<compile_context>
chip_gen: v7x
topology: tpu7x:2x2x1
jax: 0.10.0
libtpu: 0.0.40
codegen_flags: <defaults>
</compile_context>

<pallas_src>
import jax
import jax.numpy as jnp
from jax import lax
from jax.experimental import pallas as pl
from jax.experimental.pallas import tpu as pltpu

H, W = 24, 32
HP, WP = H // 2, W // 2
CONV_CH = 16
CTOT = 3 * CONV_CH            # 48 (concat of the 3 branches)
T = 25                        # 5x5 tap window shared by all branches
S = HP * WP                   # 192 pooled spatial positions
FLAT = CTOT * S               # 9216 flat feature size
FC_OUT = 128
BN_EPS = 1e-5


# ----------------------------- Pallas kernels ------------------------------

def conv_relu_pool_kernel(p_ref, wc_ref, bconv_ref, out_ref):
    # p_ref: (bb*4*S, T) bf16, rows ordered (sample, quadrant, spatial)
    # wc_ref: (T, 48) bf16 BN-folded ; bconv_ref: (1, 48) f32 BN-folded
    # out_ref: (bb*S, 48) bf16
    bb = p_ref.shape[0] // (4 * S)
    z = jnp.dot(p_ref[...], wc_ref[...],
                preferred_element_type=jnp.float32)          # (bb*4S, 48) f32
    z3 = z.reshape(bb, 4 * S, CTOT)                          # sublane split, layout-free
    # 2x2/stride-2 max pool == max over the 4 contiguous quadrant row blocks.
    # Hoisted above bias+ReLU (bias is quadrant-invariant, ReLU monotone).
    m = jnp.maximum(jnp.maximum(z3[:, 0:S], z3[:, S:2 * S]),
                    jnp.maximum(z3[:, 2 * S:3 * S], z3[:, 3 * S:4 * S]))   # (bb,S,48)
    act = jnp.maximum(m + bconv_ref[...], 0.0)               # folded bias + ReLU
    out_ref[...] = act.reshape(bb * S, CTOT).astype(out_ref.dtype)


def fc_kernel(x_ref, w_ref, b_ref, o_ref):
    # x_ref: (bbf, 9216) bf16 ; w_ref: (9216, 128) bf16 resident ; b_ref: (1,128) f32
    o_ref[...] = (jnp.dot(x_ref[...], w_ref[...],
                          preferred_element_type=jnp.float32) + b_ref[...])


# ------------------------------ wrapper glue --------------------------------

def im2col_pooled_order(x):
    """x: (B,1,H,W) -> patches (B*4*S, 25) bf16, pool-quadrant-major row order."""
    b = x.shape[0]
    x2 = x[:, 0].astype(jnp.bfloat16)                   # (B, H, W) bf16 early: half traffic
    xp = jnp.pad(x2, ((0, 0), (2, 2), (2, 2)))          # pad=2 (5x5 branch window)
    taps = [xp[:, di:di + H, dj:dj + W]                 # 25 full-res tap shifts
            for di in range(5) for dj in range(5)]
    tapstack = jnp.stack(taps, axis=-1)                 # (B, H, W, 25)
    blocks = []
    for q in range(4):
        dy, dx = q // 2, q % 2
        blocks.append(tapstack[:, dy::2, dx::2, :].reshape(b, S, T))
    return jnp.concatenate(blocks, axis=1).reshape(b * 4 * S, T)


def build_combined_conv_weight(w1, w3, w5):
    """Pack 1x1 / 3x3(pad1) / 5x5(pad2) branch weights into one (25, 48) matrix."""
    wc = jnp.zeros((T, CTOT), jnp.float32)
    wc = wc.at[12, 0:CONV_CH].set(w1.reshape(CONV_CH))                   # 1x1 -> center tap
    idx3 = jnp.array([(ei + 1) * 5 + (ej + 1) for ei in range(3) for ej in range(3)])
    wc = wc.at[idx3, CONV_CH:2 * CONV_CH].set(w3.reshape(CONV_CH, 9).T)  # 3x3 -> inner taps
    wc = wc.at[:, 2 * CONV_CH:3 * CONV_CH].set(w5.reshape(CONV_CH, 25).T)
    return wc


def _divisors(n):
    return [d for d in range(1, n + 1) if n % d == 0]


def _pick_conv_block(b, cap=16):
    """Largest divisor of b <= cap, preferring >=2 grid steps (v7x dual-TC)."""
    cand = [d for d in _divisors(b) if d <= cap]
    two_step = [d for d in cand if d <= max(b // 2, 1)]
    return max(two_step) if two_step else max(cand)


def _pick_fc_block(b, cap=256):
    """FC batch block: multiple of 8 (sublane-legal) or the full batch; big M
    to amortize the resident weight; prefer >=2 grid steps when possible."""
    cand = [d for d in _divisors(b) if d <= cap and d % 8 == 0]
    if not cand:
        return b
    two_step = [d for d in cand if d <= max(b // 2, 1)]
    return max(two_step) if two_step else max(cand)


@jax.jit
def parallel_cnn_forward(x, params):
    b = x.shape[0]
    patches = im2col_pooled_order(x)                               # (B*4S, 25) bf16

    # ---- kernel 1: conv (BN folded) + quadrant max-pool + bias/ReLU ----
    bb = _pick_conv_block(b)
    pooled = pl.pallas_call(
        conv_relu_pool_kernel,
        out_shape=jax.ShapeDtypeStruct((b * S, CTOT), jnp.bfloat16),
        grid=(b // bb,),
        in_specs=[
            pl.BlockSpec((bb * 4 * S, T), lambda i: (i, 0)),
            pl.BlockSpec((T, CTOT), lambda i: (0, 0)),
            pl.BlockSpec((1, CTOT), lambda i: (0, 0)),
        ],
        out_specs=pl.BlockSpec((bb * S, CTOT), lambda i: (i, 0)),
        compiler_params=pltpu.CompilerParams(
            dimension_semantics=("parallel",),
            vmem_limit_bytes=48 * 1024 * 1024),
    )(patches, params['wc_folded_bf16'], params['bconv_folded'][None, :])

    # Free row-major relabel in HBM: (B*S, 48) -> (B, 9216), s-major c-minor.
    feat = pooled.reshape(b, FLAT)                                 # bf16

    # ---- kernel 2: FC, bf16 operands, f32 accumulate, resident weight ----
    bbf = _pick_fc_block(b)
    out = pl.pallas_call(
        fc_kernel,
        out_shape=jax.ShapeDtypeStruct((b, FC_OUT), jnp.float32),
        grid=(b // bbf,),
        in_specs=[
            pl.BlockSpec((bbf, FLAT), lambda i: (i, 0)),
            pl.BlockSpec((FLAT, FC_OUT), lambda i: (0, 0)),   # constant index: DMA'd once
            pl.BlockSpec((1, FC_OUT), lambda i: (0, 0)),
        ],
        out_specs=pl.BlockSpec((bbf, FC_OUT), lambda i: (i, 0)),
        compiler_params=pltpu.CompilerParams(
            dimension_semantics=("parallel",),
            vmem_limit_bytes=32 * 1024 * 1024),
    )(feat, params['wfc_bf16'], params['bfc'][None, :])
    return out


# ------------------------- deterministic parameters -------------------------

def init_params(key):
    ks = jax.random.split(key, 12)

    def u(k, shape, fan_in):
        bound = 1.0 / (fan_in ** 0.5)
        return jax.random.uniform(k, shape, jnp.float32, -bound, bound)

    w1 = u(ks[0], (CONV_CH, 1, 1, 1), 1)
    b1 = u(ks[1], (CONV_CH,), 1)
    w3 = u(ks[2], (CONV_CH, 1, 3, 3), 9)
    b3 = u(ks[3], (CONV_CH,), 9)
    w5 = u(ks[4], (CONV_CH, 1, 5, 5), 25)
    b5 = u(ks[5], (CONV_CH,), 25)
    # BatchNorm params (inference mode). Order: [1x1 | 3x3 | 5x5] branches.
    gamma = jax.random.uniform(ks[6], (CTOT,), jnp.float32, 0.5, 1.5)
    beta = jax.random.uniform(ks[7], (CTOT,), jnp.float32, -0.5, 0.5)
    mean = jax.random.uniform(ks[8], (CTOT,), jnp.float32, -0.5, 0.5)
    var = jax.random.uniform(ks[9], (CTOT,), jnp.float32, 0.5, 1.5)
    wfc = u(ks[10], (FC_OUT, FLAT), FLAT)
    bfc = u(ks[11], (FC_OUT,), FLAT)

    # ---- kernel-side derived params (setup glue) ----
    wc = build_combined_conv_weight(w1, w3, w5)
    bconv = jnp.concatenate([b1, b3, b5])
    # Fold BatchNorm (inference affine) into conv weight + bias.
    scale = gamma / jnp.sqrt(var + BN_EPS)
    shift = beta - mean * scale
    wc_folded_bf16 = (wc * scale[None, :]).astype(jnp.bfloat16)
    bconv_folded = bconv * scale + shift
    # Permute FC weight: torch flat index c*S + s  ->  ours s*CTOT + c, then bf16.
    wfc_perm = wfc.reshape(FC_OUT, CTOT, S).transpose(2, 1, 0).reshape(FLAT, FC_OUT)
    wfc_bf16 = wfc_perm.astype(jnp.bfloat16)

    return dict(w1=w1, b1=b1, w3=w3, b3=b3, w5=w5, b5=b5,
                gamma=gamma, beta=beta, mean=mean, var=var,
                wfc=wfc, bfc=bfc,
                wc_folded_bf16=wc_folded_bf16, bconv_folded=bconv_folded,
                wfc_bf16=wfc_bf16)


# ------------------------------ pure-JAX reference ---------------------------

def reference_forward(x, params):
    def branch(w, bias, g, be, m, v, pad):
        y = lax.conv_general_dilated(
            x, w, window_strides=(1, 1), padding=[(pad, pad), (pad, pad)],
            dimension_numbers=('NCHW', 'OIHW', 'NCHW'))
        y = y + bias.reshape(1, -1, 1, 1)
        y = (y - m.reshape(1, -1, 1, 1)) * (
            g.reshape(1, -1, 1, 1) / jnp.sqrt(v.reshape(1, -1, 1, 1) + BN_EPS)
        ) + be.reshape(1, -1, 1, 1)
        y = jnp.maximum(y, 0.0)
        return lax.reduce_window(y, -jnp.inf, lax.max,
                                 (1, 1, 2, 2), (1, 1, 2, 2), 'VALID')

    g, be, m, v = params['gamma'], params['beta'], params['mean'], params['var']
    outs = []
    for idx, (w, bias, pad) in enumerate([(params['w1'], params['b1'], 0),
                                          (params['w3'], params['b3'], 1),
                                          (params['w5'], params['b5'], 2)]):
        sl = slice(idx * CONV_CH, (idx + 1) * CONV_CH)
        outs.append(branch(w, bias, g[sl], be[sl], m[sl], v[sl], pad))
    feat = jnp.concatenate(outs, axis=1)                  # (B, 48, 12, 16)
    flat = feat.reshape(x.shape[0], -1)                   # (B, 9216) channel-major
    return flat @ params['wfc'].T + params['bfc']


if __name__ == "__main__":
    key = jax.random.PRNGKey(0)
    pkey, xkey = jax.random.split(key)
    params = init_params(pkey)
    x = jax.random.normal(xkey, (2, 1, H, W), jnp.float32)

    out = parallel_cnn_forward(x, params)
    out = jax.block_until_ready(out)
    assert out.shape == (2, FC_OUT)

    ref = reference_forward(x, params)
    max_err = float(jnp.max(jnp.abs(out - ref)))
    assert max_err < 5e-2, f"max abs error {max_err}"
    print("KERNEL_OK")
</pallas_src>

<mosaic_0001>
module attributes {stable_mosaic.version = 11 : i64} {
  func.func @conv_relu_pool_kernel(%arg0: i32, %arg1: memref<768x25xbf16, #tpu.memory_space<vmem>>, %arg2: memref<25x48xbf16, #tpu.memory_space<vmem>>, %arg3: memref<1x48xf32, #tpu.memory_space<vmem>>, %arg4: memref<192x48xbf16, #tpu.memory_space<vmem>>) attributes {dimension_semantics = [#tpu.dimension_semantics<parallel>], iteration_bounds = array<i64: 2>, scalar_prefetch = 0 : i64, scratch_operands = 0 : i64, tpu.core_type = #tpu.core_type<tc>, window_params = [{transform_indices = @transform_0, window_bounds = array<i64: 768, 25>}, {pipeline_mode = #tpu.pipeline_mode<synchronous>, transform_indices = @transform_1, window_bounds = array<i64: 25, 48>}, {pipeline_mode = #tpu.pipeline_mode<synchronous>, transform_indices = @transform_2, window_bounds = array<i64: 1, 48>}, {transform_indices = @transform_3, window_bounds = array<i64: 192, 48>}]} {
    %c0 = arith.constant 0 : index
    %c0_0 = arith.constant 0 : index
    %0 = vector.load %arg1[%c0, %c0_0] : memref<768x25xbf16, #tpu.memory_space<vmem>>, vector<768x25xbf16>
    %c0_1 = arith.constant 0 : index
    %c0_2 = arith.constant 0 : index
    %1 = vector.load %arg2[%c0_1, %c0_2] : memref<25x48xbf16, #tpu.memory_space<vmem>>, vector<25x48xbf16>
    %cst = arith.constant dense<0.000000e+00> : vector<768x48xf32>
    %2 = tpu.matmul %0, %1, %cst {dimension_numbers = #tpu.dot_dimension_numbers<[1], [0], [0], [1], [0, 0, 1, 1], [], []>} : vector<768x25xbf16>, vector<25x48xbf16>, vector<768x48xf32> -> vector<768x48xf32>
    %3 = vector.shape_cast %2 : vector<768x48xf32> to vector<1x768x48xf32>
    %4 = vector.extract_strided_slice %3 {offsets = [0, 0, 0], sizes = [1, 192, 48], strides = [1, 1, 1]} : vector<1x768x48xf32> to vector<1x192x48xf32>
    %5 = vector.extract_strided_slice %3 {offsets = [0, 192, 0], sizes = [1, 192, 48], strides = [1, 1, 1]} : vector<1x768x48xf32> to vector<1x192x48xf32>
    %6 = arith.maximumf %4, %5 : vector<1x192x48xf32>
    %7 = vector.extract_strided_slice %3 {offsets = [0, 384, 0], sizes = [1, 192, 48], strides = [1, 1, 1]} : vector<1x768x48xf32> to vector<1x192x48xf32>
    %8 = vector.extract_strided_slice %3 {offsets = [0, 576, 0], sizes = [1, 192, 48], strides = [1, 1, 1]} : vector<1x768x48xf32> to vector<1x192x48xf32>
    %9 = arith.maximumf %7, %8 : vector<1x192x48xf32>
    %10 = arith.maximumf %6, %9 : vector<1x192x48xf32>
    %c0_3 = arith.constant 0 : index
    %c0_4 = arith.constant 0 : index
    %11 = vector.load %arg3[%c0_3, %c0_4] : memref<1x48xf32, #tpu.memory_space<vmem>>, vector<1x48xf32>
    %12 = vector.shape_cast %11 : vector<1x48xf32> to vector<1x1x48xf32>
    %13 = vector.broadcast %12 : vector<1x1x48xf32> to vector<1x192x48xf32>
    %14 = arith.addf %10, %13 : vector<1x192x48xf32>
    %cst_5 = arith.constant 0.000000e+00 : f32
    %15 = vector.broadcast %cst_5 : f32 to vector<1x192x48xf32>
    %16 = arith.maximumf %14, %15 : vector<1x192x48xf32>
    %17 = vector.shape_cast %16 : vector<1x192x48xf32> to vector<192x48xf32>
    %18 = arith.truncf %17 : vector<192x48xf32> to vector<192x48xbf16>
    %c0_6 = arith.constant 0 : index
    %c0_7 = arith.constant 0 : index
    %19 = vector.load %arg4[%c0_6, %c0_7] : memref<192x48xbf16, #tpu.memory_space<vmem>>, vector<192x48xbf16>
    tpu.vector_store %arg4[%c0_6, %c0_7], %18 {strides = array<i32>} : memref<192x48xbf16, #tpu.memory_space<vmem>>, vector<192x48xbf16>,
    return
  }
  func.func @transform_0(%arg0: i32) -> (i32, i32) {
    %c0_i32 = arith.constant 0 : i32
    %c0_i32_0 = arith.constant 0 : i32
    return %arg0, %c0_i32 : i32, i32
  }
  func.func @transform_1(%arg0: i32) -> (i32, i32) {
    %c0_i32 = arith.constant 0 : i32
    %c0_i32_0 = arith.constant 0 : i32
    %c0_i32_1 = arith.constant 0 : i32
    return %c0_i32, %c0_i32_0 : i32, i32
  }
  func.func @transform_2(%arg0: i32) -> (i32, i32) {
    %c0_i32 = arith.constant 0 : i32
    %c0_i32_0 = arith.constant 0 : i32
    %c0_i32_1 = arith.constant 0 : i32
    return %c0_i32, %c0_i32_0 : i32, i32
  }
  func.func @transform_3(%arg0: i32) -> (i32, i32) {
    %c0_i32 = arith.constant 0 : i32
    %c0_i32_0 = arith.constant 0 : i32
    return %arg0, %c0_i32 : i32, i32
  }
}

module attributes {stable_mosaic.version = 11 : i64} {
  func.func @fc_kernel(%arg0: i32, %arg1: memref<2x9216xbf16, #tpu.memory_space<vmem>>, %arg2: memref<9216x128xbf16, #tpu.memory_space<vmem>>, %arg3: memref<1x128xf32, #tpu.memory_space<vmem>>, %arg4: memref<2x128xf32, #tpu.memory_space<vmem>>) attributes {dimension_semantics = [#tpu.dimension_semantics<parallel>], iteration_bounds = array<i64: 1>, scalar_prefetch = 0 : i64, scratch_operands = 0 : i64, tpu.core_type = #tpu.core_type<tc>, window_params = [{transform_indices = @transform_0, window_bounds = array<i64: 2, 9216>}, {pipeline_mode = #tpu.pipeline_mode<synchronous>, transform_indices = @transform_1, window_bounds = array<i64: 9216, 128>}, {pipeline_mode = #tpu.pipeline_mode<synchronous>, transform_indices = @transform_2, window_bounds = array<i64: 1, 128>}, {transform_indices = @transform_3, window_bounds = array<i64: 2, 128>}]} {
    %c0 = arith.constant 0 : index
    %c0_0 = arith.constant 0 : index
    %0 = vector.load %arg1[%c0, %c0_0] : memref<2x9216xbf16, #tpu.memory_space<vmem>>, vector<2x9216xbf16>
    %c0_1 = arith.constant 0 : index
    %c0_2 = arith.constant 0 : index
    %1 = vector.load %arg2[%c0_1, %c0_2] : memref<9216x128xbf16, #tpu.memory_space<vmem>>, vector<9216x128xbf16>
    %cst = arith.constant dense<0.000000e+00> : vector<2x128xf32>
    %2 = tpu.matmul %0, %1, %cst {dimension_numbers = #tpu.dot_dimension_numbers<[1], [0], [0], [1], [0, 0, 1, 1], [], []>} : vector<2x9216xbf16>, vector<9216x128xbf16>, vector<2x128xf32> -> vector<2x128xf32>
    %c0_3 = arith.constant 0 : index
    %c0_4 = arith.constant 0 : index
    %3 = vector.load %arg3[%c0_3, %c0_4] : memref<1x128xf32, #tpu.memory_space<vmem>>, vector<1x128xf32>
    %4 = vector.broadcast %3 : vector<1x128xf32> to vector<2x128xf32>
    %5 = arith.addf %2, %4 : vector<2x128xf32>
    %c0_5 = arith.constant 0 : index
    %c0_6 = arith.constant 0 : index
    %6 = vector.load %arg4[%c0_5, %c0_6] : memref<2x128xf32, #tpu.memory_space<vmem>>, vector<2x128xf32>
    tpu.vector_store %arg4[%c0_5, %c0_6], %5 {strides = array<i32>} : memref<2x128xf32, #tpu.memory_space<vmem>>, vector<2x128xf32>,
    return
  }
  func.func @transform_0(%arg0: i32) -> (i32, i32) {
    %c0_i32 = arith.constant 0 : i32
    %c0_i32_0 = arith.constant 0 : i32
    return %arg0, %c0_i32 : i32, i32
  }
  func.func @transform_1(%arg0: i32) -> (i32, i32) {
    %c0_i32 = arith.constant 0 : i32
    %c0_i32_0 = arith.constant 0 : i32
    %c0_i32_1 = arith.constant 0 : i32
    return %c0_i32, %c0_i32_0 : i32, i32
  }
  func.func @transform_2(%arg0: i32) -> (i32, i32) {
    %c0_i32 = arith.constant 0 : i32
    %c0_i32_0 = arith.constant 0 : i32
    %c0_i32_1 = arith.constant 0 : i32
    return %c0_i32, %c0_i32_0 : i32, i32
  }
  func.func @transform_3(%arg0: i32) -> (i32, i32) {
    %c0_i32 = arith.constant 0 : i32
    %c0_i32_0 = arith.constant 0 : i32
    return %arg0, %c0_i32 : i32, i32
  }
}

</mosaic_0001>

<bundles_post_ra>
// kernel: parallel_cnn_forward.2
= control target key start
LH: loop header
LB: loop body
LE: loop exit
PB: predicated region body
PF: predicated region fallthrough
CT: control target
= control target key end

     0   :  { %s1797_s12 = smov 0   ;;  %s2145_s0 = inlined_call_operand.vmem [shape: bf16[1536,25], index: 0, kind: input, shape index: {}]   ;;  %s2146_s1 = inlined_call_operand.vmem [shape: bf16[25,48], index: 1, kind: input, shape index: {}]   ;;  %s2147_s2 = inlined_call_operand.vmem [shape: f32[1,48], index: 2, kind: input, shape index: {}]   ;;  %s2148_s3 = inlined_call_operand.vmem [shape: bf16[384,48], index: 3, kind: output, shape index: {}]  }
   0x1 LB: > { %s1399_s13 = sadd.s32 4294967295, %s1774_s12   ;;  %p1403_p0 = scmp.ge.s32.totalorder %s1774_s12, 1  ;;  %s1774_s12 = sphi %s1797_s12, %s13_s12  }
   0x2   : > { %p138_p1 = scmp.lt.s32.totalorder %s1774_s12, 3 }
   0x4   : > { %p139_p2 = pnand %p1403_p0, %p138_p1 }
   0x5   : > { %v1718_v0 = vld [vmem:[%s2146_s1] sm:$0xff] (!%p139_p2)   ;;  %vm671_vm0 = vcmask (!%p139_p2), 1043456   ;;  %v1719_v1 = vld [vmem:[%s2146_s1 + $0x8] sm:$0x1f] (!%p139_p2)   ;;  %vm672_vm1 = vcmask (!%p139_p2), 1044480   ;;  %s162_s18 = smul.u32 (!%p139_p2), 96, %s1399_s13 }
   0x6   : > { %142 = sbr.rel (%p139_p2) target bundleno = 333 (0x14d), region = 32  ;;  %1605 = vmatprep.subr.bf16.mxu0 (!%p139_p2), %v1718_v0  ;;  %1705 = vmatprep.subr.bf16.mxu1 (!%p139_p2), %v1718_v0  ;;  %v1776_v2 = vmov (!%p139_p2), 65535   ;;  %vm526_vm2 = vcmask (!%p139_p2), 203776   ;;  %vm1318_vm3 = vcmask (!%p139_p2), 388096  }
   0x7   : > { %1606 = vmatpush3.bf16.msra.mxu0 (!%p139_p2), %v1718_v0  ;;  %1707 = vmatpush3.bf16.msra.mxu1 (!%p139_p2), %v1718_v0  ;;  %v673_v3 = vsel (!%p139_p2), %vm671_vm0, 4294967295, %v1776_v2  ;;  %p163_p3 = scmp.lt.s32.totalorder (!%p139_p2), %s162_s18, 191  ;;  %s168_s23 = smul.u32 (!%p139_p2), 24, %s1399_s13 }
   0x8   : > { %v674_v4 = vsel (!%p139_p2), %vm672_vm1, %v673_v3, 0 }
   0x9   : > { %v676_v5 = vand.u32 (!%p139_p2), %v1719_v1, %v674_v4  ;;  %p169_p4 = scmp.lt.s32.totalorder (!%p139_p2), %s168_s23, 47 }
   0xb   : > { %1607 = vmatprep.subr.bf16.mxu0 (!%p139_p2), %v676_v5  ;;  %1706 = vmatprep.subr.bf16.mxu1 (!%p139_p2), %v676_v5 }
   0xc   : > { %1608 = vmatpush3.bf16.msra.mxu0 (!%p139_p2), %v676_v5  ;;  %1708 = vmatpush3.bf16.msra.mxu1 (!%p139_p2), %v676_v5 }
   0xd   : > { %s2150_s18 = smov (!%p163_p3, %s162_s18), 191  ;;  %s2152_s23 = smov (!%p169_p4, %s168_s23), 47 }
   0xe   : > { %s1404_s19 = sshll.u32 %s2150_s18, 2  ;;  %s1405_s26 = sshll.u32 %s2152_s23, 2 }
   0xf   : > { %s1816_s22 = scalar_lea.vmem %s2145_s0, %s1404_s19  ;;  %s2031_s29 = scalar_lea.vmem %s2148_s3, %s1405_s26 }
  0x10   : > { %v1720_v6 = vld [vmem:[%s1816_s22] sm:$0xff]   ;;  %v1722_v8 = vld [vmem:[%s1816_s22 + $0x8] sm:$0xff]   ;;  %v1724_v10 = vld [vmem:[%s1816_s22 + $0x10] sm:$0xff]  }
  0x11   : > { %v1721_v7 = vld [vmem:[%s1816_s22 + $0xc0] sm:$0xff]   ;;  %1609 = vmatprep.mubr.msk.bf16.mxu0 %vm526_vm2, %v1720_v6  ;;  %v1723_v9 = vld [vmem:[%s1816_s22 + $0xc8] sm:$0xff]   ;;  %v1725_v11 = vld [vmem:[%s1816_s22 + $0xd0] sm:$0xff]  }
  0x12   : > { %1657 = vmatprep.mubr.msk.bf16.mxu1 %vm526_vm2, %v1721_v7  ;;  %1610 = vmatmul.mubr.msk.bf16.vlgmr.msra.gmra.mrb[0].mxu0 %vm526_vm2, %v1722_v8  ;;  %v1726_v12 = vld [vmem:[%s1816_s22 + $0x18] sm:$0xff]   ;;  %v1728_v14 = vld [vmem:[%s1816_s22 + $0x20] sm:$0xff]   ;;  %v1730_v16 = vld [vmem:[%s1816_s22 + $0x28] sm:$0xff]  }
  0x13   : > { %1658 = vmatmul.mubr.msk.bf16.vlgmr.msra.gmra.mrb[0].mxu1 %vm526_vm2, %v1723_v9  ;;  %1613 = vmatprep.mubr.msk.bf16.mxu0 %vm526_vm2, %v1724_v10  ;;  %v1727_v13 = vld [vmem:[%s1816_s22 + $0xd8] sm:$0xff]   ;;  %v1729_v15 = vld [vmem:[%s1816_s22 + $0xe0] sm:$0xff]   ;;  %v1731_v17 = vld [vmem:[%s1816_s22 + $0xe8] sm:$0xff]  }
  0x14   : > { %1661 = vmatprep.mubr.msk.bf16.mxu1 %vm526_vm2, %v1725_v11  ;;  %v1732_v18 = vld [vmem:[%s1816_s22 + $0x30] sm:$0xff]   ;;  %v1734_v20 = vld [vmem:[%s1816_s22 + $0x38] sm:$0xff]   ;;  %v1736_v22 = vld [vmem:[%s1816_s22 + $0x40] sm:$0xff]  }
  0x15   : > { %v1733_v19 = vld [vmem:[%s1816_s22 + $0xf0] sm:$0xff]   ;;  %v1735_v21 = vld [vmem:[%s1816_s22 + $0xf8] sm:$0xff]   ;;  %v1737_v23 = vld [vmem:[%s1816_s22 + $0x100] sm:$0xff]  }
  0x16   : > { %v1738_v24 = vld [vmem:[%s1816_s22 + $0x48] sm:$0xff]   ;;  %v1740_v26 = vld [vmem:[%s1816_s22 + $0x50] sm:$0xff]   ;;  %v1742_v28 = vld [vmem:[%s1816_s22 + $0x58] sm:$0xff]  }
  0x17   : > { %v1739_v25 = vld [vmem:[%s1816_s22 + $0x108] sm:$0xff]   ;;  %v1741_v27 = vld [vmem:[%s1816_s22 + $0x110] sm:$0xff]   ;;  %v1743_v29 = vld [vmem:[%s1816_s22 + $0x118] sm:$0xff]  }
  0x18   : > { %v1744_v30 = vld [vmem:[%s1816_s22 + $0x60] sm:$0xff]   ;;  %v1746_v32 = vld [vmem:[%s1816_s22 + $0x68] sm:$0xff]   ;;  %v1748_v34 = vld [vmem:[%s1816_s22 + $0x70] sm:$0xff]  }
  0x19   : > { %v1745_v31 = vld [vmem:[%s1816_s22 + $0x120] sm:$0xff]   ;;  %v1747_v33 = vld [vmem:[%s1816_s22 + $0x128] sm:$0xff]   ;;  %v1749_v35 = vld [vmem:[%s1816_s22 + $0x130] sm:$0xff]  }
  0x1a   : > { %1614 = vmatmul.mubr.msk.bf16.gmra.mrb[4].mxu0 %vm526_vm2, %v1726_v12  ;;  %v1750_v36 = vld [vmem:[%s1816_s22 + $0x78] sm:$0xff]   ;;  %v1752_v38 = vld [vmem:[%s1816_s22 + $0x80] sm:$0xff]   ;;  %v1754_v40 = vld [vmem:[%s1816_s22 + $0x88] sm:$0xff]  }
  0x1b   : > { %1662 = vmatmul.mubr.msk.bf16.gmra.mrb[4].mxu1 %vm526_vm2, %v1727_v13  ;;  %1617 = vmatprep.mubr.msk.bf16.mxu0 %vm526_vm2, %v1728_v14  ;;  %v1751_v37 = vld [vmem:[%s1816_s22 + $0x138] sm:$0xff]   ;;  %v1753_v39 = vld [vmem:[%s1816_s22 + $0x140] sm:$0xff]   ;;  %v1755_v41 = vld [vmem:[%s1816_s22 + $0x148] sm:$0xff]  }
  0x1c   : > { %1665 = vmatprep.mubr.msk.bf16.mxu1 %vm526_vm2, %v1729_v15  ;;  %v1756_v42 = vld [vmem:[%s1816_s22 + $0x90] sm:$0xff]   ;;  %v1758_v44 = vld [vmem:[%s1816_s22 + $0x98] sm:$0xff]   ;;  %v1760_v46 = vld [vmem:[%s1816_s22 + $0xa0] sm:$0xff]  }
  0x1d   : > { %v1757_v43 = vld [vmem:[%s1816_s22 + $0x150] sm:$0xff]   ;;  %v1759_v45 = vld [vmem:[%s1816_s22 + $0x158] sm:$0xff]   ;;  %v1761_v47 = vld [vmem:[%s1816_s22 + $0x160] sm:$0xff]  }
  0x1e   : > { %v1762_v48 = vld [vmem:[%s1816_s22 + $0xa8] sm:$0xff]   ;;  %v1764_v50 = vld [vmem:[%s1816_s22 + $0xb0] sm:$0xff]   ;;  %v1766_v52 = vld [vmem:[%s1816_s22 + $0xb8] sm:$0xff]  }
  0x1f   : > { %v1763_v49 = vld [vmem:[%s1816_s22 + $0x168] sm:$0xff]   ;;  %v1765_v51 = vld [vmem:[%s1816_s22 + $0x170] sm:$0xff]   ;;  %v1767_v53 = vld [vmem:[%s1816_s22 + $0x178] sm:$0xff]  }
  0x22   : > { %1618 = vmatmul.mubr.msk.bf16.gmra.mrb[8].mxu0 %vm526_vm2, %v1730_v16 }
  0x23   : > { %1666 = vmatmul.mubr.msk.bf16.gmra.mrb[8].mxu1 %vm526_vm2, %v1731_v17  ;;  %1621 = vmatprep.mubr.msk.bf16.mxu0 %vm526_vm2, %v1732_v18 }
  0x24   : > { %1669 = vmatprep.mubr.msk.bf16.mxu1 %vm526_vm2, %v1733_v19 }
  0x2a   : > { %1622 = vmatmul.mubr.msk.bf16.gmra.mrb[12].mxu0 %vm526_vm2, %v1734_v20 }
  0x2b   : > { %1670 = vmatmul.mubr.msk.bf16.gmra.mrb[12].mxu1 %vm526_vm2, %v1735_v21  ;;  %1625 = vmatprep.mubr.msk.bf16.mxu0 %vm526_vm2, %v1736_v22 }
  0x2c   : > { %1673 = vmatprep.mubr.msk.bf16.mxu1 %vm526_vm2, %v1737_v23 }
  0x32   : > { %1626 = vmatmul.mubr.msk.bf16.gmra.mrb[16].mxu0 %vm526_vm2, %v1738_v24 }
  0x33   : > { %1674 = vmatmul.mubr.msk.bf16.gmra.mrb[16].mxu1 %vm526_vm2, %v1739_v25  ;;  %1629 = vmatprep.mubr.msk.bf16.mxu0 %vm526_vm2, %v1740_v26 }
  0x34   : > { %1677 = vmatprep.mubr.msk.bf16.mxu1 %vm526_vm2, %v1741_v27 }
  0x3a   : > { %1630 = vmatmul.mubr.msk.bf16.gmra.mrb[20].mxu0 %vm526_vm2, %v1742_v28 }
  0x3b   : > { %1678 = vmatmul.mubr.msk.bf16.gmra.mrb[20].mxu1 %vm526_vm2, %v1743_v29  ;;  %1633 = vmatprep.mubr.msk.bf16.mxu0 %vm526_vm2, %v1744_v30 }
  0x3c   : > { %1681 = vmatprep.mubr.msk.bf16.mxu1 %vm526_vm2, %v1745_v31 }
  0x42   : > { %1634 = vmatmul.mubr.msk.bf16.gmra.mrb[24].mxu0 %vm526_vm2, %v1746_v32 }
  0x43   : > { %1682 = vmatmul.mubr.msk.bf16.gmra.mrb[24].mxu1 %vm526_vm2, %v1747_v33  ;;  %1637 = vmatprep.mubr.msk.bf16.mxu0 %vm526_vm2, %v1748_v34 }
  0x44   : > { %1685 = vmatprep.mubr.msk.bf16.mxu1 %vm526_vm2, %v1749_v35 }
  0x4a   : > { %1638 = vmatmul.mubr.msk.bf16.gmra.mrb[28].mxu0 %vm526_vm2, %v1750_v36 }
  0x4b   : > { %1686 = vmatmul.mubr.msk.bf16.gmra.mrb[28].mxu1 %vm526_vm2, %v1751_v37  ;;  %1641 = vmatprep.mubr.msk.bf16.mxu0 %vm526_vm2, %v1752_v38 }
  0x4c   : > { %1689 = vmatprep.mubr.msk.bf16.mxu1 %vm526_vm2, %v1753_v39 }
  0x52   : > { %1642 = vmatmul.mubr.msk.bf16.gmra.mrb[32].mxu0 %vm526_vm2, %v1754_v40 }
  0x53   : > { %1690 = vmatmul.mubr.msk.bf16.gmra.mrb[32].mxu1 %vm526_vm2, %v1755_v41  ;;  %1645 = vmatprep.mubr.msk.bf16.mxu0 %vm526_vm2, %v1756_v42 }
  0x54   : > { %1693 = vmatprep.mubr.msk.bf16.mxu1 %vm526_vm2, %v1757_v43 }
  0x5a   : > { %1646 = vmatmul.mubr.msk.bf16.gmra.mrb[36].mxu0 %vm526_vm2, %v1758_v44 }
  0x5b   : > { %1694 = vmatmul.mubr.msk.bf16.gmra.mrb[36].mxu1 %vm526_vm2, %v1759_v45  ;;  %1649 = vmatprep.mubr.msk.bf16.mxu0 %vm526_vm2, %v1760_v46  ;;  %v2018_v46 = vld [vmem:[%s2147_s2] ss:$0 sm:$0xff] }
  0x5c   : > { %1697 = vmatprep.mubr.msk.bf16.mxu1 %vm526_vm2, %v1761_v47 }
  0x62   : > { %1650 = vmatmul.mubr.msk.bf16.gmra.mrb[40].mxu0 %vm526_vm2, %v1762_v48 }
  0x63   : > { %1698 = vmatmul.mubr.msk.bf16.gmra.mrb[40].mxu1 %vm526_vm2, %v1763_v49  ;;  %1653 = vmatprep.mubr.msk.bf16.mxu0 %vm526_vm2, %v1764_v50 }
  0x64   : > { %1701 = vmatprep.mubr.msk.bf16.mxu1 %vm526_vm2, %v1765_v51 }
  0x6a   : > { %1654 = vmatmul.mubr.msk.bf16.gmra.mrb[44].mxu0 %vm526_vm2, %v1766_v52 }
  0x6b   : > { %1702 = vmatmul.mubr.msk.bf16.gmra.mrb[44].mxu1 %vm526_vm2, %v1767_v53 }
  0xe5   : > { %v1914_v54 = vpop.f32.mrb[0].mxu0 }
  0xe6   : > { %v1916_v55 = vpop.f32.mrb[0].mxu1  ;;  %v1918_v56 = vpop.f32.mrb[1].mxu0 }
  0xe7   : > { %v1920_v57 = vpop.f32.mrb[1].mxu1  ;;  %v1922_v58 = vpop.f32.mrb[2].mxu0 }
  0xe8   : > { %v1924_v59 = vpop.f32.mrb[2].mxu1  ;;  %v1926_v60 = vpop.f32.mrb[3].mxu0 }
  0xe9   : > { %v1928_v61 = vpop.f32.mrb[3].mxu1 }
  0xed   : > { %v1930_v62 = vpop.f32.mrb[4].mxu0 }
  0xee   : > { %v1932_v63 = vpop.f32.mrb[4].mxu1  ;;  %v1934_v0 = vpop.f32.mrb[5].mxu0 }
  0xef   : > { %v1936_v1 = vpop.f32.mrb[5].mxu1  ;;  %v1938_v2 = vpop.f32.mrb[6].mxu0 }
  0xf0   : > { %v1940_v3 = vpop.f32.mrb[6].mxu1  ;;  %v1942_v4 = vpop.f32.mrb[7].mxu0 }
  0xf1   : > { %v1944_v5 = vpop.f32.mrb[7].mxu1 }
  0xf5   : > { %v1946_v6 = vpop.f32.mrb[8].mxu0 }
  0xf6   : > { %v1948_v7 = vpop.f32.mrb[8].mxu1  ;;  %v1950_v8 = vpop.f32.mrb[9].mxu0 }
  0xf7   : > { %v1952_v9 = vpop.f32.mrb[9].mxu1  ;;  %v1954_v10 = vpop.f32.mrb[10].mxu0 }
  0xf8   : > { %v1956_v11 = vpop.f32.mrb[10].mxu1  ;;  %v1958_v12 = vpop.f32.mrb[11].mxu0 }
  0xf9   : > { %v1960_v13 = vpop.f32.mrb[11].mxu1 }
  0xfd   : > { %v1962_v14 = vpop.f32.mrb[12].mxu0 }
  0xfe   : > { %v1964_v15 = vpop.f32.mrb[12].mxu1  ;;  %v1966_v16 = vpop.f32.mrb[13].mxu0 }
  0xff   : > { %v1968_v17 = vpop.f32.mrb[13].mxu1  ;;  %v1970_v18 = vpop.f32.mrb[14].mxu0 }
 0x100   : > { %v1972_v19 = vpop.f32.mrb[14].mxu1  ;;  %v1974_v20 = vpop.f32.mrb[15].mxu0 }
 0x101   : > { %v1976_v21 = vpop.f32.mrb[15].mxu1 }
 0x105   : > { %v1978_v22 = vpop.f32.mrb[16].mxu0 }
 0x106   : > { %v1980_v23 = vpop.f32.mrb[16].mxu1  ;;  %v1982_v24 = vpop.f32.mrb[17].mxu0 }
 0x107   : > { %v1984_v25 = vpop.f32.mrb[17].mxu1  ;;  %v1986_v26 = vpop.f32.mrb[18].mxu0 }
 0x108   : > { %v1988_v27 = vpop.f32.mrb[18].mxu1  ;;  %v1990_v28 = vpop.f32.mrb[19].mxu0 }
 0x109   : > { %v1992_v29 = vpop.f32.mrb[19].mxu1 }
 0x10d   : > { %v1994_v30 = vpop.f32.mrb[20].mxu0 }
 0x10e   : > { %v1996_v31 = vpop.f32.mrb[20].mxu1  ;;  %v1998_v32 = vpop.f32.mrb[21].mxu0 }
 0x10f   : > { %v2000_v33 = vpop.f32.mrb[21].mxu1  ;;  %v2002_v34 = vpop.f32.mrb[22].mxu0 }
 0x110   : > { %v2006_v35 = vpop.f32.mrb[22].mxu1  ;;  %v2008_v36 = vpop.f32.mrb[23].mxu0 }
 0x111   : > { %v2010_v37 = vpop.f32.mrb[23].mxu1 }
 0x115   : > { %v1635_v38 = vpop.f32.mrb[24].mxu0 }
 0x116   : > { %v1097_v39 = vmax.f32 %v1914_v54, %v1635_v38  ;;  %v1683_v40 = vpop.f32.mrb[24].mxu1  ;;  %v808_v41 = vpop.f32.mrb[25].mxu0 }
 0x117   : > { %v1121_v42 = vmax.f32 %v1916_v55, %v1683_v40  ;;  %v1095_v43 = vmax.f32 %v1918_v56, %v808_v41  ;;  %v1000_v44 = vpop.f32.mrb[25].mxu1  ;;  %v1636_v45 = vpop.f32.mrb[26].mxu0 }
 0x118   : > { %v1119_v47 = vmax.f32 %v1920_v57, %v1000_v44  ;;  %v1098_v48 = vmax.f32 %v1922_v58, %v1636_v45  ;;  %v1684_v49 = vpop.f32.mrb[26].mxu1  ;;  %v811_v50 = vpop.f32.mrb[27].mxu0 }
 0x119   : > { %v1145_v51 = vmax.f32 %v1097_v39, %v1121_v42  ;;  %v1122_v52 = vmax.f32 %v1924_v59, %v1684_v49  ;;  %v1096_v53 = vmax.f32 %v1926_v60, %v811_v50  ;;  %v1003_v54 = vpop.f32.mrb[27].mxu1 }
 0x11a   : > { %v1143_v55 = vmax.f32 %v1095_v43, %v1119_v47  ;;  %v1120_v56 = vmax.f32 %v1928_v61, %v1003_v54 }
 0x11b   : > { %v1176_v38 = vadd.f32 %v2018_v46, %v1145_v51  ;;  %v1146_v40 = vmax.f32 %v1098_v48, %v1122_v52 }
 0x11c   : > { %v1174_v41 = vadd.f32 %v2018_v46, %v1143_v55  ;;  %v1144_v57 = vmax.f32 %v1096_v53, %v1120_v56 }
 0x11d   : > { %v1200_v44 = vmax.f32 %v1176_v38, 0.0  ;;  %v1177_v58 = vadd.f32 %v2018_v46, %v1146_v40  ;;  %v1639_v45 = vpop.f32.mrb[28].mxu0 }
 0x11e   : > { %v1198_v59 = vmax.f32 %v1174_v41, 0.0  ;;  %v1175_v60 = vadd.f32 %v2018_v46, %v1144_v57  ;;  %v1101_v61 = vmax.f32 %v1930_v62, %v1639_v45  ;;  %v1687_v39 = vpop.f32.mrb[28].mxu1  ;;  %v824_v42 = vpop.f32.mrb[29].mxu0 }
 0x11f   : > { %v1533_v43 = vpack.c.bf16 %v1200_v44, %v1200_v44  ;;  %v1201_v47 = vmax.f32 %v1177_v58, 0.0  ;;  %v1125_v48 = vmax.f32 %v1932_v63, %v1687_v39  ;;  %v1099_v49 = vmax.f32 %v1934_v0, %v824_v42  ;;  %v1016_v50 = vpop.f32.mrb[29].mxu1  ;;  %v1640_v51 = vpop.f32.mrb[30].mxu0 }
 0x120   : > { %v1531_v52 = vpack.c.bf16 %v1198_v59, %v1198_v59  ;;  %v1199_v53 = vmax.f32 %v1175_v60, 0.0  ;;  %v1123_v54 = vmax.f32 %v1936_v1, %v1016_v50  ;;  %v1102_v55 = vmax.f32 %v1938_v2, %v1640_v51  ;;  %v1688_v62 = vpop.f32.mrb[30].mxu1  ;;  %v827_v56 = vpop.f32.mrb[31].mxu0 }
 0x121   : > { %1321 = vst.msk [vmem:[%s2031_s29 + $0x8] sm:$0xf] %vm1318_vm3, %v1533_v43  ;;  %v1534_v38 = vpack.c.bf16 %v1201_v47, %v1201_v47  ;;  %v1149_v40 = vmax.f32 %v1101_v61, %v1125_v48  ;;  %v1126_v63 = vmax.f32 %v1940_v3, %v1688_v62  ;;  %v1100_v0 = vmax.f32 %v1942_v4, %v827_v56  ;;  %v1019_v41 = vpop.f32.mrb[31].mxu1 }
 0x122   : > { %1319 = vst.msk [vmem:[%s2031_s29] sm:$0xf] %vm1318_vm3, %v1531_v52  ;;  %v1532_v57 = vpack.c.bf16 %v1199_v53, %v1199_v53  ;;  %v1147_v44 = vmax.f32 %v1099_v49, %v1123_v54  ;;  %v1124_v1 = vmax.f32 %v1944_v5, %v1019_v41 }
 0x123   : > { %1322 = vst.msk [vmem:[%s2031_s29 + $0xc] sm:$0xf] %vm1318_vm3, %v1534_v38  ;;  %v1180_v2 = vadd.f32 %v2018_v46, %v1149_v40  ;;  %v1150_v58 = vmax.f32 %v1102_v55, %v1126_v63 }
 0x124   : > { %1320 = vst.msk [vmem:[%s2031_s29 + $0x4] sm:$0xf] %vm1318_vm3, %v1532_v57  ;;  %v1178_v45 = vadd.f32 %v2018_v46, %v1147_v44  ;;  %v1148_v59 = vmax.f32 %v1100_v0, %v1124_v1 }
 0x125   : > { %v1204_v3 = vmax.f32 %v1180_v2, 0.0  ;;  %v1181_v4 = vadd.f32 %v2018_v46, %v1150_v58  ;;  %v1643_v60 = vpop.f32.mrb[32].mxu0 }
 0x126   : > { %v1202_v61 = vmax.f32 %v1178_v45, 0.0  ;;  %v1179_v39 = vadd.f32 %v2018_v46, %v1148_v59  ;;  %v1105_v5 = vmax.f32 %v1946_v6, %v1643_v60  ;;  %v1691_v42 = vpop.f32.mrb[32].mxu1  ;;  %v840_v43 = vpop.f32.mrb[33].mxu0 }
 0x127   : > { %v1537_v47 = vpack.c.bf16 %v1204_v3, %v1204_v3  ;;  %v1205_v48 = vmax.f32 %v1181_v4, 0.0  ;;  %v1129_v49 = vmax.f32 %v1948_v7, %v1691_v42  ;;  %v1103_v50 = vmax.f32 %v1950_v8, %v840_v43  ;;  %v1032_v51 = vpop.f32.mrb[33].mxu1  ;;  %v1644_v52 = vpop.f32.mrb[34].mxu0 }
 0x128   : > { %v1535_v53 = vpack.c.bf16 %v1202_v61, %v1202_v61  ;;  %v1203_v54 = vmax.f32 %v1179_v39, 0.0  ;;  %v1127_v55 = vmax.f32 %v1952_v9, %v1032_v51  ;;  %v1106_v62 = vmax.f32 %v1954_v10, %v1644_v52  ;;  %v1692_v6 = vpop.f32.mrb[34].mxu1  ;;  %v843_v56 = vpop.f32.mrb[35].mxu0 }
 0x129   : > { %1325 = vst.msk [vmem:[%s2031_s29 + $0x18] sm:$0xf] %vm1318_vm3, %v1537_v47  ;;  %v1538_v38 = vpack.c.bf16 %v1205_v48, %v1205_v48  ;;  %v1153_v40 = vmax.f32 %v1105_v5, %v1129_v49  ;;  %v1130_v7 = vmax.f32 %v1956_v11, %v1692_v6  ;;  %v1104_v8 = vmax.f32 %v1958_v12, %v843_v56  ;;  %v1035_v63 = vpop.f32.mrb[35].mxu1 }
 0x12a   : > { %1323 = vst.msk [vmem:[%s2031_s29 + $0x10] sm:$0xf] %vm1318_vm3, %v1535_v53  ;;  %v1536_v0 = vpack.c.bf16 %v1203_v54, %v1203_v54  ;;  %v1151_v41 = vmax.f32 %v1103_v50, %v1127_v55  ;;  %v1128_v9 = vmax.f32 %v1960_v13, %v1035_v63 }
 0x12b   : > { %1326 = vst.msk [vmem:[%s2031_s29 + $0x1c] sm:$0xf] %vm1318_vm3, %v1538_v38  ;;  %v1184_v10 = vadd.f32 %v2018_v46, %v1153_v40  ;;  %v1154_v57 = vmax.f32 %v1106_v62, %v1130_v7 }
 0x12c   : > { %1324 = vst.msk [vmem:[%s2031_s29 + $0x14] sm:$0xf] %vm1318_vm3, %v1536_v0  ;;  %v1182_v44 = vadd.f32 %v2018_v46, %v1151_v41  ;;  %v1152_v1 = vmax.f32 %v1104_v8, %v1128_v9 }
 0x12d   : > { %v1208_v11 = vmax.f32 %v1184_v10, 0.0  ;;  %v1185_v12 = vadd.f32 %v2018_v46, %v1154_v57  ;;  %v1647_v2 = vpop.f32.mrb[36].mxu0 }
 0x12e   : > { %v1206_v58 = vmax.f32 %v1182_v44, 0.0  ;;  %v1183_v45 = vadd.f32 %v2018_v46, %v1152_v1  ;;  %v1109_v13 = vmax.f32 %v1962_v14, %v1647_v2  ;;  %v1695_v59 = vpop.f32.mrb[36].mxu1  ;;  %v856_v3 = vpop.f32.mrb[37].mxu0 }
 0x12f   : > { %v1541_v4 = vpack.c.bf16 %v1208_v11, %v1208_v11  ;;  %v1209_v60 = vmax.f32 %v1185_v12, 0.0  ;;  %v1133_v61 = vmax.f32 %v1964_v15, %v1695_v59  ;;  %v1107_v39 = vmax.f32 %v1966_v16, %v856_v3  ;;  %v1048_v5 = vpop.f32.mrb[37].mxu1  ;;  %v1648_v42 = vpop.f32.mrb[38].mxu0 }
 0x130   : > { %v1539_v43 = vpack.c.bf16 %v1206_v58, %v1206_v58  ;;  %v1207_v47 = vmax.f32 %v1183_v45, 0.0  ;;  %v1131_v48 = vmax.f32 %v1968_v17, %v1048_v5  ;;  %v1110_v49 = vmax.f32 %v1970_v18, %v1648_v42  ;;  %v1696_v14 = vpop.f32.mrb[38].mxu1  ;;  %v859_v50 = vpop.f32.mrb[39].mxu0 }
 0x131   : > { %1329 = vst.msk [vmem:[%s2031_s29 + $0x28] sm:$0xf] %vm1318_vm3, %v1541_v4  ;;  %v1542_v51 = vpack.c.bf16 %v1209_v60, %v1209_v60  ;;  %v1157_v52 = vmax.f32 %v1109_v13, %v1133_v61  ;;  %v1134_v15 = vmax.f32 %v1972_v19, %v1696_v14  ;;  %v1108_v16 = vmax.f32 %v1974_v20, %v859_v50  ;;  %v1051_v53 = vpop.f32.mrb[39].mxu1 }
 0x132   : > { %1327 = vst.msk [vmem:[%s2031_s29 + $0x20] sm:$0xf] %vm1318_vm3, %v1539_v43  ;;  %v1540_v54 = vpack.c.bf16 %v1207_v47, %v1207_v47  ;;  %v1155_v55 = vmax.f32 %v1107_v39, %v1131_v48  ;;  %v1132_v17 = vmax.f32 %v1976_v21, %v1051_v53 }
 0x133   : > { %1330 = vst.msk [vmem:[%s2031_s29 + $0x2c] sm:$0xf] %vm1318_vm3, %v1542_v51  ;;  %v1188_v18 = vadd.f32 %v2018_v46, %v1157_v52  ;;  %v1158_v62 = vmax.f32 %v1110_v49, %v1134_v15 }
 0x134   : > { %1328 = vst.msk [vmem:[%s2031_s29 + $0x24] sm:$0xf] %vm1318_vm3, %v1540_v54  ;;  %v1186_v6 = vadd.f32 %v2018_v46, %v1155_v55  ;;  %v1156_v56 = vmax.f32 %v1108_v16, %v1132_v17 }
 0x135   : > { %v1212_v19 = vmax.f32 %v1188_v18, 0.0  ;;  %v1189_v20 = vadd.f32 %v2018_v46, %v1158_v62  ;;  %v1651_v38 = vpop.f32.mrb[40].mxu0 }
 0x136   : > { %v1210_v40 = vmax.f32 %v1186_v6, 0.0  ;;  %v1187_v7 = vadd.f32 %v2018_v46, %v1156_v56  ;;  %v1113_v21 = vmax.f32 %v1978_v22, %v1651_v38  ;;  %v1699_v8 = vpop.f32.mrb[40].mxu1  ;;  %v872_v63 = vpop.f32.mrb[41].mxu0 }
 0x137   : > { %v1545_v0 = vpack.c.bf16 %v1212_v19, %v1212_v19  ;;  %v1213_v41 = vmax.f32 %v1189_v20, 0.0  ;;  %v1137_v9 = vmax.f32 %v1980_v23, %v1699_v8  ;;  %v1111_v10 = vmax.f32 %v1982_v24, %v872_v63  ;;  %v1064_v57 = vpop.f32.mrb[41].mxu1  ;;  %v1652_v44 = vpop.f32.mrb[42].mxu0 }
 0x138   : > { %v1543_v1 = vpack.c.bf16 %v1210_v40, %v1210_v40  ;;  %v1211_v11 = vmax.f32 %v1187_v7, 0.0  ;;  %v1135_v12 = vmax.f32 %v1984_v25, %v1064_v57  ;;  %v1114_v2 = vmax.f32 %v1986_v26, %v1652_v44  ;;  %v1700_v22 = vpop.f32.mrb[42].mxu1  ;;  %v875_v58 = vpop.f32.mrb[43].mxu0 }
 0x139   : > { %1333 = vst.msk [vmem:[%s2031_s29 + $0x38] sm:$0xf] %vm1318_vm3, %v1545_v0  ;;  %v1546_v45 = vpack.c.bf16 %v1213_v41, %v1213_v41  ;;  %v1161_v13 = vmax.f32 %v1113_v21, %v1137_v9  ;;  %v1138_v23 = vmax.f32 %v1988_v27, %v1700_v22  ;;  %v1112_v24 = vmax.f32 %v1990_v28, %v875_v58  ;;  %v1067_v59 = vpop.f32.mrb[43].mxu1 }
 0x13a   : > { %1331 = vst.msk [vmem:[%s2031_s29 + $0x30] sm:$0xf] %vm1318_vm3, %v1543_v1  ;;  %v1544_v3 = vpack.c.bf16 %v1211_v11, %v1211_v11  ;;  %v1159_v4 = vmax.f32 %v1111_v10, %v1135_v12  ;;  %v1136_v25 = vmax.f32 %v1992_v29, %v1067_v59 }
 0x13b   : > { %1334 = vst.msk [vmem:[%s2031_s29 + $0x3c] sm:$0xf] %vm1318_vm3, %v1546_v45  ;;  %v1192_v26 = vadd.f32 %v2018_v46, %v1161_v13  ;;  %v1162_v60 = vmax.f32 %v1114_v2, %v1138_v23 }
 0x13c   : > { %1332 = vst.msk [vmem:[%s2031_s29 + $0x34] sm:$0xf] %vm1318_vm3, %v1544_v3  ;;  %v1190_v61 = vadd.f32 %v2018_v46, %v1159_v4  ;;  %v1160_v39 = vmax.f32 %v1112_v24, %v1136_v25 }
 0x13d   : > { %v1216_v27 = vmax.f32 %v1192_v26, 0.0  ;;  %v1193_v28 = vadd.f32 %v2018_v46, %v1162_v60  ;;  %v1655_v5 = vpop.f32.mrb[44].mxu0 }
 0x13e   : > { %v1214_v42 = vmax.f32 %v1190_v61, 0.0  ;;  %v1191_v43 = vadd.f32 %v2018_v46, %v1160_v39  ;;  %v1117_v29 = vmax.f32 %v1994_v30, %v1655_v5  ;;  %v1703_v47 = vpop.f32.mrb[44].mxu1  ;;  %v888_v48 = vpop.f32.mrb[45].mxu0 }
 0x13f   : > { %v1549_v49 = vpack.c.bf16 %v1216_v27, %v1216_v27  ;;  %v1217_v14 = vmax.f32 %v1193_v28, 0.0  ;;  %v1141_v50 = vmax.f32 %v1996_v31, %v1703_v47  ;;  %v1115_v51 = vmax.f32 %v1998_v32, %v888_v48  ;;  %v1080_v52 = vpop.f32.mrb[45].mxu1  ;;  %v1656_v15 = vpop.f32.mrb[46].mxu0 }
 0x140   : > { %v1547_v16 = vpack.c.bf16 %v1214_v42, %v1214_v42  ;;  %v1215_v53 = vmax.f32 %v1191_v43, 0.0  ;;  %v1139_v54 = vmax.f32 %v2000_v33, %v1080_v52  ;;  %v1118_v55 = vmax.f32 %v2002_v34, %v1656_v15  ;;  %v1704_v30 = vpop.f32.mrb[46].mxu1  ;;  %v891_v17 = vpop.f32.mrb[47].mxu0 }
 0x141   : > { %1337 = vst.msk [vmem:[%s2031_s29 + $0x48] sm:$0xf] %vm1318_vm3, %v1549_v49  ;;  %v1550_v18 = vpack.c.bf16 %v1217_v14, %v1217_v14  ;;  %v1165_v62 = vmax.f32 %v1117_v29, %v1141_v50  ;;  %v1142_v31 = vmax.f32 %v2006_v35, %v1704_v30  ;;  %v1116_v32 = vmax.f32 %v2008_v36, %v891_v17  ;;  %v1083_v6 = vpop.f32.mrb[47].mxu1 }
 0x142   : > { %1335 = vst.msk [vmem:[%s2031_s29 + $0x40] sm:$0xf] %vm1318_vm3, %v1547_v16  ;;  %v1548_v56 = vpack.c.bf16 %v1215_v53, %v1215_v53  ;;  %v1163_v19 = vmax.f32 %v1115_v51, %v1139_v54  ;;  %v1140_v33 = vmax.f32 %v2010_v37, %v1083_v6 }
 0x143   : > { %1338 = vst.msk [vmem:[%s2031_s29 + $0x4c] sm:$0xf] %vm1318_vm3, %v1550_v18  ;;  %v1196_v34 = vadd.f32 %v2018_v46, %v1165_v62  ;;  %v1166_v20 = vmax.f32 %v1118_v55, %v1142_v31 }
 0x144   : > { %1336 = vst.msk [vmem:[%s2031_s29 + $0x44] sm:$0xf] %vm1318_vm3, %v1548_v56  ;;  %v1194_v35 = vadd.f32 %v2018_v46, %v1163_v19  ;;  %v1164_v36 = vmax.f32 %v1116_v32, %v1140_v33 }
 0x145   : > { %v1220_v38 = vmax.f32 %v1196_v34, 0.0  ;;  %v1197_v40 = vadd.f32 %v2018_v46, %v1166_v20 }
 0x146   : > { %v1218_v7 = vmax.f32 %v1194_v35, 0.0  ;;  %v1195_v21 = vadd.f32 %v2018_v46, %v1164_v36 }
 0x147   : > { %v1553_v37 = vpack.c.bf16 %v1220_v38, %v1220_v38  ;;  %v1221_v8 = vmax.f32 %v1197_v40, 0.0 }
 0x148   : > { %v1551_v63 = vpack.c.bf16 %v1218_v7, %v1218_v7  ;;  %v1219_v0 = vmax.f32 %v1195_v21, 0.0 }
 0x149   : > { %1341 = vst.msk [vmem:[%s2031_s29 + $0x58] sm:$0xf] %vm1318_vm3, %v1553_v37  ;;  %v1554_v41 = vpack.c.bf16 %v1221_v8, %v1221_v8 }
 0x14a   : > { %1339 = vst.msk [vmem:[%s2031_s29 + $0x50] sm:$0xf] %vm1318_vm3, %v1551_v63  ;;  %v1552_v9 = vpack.c.bf16 %v1219_v0, %v1219_v0 }
 0x14b   : > { %1342 = vst.msk [vmem:[%s2031_s29 + $0x5c] sm:$0xf] %vm1318_vm3, %v1554_v41 }
 0x14c   : > { %1340 = vst.msk [vmem:[%s2031_s29 + $0x54] sm:$0xf] %vm1318_vm3, %v1552_v9 }
 0x14d PF: > { %s13_s12 = sadd.s32 1, %s1774_s12  }
 0x14e   : > { %p10_p5 = scmp.ge.s32.totalorder %s13_s12, 4  }
 0x150   :  { %12 = sbr.rel (!%p10_p5) target bundleno = 1 (0x1), region = 62 }

// kernel: parallel_cnn_forward.3
= control target key start
LH: loop header
LB: loop body
LE: loop exit
PB: predicated region body
PF: predicated region fallthrough
CT: control target
= control target key end

     0   :  { %v1197_v28 = vlaneseq  ;;  %v8597_v36 = vmov 1966171168   ;;  %s10520_s0 = inlined_call_operand.vmem [shape: bf16[2,9216], index: 0, kind: input, shape index: {}]   ;;  %s10521_s1 = inlined_call_operand.vmem [shape: bf16[9216,128], index: 1, kind: input, shape index: {}]   ;;  %s10522_s2 = inlined_call_operand.vmem [shape: f32[1,128], index: 2, kind: input, shape index: {}]   ;;  %s10523_s3 = inlined_call_operand.hbm [shape: f32[2,128], index: 3, kind: output, shape index: {}]  }
   0x1   :  { %v7988_v0 = vld [vmem:[%s10521_s1 + $0x40] sm:$0xff]   ;;  %v7992_v4 = vld [vmem:[%s10521_s1 + $0x48] sm:$0xff]   ;;  %v7996_v8 = vld [vmem:[%s10521_s1 + $0x50] sm:$0xff]   ;;  %v1195_v37 = vunpack.c.l.s4 %v8597_v36 }
   0x2   :  { %v7989_v1 = vld [vmem:[%s10521_s1 + $0xc0] sm:$0xff]   ;;  %7194 = vmatprep.subr.bf16.mxu0 %v7988_v0  ;;  %v7993_v5 = vld [vmem:[%s10521_s1 + $0xc8] sm:$0xff]   ;;  %v7997_v9 = vld [vmem:[%s10521_s1 + $0xd0] sm:$0xff]   ;;  %v1198_v33 = vshrl.u32 %v1197_v28, 7 }
   0x3   :  { %v7990_v2 = vld [vmem:[%s10521_s1] sm:$0xff]   ;;  %7216 = vmatprep.subr.bf16.mxu1 %v7989_v1  ;;  %v7994_v6 = vld [vmem:[%s10521_s1 + $0x8] sm:$0xff]   ;;  %v7998_v10 = vld [vmem:[%s10521_s1 + $0x10] sm:$0xff]   ;;  %v1196_v40 = vunpack.c.0.s8 %v1195_v37 }
   0x4   :  { %v7991_v3 = vld [vmem:[%s10521_s1 + $0x80] sm:$0xff]   ;;  %7195 = vmatpush3.bf16.msra.mxu0 %v7990_v2  ;;  %v7995_v7 = vld [vmem:[%s10521_s1 + $0x88] sm:$0xff]   ;;  %v7999_v11 = vld [vmem:[%s10521_s1 + $0x90] sm:$0xff]  }
   0x5   :  { %7217 = vmatpush3.bf16.msra.mxu1 %v7991_v3  ;;  %7196 = vmatprep.subr.bf16.mxu0 %v7992_v4  ;;  %v8000_v12 = vld [vmem:[%s10521_s1 + $0x58] sm:$0xff]   ;;  %v8004_v16 = vld [vmem:[%s10521_s1 + $0x60] sm:$0xff]   ;;  %v8008_v20 = vld [vmem:[%s10521_s1 + $0x68] sm:$0xff]   ;;  %v8724_v41 = vsub.s32 %v1196_v40, %v1198_v33 }
   0x6   :  { %7218 = vmatprep.subr.bf16.mxu1 %v7993_v5  ;;  %v8001_v13 = vld [vmem:[%s10521_s1 + $0xd8] sm:$0xff]   ;;  %v8005_v17 = vld [vmem:[%s10521_s1 + $0xe0] sm:$0xff]   ;;  %v8009_v21 = vld [vmem:[%s10521_s1 + $0xe8] sm:$0xff]  }
   0x7   :  { %v8002_v14 = vld [vmem:[%s10521_s1 + $0x18] sm:$0xff]   ;;  %v8006_v18 = vld [vmem:[%s10521_s1 + $0x20] sm:$0xff]   ;;  %v8010_v22 = vld [vmem:[%s10521_s1 + $0x28] sm:$0xff]  }
   0x8   :  { %7197 = vmatpush3.bf16.msra.mxu0 %v7994_v6  ;;  %v8003_v15 = vld [vmem:[%s10521_s1 + $0x98] sm:$0xff]   ;;  %v8007_v19 = vld [vmem:[%s10521_s1 + $0xa0] sm:$0xff]   ;;  %v8011_v23 = vld [vmem:[%s10521_s1 + $0xa8] sm:$0xff]  }
   0x9   :  { %7219 = vmatpush3.bf16.msra.mxu1 %v7995_v7  ;;  %7198 = vmatprep.subr.bf16.mxu0 %v7996_v8  ;;  %v8012_v24 = vld [vmem:[%s10521_s1 + $0x70] sm:$0xff]   ;;  %v8016_v29 = vld [vmem:[%s10521_s1 + $0x78] sm:$0xff]   ;;  %v16_v34 = vld [vmem:[%s10520_s0] sm:$0xff] }
   0xa   :  { %7220 = vmatprep.subr.bf16.mxu1 %v7997_v9  ;;  %v8013_v25 = vld [vmem:[%s10521_s1 + $0xf0] sm:$0xff]   ;;  %v8017_v30 = vld [vmem:[%s10521_s1 + $0xf8] sm:$0xff]   ;;  %v8021_v35 = vld [vmem:[%s10521_s1 + $0x140] sm:$0xff]   ;;  %v1193_v39 = vcombine.high %v16_v34, %v16_v34  ;;  %v1200_v42 = vrot.slane %v16_v34, %v8724_v41 }
   0xb   :  { %v8014_v26 = vld [vmem:[%s10521_s1 + $0x30] sm:$0xff]   ;;  %v8018_v31 = vld [vmem:[%s10521_s1 + $0x38] sm:$0xff]   ;;  %v8022_v38 = vld [vmem:[%s10521_s1 + $0x1c0] sm:$0xff]  }
   0xc   :  { %7199 = vmatpush3.bf16.msra.mxu0 %v7998_v10  ;;  %v8015_v27 = vld [vmem:[%s10521_s1 + $0xb0] sm:$0xff]   ;;  %v8019_v32 = vld [vmem:[%s10521_s1 + $0xb8] sm:$0xff]   ;;  %v8728_v43 = vrot.slane %v1193_v39, %v8724_v41  ;;  %v1208_v44 = vcombine.high %v1200_v42, %v1200_v42  ;;  %v1216_v45 = vrot.slane %v1200_v42, %v8724_v41  ;;  %v8023_v47 = vld [vmem:[%s10521_s1 + $0x100] sm:$0xff]  }
   0xd   :  { %7221 = vmatpush3.bf16.msra.mxu1 %v7999_v11  ;;  %7200 = vmatprep.subr.bf16.mxu0 %v8000_v12  ;;  %v8024_v49 = vld [vmem:[%s10521_s1 + $0x180] sm:$0xff]   ;;  %v8025_v52 = vld [vmem:[%s10521_s1 + $0x148] sm:$0xff]   ;;  %v8029_v58 = vld [vmem:[%s10521_s1 + $0x150] sm:$0xff]  }
   0xe   :  { %7222 = vmatprep.subr.bf16.mxu1 %v8001_v13  ;;  %v1209_v46 = vcombine.high %v8728_v43, %v8728_v43  ;;  %v1230_v48 = vrot.slane %v1208_v44, %v8724_v41  ;;  %v1238_v51 = vcombine.high %v1216_v45, %v1216_v45  ;;  %v8026_v54 = vld [vmem:[%s10521_s1 + $0x1c8] sm:$0xff]   ;;  %v8030_v59 = vld [vmem:[%s10521_s1 + $0x1d0] sm:$0xff]   ;;  %v8033_v62 = vld [vmem:[%s10521_s1 + $0x158] sm:$0xff]  }
   0xf   :  { %v8027_v55 = vld [vmem:[%s10521_s1 + $0x108] sm:$0xff]   ;;  %v8031_v60 = vld [vmem:[%s10521_s1 + $0x110] sm:$0xff]   ;;  %v8034_v63 = vld [vmem:[%s10521_s1 + $0x1d8] sm:$0xff]  }
  0x10   :  { %7201 = vmatpush3.bf16.msra.mxu0 %v8002_v14  ;;  %v1237_v50 = vrot.slane %v1209_v46, %v8724_v41  ;;  %5194 = vmatprep.mubr.bf16.mxu0 %v1230_v48  ;;  %v1240_v53 = vcombine.high %v1230_v48, %v1230_v48  ;;  %v8028_v57 = vld [vmem:[%s10521_s1 + $0x188] sm:$0xff]   ;;  %v8032_v61 = vld [vmem:[%s10521_s1 + $0x190] sm:$0xff]   ;;  %v8035_v0 = vld [vmem:[%s10521_s1 + $0x118] sm:$0xff]  }
  0x11   :  { %7223 = vmatpush3.bf16.msra.mxu1 %v8003_v15  ;;  %7202 = vmatprep.subr.bf16.mxu0 %v8004_v16  ;;  %v8036_v1 = vld [vmem:[%s10521_s1 + $0x198] sm:$0xff]   ;;  %v8037_v2 = vld [vmem:[%s10521_s1 + $0x160] sm:$0xff]   ;;  %v8041_v6 = vld [vmem:[%s10521_s1 + $0x168] sm:$0xff]  }
  0x12   :  { %7224 = vmatprep.subr.bf16.mxu1 %v8005_v17  ;;  %v1241_v56 = vcombine.high %v1237_v50, %v1237_v50  ;;  %5234 = vmatprep.mubr.bf16.mxu1 %v1240_v53  ;;  %v8038_v3 = vld [vmem:[%s10521_s1 + $0x1e0] sm:$0xff]   ;;  %v8042_v7 = vld [vmem:[%s10521_s1 + $0x1e8] sm:$0xff]   ;;  %v8045_v10 = vld [vmem:[%s10521_s1 + $0x170] sm:$0xff]  }
  0x13   :  { %v8039_v4 = vld [vmem:[%s10521_s1 + $0x120] sm:$0xff]   ;;  %v8043_v8 = vld [vmem:[%s10521_s1 + $0x128] sm:$0xff]   ;;  %v8046_v11 = vld [vmem:[%s10521_s1 + $0x1f0] sm:$0xff]  }
  0x14   :  { %7203 = vmatpush3.bf16.msra.mxu0 %v8006_v18  ;;  %v8040_v5 = vld [vmem:[%s10521_s1 + $0x1a0] sm:$0xff]   ;;  %v8044_v9 = vld [vmem:[%s10521_s1 + $0x1a8] sm:$0xff]   ;;  %v8047_v12 = vld [vmem:[%s10521_s1 + $0x130] sm:$0xff]   ;;  %v1223_v18 = vrot.slane %v8728_v43, %v8724_v41 }
  0x15   :  { %7225 = vmatpush3.bf16.msra.mxu1 %v8007_v19  ;;  %7204 = vmatprep.subr.bf16.mxu0 %v8008_v20  ;;  %v8048_v13 = vld [vmem:[%s10521_s1 + $0x1b0] sm:$0xff]   ;;  %v8049_v14 = vld [vmem:[%s10521_s1 + $0x178] sm:$0xff]   ;;  %v8053_v19 = vld [vmem:[%s10521_s1 + $0x240] sm:$0xff]  }
  0x16   :  { %7226 = vmatprep.subr.bf16.mxu1 %v8009_v21  ;;  %v8050_v15 = vld [vmem:[%s10521_s1 + $0x1f8] sm:$0xff]   ;;  %v8054_v20 = vld [vmem:[%s10521_s1 + $0x2c0] sm:$0xff]   ;;  %v8061_v28 = vld [vmem:[%s10521_s1 + $0x250] sm:$0xff]  }
  0x17   :  { %v8051_v16 = vld [vmem:[%s10521_s1 + $0x138] sm:$0xff]   ;;  %v8055_v21 = vld [vmem:[%s10521_s1 + $0x200] sm:$0xff]   ;;  %v8073_v40 = vld [vmem:[%s10521_s1 + $0x268] sm:$0xff]  }
  0x18   :  { %7205 = vmatpush3.bf16.msra.mxu0 %v8010_v22  ;;  %v8052_v17 = vld [vmem:[%s10521_s1 + $0x1b8] sm:$0xff]   ;;  %v8056_v22 = vld [vmem:[%s10521_s1 + $0x280] sm:$0xff]   ;;  %v8074_v42 = vld [vmem:[%s10521_s1 + $0x2e8] sm:$0xff]  }
  0x19   :  { %7227 = vmatpush3.bf16.msra.mxu1 %v8011_v23  ;;  %7206 = vmatprep.subr.bf16.mxu0 %v8012_v24  ;;  %v1239_v23 = vcombine.high %v1223_v18, %v1223_v18  ;;  %v8057_v24 = vld [vmem:[%s10521_s1 + $0x248] sm:$0xff]   ;;  %v8066_v33 = vld [vmem:[%s10521_s1 + $0x2d8] sm:$0xff]   ;;  %v8069_v36 = vld [vmem:[%s10521_s1 + $0x260] sm:$0xff]  }
  0x1a   :  { %7228 = vmatprep.subr.bf16.mxu1 %v8013_v25  ;;  %v8058_v25 = vld [vmem:[%s10521_s1 + $0x2c8] sm:$0xff]   ;;  %v8067_v34 = vld [vmem:[%s10521_s1 + $0x218] sm:$0xff]   ;;  %v8070_v37 = vld [vmem:[%s10521_s1 + $0x2e0] sm:$0xff]  }
  0x1b   :  { %v8072_v39 = vld [vmem:[%s10521_s1 + $0x2a0] sm:$0xff]   ;;  %v8075_v43 = vld [vmem:[%s10521_s1 + $0x228] sm:$0xff]  }
  0x1c   :  { %7207 = vmatpush3.bf16.msra.mxu0 %v8014_v26  ;;  %v8059_v26 = vld [vmem:[%s10521_s1 + $0x208] sm:$0xff]  }
  0x1d   :  { %7229 = vmatpush3.bf16.msra.mxu1 %v8015_v27  ;;  %7208 = vmatprep.subr.bf16.mxu0 %v8016_v29  ;;  %v8060_v27 = vld [vmem:[%s10521_s1 + $0x288] sm:$0xff]   ;;  %v8062_v29 = vld [vmem:[%s10521_s1 + $0x2d0] sm:$0xff]  }
  0x1e   :  { %7230 = vmatprep.subr.bf16.mxu1 %v8017_v30  ;;  %v8063_v30 = vld [vmem:[%s10521_s1 + $0x210] sm:$0xff]   ;;  %v8076_v44 = vld [vmem:[%s10521_s1 + $0x2a8] sm:$0xff]  }
  0x1f   :  { %v17_v46 = vld [vmem:[%s10520_s0 + $0x8] sm:$0xff] }
  0x20   :  { %7209 = vmatpush3.bf16.msra.mxu0 %v8018_v31  ;;  %v8064_v31 = vld [vmem:[%s10521_s1 + $0x290] sm:$0xff]   ;;  %v1249_v48 = vrot.slane %v17_v46, %v8724_v41 }
  0x21   :  { %7231 = vmatpush3.bf16.msra.mxu1 %v8019_v32  ;;  %7238 = vmatprep.subr.bf16.mxu0 %v8021_v35  ;;  %v8065_v32 = vld [vmem:[%s10521_s1 + $0x258] sm:$0xff]  }
  0x22   :  { %7260 = vmatprep.subr.bf16.mxu1 %v8022_v38  ;;  %v8068_v35 = vld [vmem:[%s10521_s1 + $0x298] sm:$0xff]   ;;  %v8071_v38 = vld [vmem:[%s10521_s1 + $0x220] sm:$0xff]  }
  0x23   :  { %5195 = vmatmul.mubr.bf16.vlgmr.msra.gmra.mrb[0].mxu0 %v1216_v45  ;;  %v8077_v45 = vld [vmem:[%s10521_s1 + $0x270] sm:$0xff]  }
  0x24   :  { %7239 = vmatpush3.bf16.msra.mxu0 %v8023_v47  ;;  %5235 = vmatmul.mubr.bf16.vlgmr.msra.gmra.mrb[0].mxu1 %v1238_v51  ;;  %v8078_v47 = vld [vmem:[%s10521_s1 + $0x2f0] sm:$0xff]  }
  0x25   :  { %7240 = vmatprep.subr.bf16.mxu0 %v8025_v52  ;;  %7261 = vmatpush3.bf16.msra.mxu1 %v8024_v49  ;;  %v1242_v49 = vcombine.high %v17_v46, %v17_v46  ;;  %v8080_v51 = vld [vmem:[%s10521_s1 + $0x2b0] sm:$0xff]   ;;  %v1257_v52 = vcombine.high %v1249_v48, %v1249_v48 }
  0x26   :  { %5274 = vmatprep.mubr.bf16.mxu0 %v1237_v50  ;;  %7262 = vmatprep.subr.bf16.mxu1 %v8026_v54  ;;  %v8079_v50 = vld [vmem:[%s10521_s1 + $0x230] sm:$0xff]   ;;  %v8081_v54 = vld [vmem:[%s10521_s1 + $0x278] sm:$0xff]  }
  0x27   :  { %5314 = vmatprep.mubr.bf16.mxu1 %v1241_v56  ;;  %v8916_v53 = vrot.slane %v1242_v49, %v8724_v41  ;;  %v1279_v56 = vrot.slane %v1257_v52, %v8724_v41  ;;  %v8128_v46 = vld [vmem:[%s10521_s1 + $0x410] sm:$0xff]   ;;  %v8131_v49 = vld [vmem:[%s10521_s1 + $0x4d8] sm:$0xff]   ;;  %v8134_v52 = vld [vmem:[%s10521_s1 + $0x460] sm:$0xff]  }
  0x28   :  { %7241 = vmatpush3.bf16.msra.mxu0 %v8027_v55  ;;  %v8082_v55 = vld [vmem:[%s10521_s1 + $0x2f8] sm:$0xff]  }
  0x29   :  { %7242 = vmatprep.subr.bf16.mxu0 %v8029_v58  ;;  %7263 = vmatpush3.bf16.msra.mxu1 %v8028_v57  ;;  %v1258_v57 = vcombine.high %v8916_v53, %v8916_v53  ;;  %v8083_v58 = vld [vmem:[%s10521_s1 + $0x238] sm:$0xff]  }
  0x2a   :  { %7264 = vmatprep.subr.bf16.mxu1 %v8030_v59  ;;  %v8084_v59 = vld [vmem:[%s10521_s1 + $0x2b8] sm:$0xff]  }
  0x2c   :  { %7243 = vmatpush3.bf16.msra.mxu0 %v8031_v60  ;;  %v1289_v60 = vcombine.high %v1279_v56, %v1279_v56 }
  0x2d   :  { %7244 = vmatprep.subr.bf16.mxu0 %v8033_v62  ;;  %7265 = vmatpush3.bf16.msra.mxu1 %v8032_v61  ;;  %v1265_v61 = vrot.slane %v1249_v48, %v8724_v41  ;;  %v8085_v62 = vld [vmem:[%s10521_s1 + $0x340] sm:$0xff]   ;;  %v8130_v48 = vld [vmem:[%s10521_s1 + $0x458] sm:$0xff]  }
  0x2e   :  { %7266 = vmatprep.subr.bf16.mxu1 %v8034_v63  ;;  %v8086_v63 = vld [vmem:[%s10521_s1 + $0x3c0] sm:$0xff]  }
  0x30   :  { %7245 = vmatpush3.bf16.msra.mxu0 %v8035_v0  ;;  %v1286_v0 = vrot.slane %v1258_v57, %v8724_v41  ;;  %v8139_v57 = vld [vmem:[%s10521_s1 + $0x4e8] sm:$0xff]  }
  0x31   :  { %7246 = vmatprep.subr.bf16.mxu0 %v8037_v2  ;;  %7267 = vmatpush3.bf16.msra.mxu1 %v8036_v1  ;;  %v8087_v1 = vld [vmem:[%s10521_s1 + $0x300] sm:$0xff]  }
  0x32   :  { %7268 = vmatprep.subr.bf16.mxu1 %v8038_v3  ;;  %v8088_v2 = vld [vmem:[%s10521_s1 + $0x380] sm:$0xff]   ;;  %v1287_v3 = vcombine.high %v1265_v61, %v1265_v61 }
  0x34   :  { %7247 = vmatpush3.bf16.msra.mxu0 %v8039_v4  ;;  %v8089_v4 = vld [vmem:[%s10521_s1 + $0x348] sm:$0xff]  }
  0x35   :  { %7248 = vmatprep.subr.bf16.mxu0 %v8041_v6  ;;  %7269 = vmatpush3.bf16.msra.mxu1 %v8040_v5  ;;  %v8090_v5 = vld [vmem:[%s10521_s1 + $0x3c8] sm:$0xff]   ;;  %v1290_v6 = vcombine.high %v1286_v0, %v1286_v0 }
  0x36   :  { %7270 = vmatprep.subr.bf16.mxu1 %v8042_v7  ;;  %v8091_v7 = vld [vmem:[%s10521_s1 + $0x308] sm:$0xff]  }
  0x38   :  { %7249 = vmatpush3.bf16.msra.mxu0 %v8043_v8  ;;  %v8092_v8 = vld [vmem:[%s10521_s1 + $0x388] sm:$0xff]  }
  0x39   :  { %7250 = vmatprep.subr.bf16.mxu0 %v8045_v10  ;;  %7271 = vmatpush3.bf16.msra.mxu1 %v8044_v9  ;;  %v8093_v9 = vld [vmem:[%s10521_s1 + $0x350] sm:$0xff]  }
  0x3a   :  { %7272 = vmatprep.subr.bf16.mxu1 %v8046_v11  ;;  %v8094_v10 = vld [vmem:[%s10521_s1 + $0x3d0] sm:$0xff]  }
  0x3b   :  { %v8095_v11 = vld [vmem:[%s10521_s1 + $0x310] sm:$0xff]  }
  0x3c   :  { %7251 = vmatpush3.bf16.msra.mxu0 %v8047_v12  ;;  %v8096_v12 = vld [vmem:[%s10521_s1 + $0x390] sm:$0xff]  }
  0x3d   :  { %7252 = vmatprep.subr.bf16.mxu0 %v8049_v14  ;;  %7273 = vmatpush3.bf16.msra.mxu1 %v8048_v13  ;;  %v8097_v13 = vld [vmem:[%s10521_s1 + $0x358] sm:$0xff]  }
  0x3e   :  { %7274 = vmatprep.subr.bf16.mxu1 %v8050_v15  ;;  %v8098_v14 = vld [vmem:[%s10521_s1 + $0x3d8] sm:$0xff]  }
  0x3f   :  { %v8099_v15 = vld [vmem:[%s10521_s1 + $0x318] sm:$0xff]  }
  0x40   :  { %7253 = vmatpush3.bf16.msra.mxu0 %v8051_v16  ;;  %v8100_v16 = vld [vmem:[%s10521_s1 + $0x398] sm:$0xff]  }
  0x41   :  { %7282 = vmatprep.subr.bf16.mxu0 %v8053_v19  ;;  %7275 = vmatpush3.bf16.msra.mxu1 %v8052_v17  ;;  %v8101_v17 = vld [vmem:[%s10521_s1 + $0x360] sm:$0xff]  }
  0x42   :  { %7304 = vmatprep.subr.bf16.mxu1 %v8054_v20  ;;  %v8103_v19 = vld [vmem:[%s10521_s1 + $0x320] sm:$0xff]  }
  0x43   :  { %5275 = vmatmul.mubr.bf16.vlgmr.msra.gmra.mrb[4].mxu0 %v1223_v18  ;;  %v8102_v18 = vld [vmem:[%s10521_s1 + $0x3e0] sm:$0xff]  }
  0x44   :  { %7283 = vmatpush3.bf16.msra.mxu0 %v8055_v21  ;;  %5315 = vmatmul.mubr.bf16.vlgmr.msra.gmra.mrb[4].mxu1 %v1239_v23  ;;  %v8104_v20 = vld [vmem:[%s10521_s1 + $0x3a0] sm:$0xff]   ;;  %v8105_v21 = vld [vmem:[%s10521_s1 + $0x368] sm:$0xff]  }
  0x45   :  { %7284 = vmatprep.subr.bf16.mxu0 %v8057_v24  ;;  %7305 = vmatpush3.bf16.msra.mxu1 %v8056_v22  ;;  %v8106_v22 = vld [vmem:[%s10521_s1 + $0x3e8] sm:$0xff]  }
  0x46   :  { %7306 = vmatprep.subr.bf16.mxu1 %v8058_v25  ;;  %5354 = vmatprep.mubr.bf16.mxu0 %v1279_v56  ;;  %v8107_v23 = vld [vmem:[%s10521_s1 + $0x328] sm:$0xff]   ;;  %v8109_v25 = vld [vmem:[%s10521_s1 + $0x370] sm:$0xff]  }
  0x47   :  { %5394 = vmatprep.mubr.bf16.mxu1 %v1289_v60  ;;  %v8108_v24 = vld [vmem:[%s10521_s1 + $0x3a8] sm:$0xff]   ;;  %v8142_v60 = vld [vmem:[%s10521_s1 + $0x470] sm:$0xff]  }
  0x48   :  { %7285 = vmatpush3.bf16.msra.mxu0 %v8059_v26  ;;  %v8110_v26 = vld [vmem:[%s10521_s1 + $0x3f0] sm:$0xff]   ;;  %v8138_v56 = vld [vmem:[%s10521_s1 + $0x468] sm:$0xff]  }
  0x49   :  { %7286 = vmatprep.subr.bf16.mxu0 %v8061_v28  ;;  %7307 = vmatpush3.bf16.msra.mxu1 %v8060_v27  ;;  %v8111_v27 = vld [vmem:[%s10521_s1 + $0x330] sm:$0xff]  }
  0x4a   :  { %7308 = vmatprep.subr.bf16.mxu1 %v8062_v29  ;;  %v8112_v28 = vld [vmem:[%s10521_s1 + $0x3b0] sm:$0xff]   ;;  %v8113_v29 = vld [vmem:[%s10521_s1 + $0x378] sm:$0xff]  }
  0x4c   :  { %7287 = vmatpush3.bf16.msra.mxu0 %v8063_v30  ;;  %v8114_v30 = vld [vmem:[%s10521_s1 + $0x3f8] sm:$0xff]  }
  0x4d   :  { %7288 = vmatprep.subr.bf16.mxu0 %v8065_v32  ;;  %7309 = vmatpush3.bf16.msra.mxu1 %v8064_v31  ;;  %v8115_v31 = vld [vmem:[%s10521_s1 + $0x338] sm:$0xff]  }
  0x4e   :  { %7310 = vmatprep.subr.bf16.mxu1 %v8066_v33  ;;  %v8116_v32 = vld [vmem:[%s10521_s1 + $0x3b8] sm:$0xff]   ;;  %v1272_v33 = vrot.slane %v8916_v53, %v8724_v41  ;;  %v8135_v53 = vld [vmem:[%s10521_s1 + $0x4e0] sm:$0xff]  }
  0x50   :  { %7289 = vmatpush3.bf16.msra.mxu0 %v8067_v34  ;;  %v8118_v34 = vld [vmem:[%s10521_s1 + $0x440] sm:$0xff]  }
  0x51   :  { %7290 = vmatprep.subr.bf16.mxu0 %v8069_v36  ;;  %7311 = vmatpush3.bf16.msra.mxu1 %v8068_v35  ;;  %v8119_v35 = vld [vmem:[%s10521_s1 + $0x4c0] sm:$0xff]  }
  0x52   :  { %7312 = vmatprep.subr.bf16.mxu1 %v8070_v37  ;;  %v8120_v36 = vld [vmem:[%s10521_s1 + $0x400] sm:$0xff]  }
  0x53   :  { %v8121_v37 = vld [vmem:[%s10521_s1 + $0x480] sm:$0xff]  }
  0x54   :  { %7291 = vmatpush3.bf16.msra.mxu0 %v8071_v38  ;;  %v1288_v38 = vcombine.high %v1272_v33, %v1272_v33 }
  0x55   :  { %7292 = vmatprep.subr.bf16.mxu0 %v8073_v40  ;;  %7313 = vmatpush3.bf16.msra.mxu1 %v8072_v39  ;;  %v8122_v39 = vld [vmem:[%s10521_s1 + $0x448] sm:$0xff]  }
  0x56   :  { %7314 = vmatprep.subr.bf16.mxu1 %v8074_v42  ;;  %v8123_v40 = vld [vmem:[%s10521_s1 + $0x4c8] sm:$0xff]  }
  0x57   :  { %v8124_v42 = vld [vmem:[%s10521_s1 + $0x408] sm:$0xff]  }
  0x58   :  { %7293 = vmatpush3.bf16.msra.mxu0 %v8075_v43  ;;  %v8125_v43 = vld [vmem:[%s10521_s1 + $0x488] sm:$0xff]  }
  0x59   :  { %7294 = vmatprep.subr.bf16.mxu0 %v8077_v45  ;;  %7315 = vmatpush3.bf16.msra.mxu1 %v8076_v44  ;;  %v8126_v44 = vld [vmem:[%s10521_s1 + $0x450] sm:$0xff]  }
  0x5a   :  { %7316 = vmatprep.subr.bf16.mxu1 %v8078_v47  ;;  %v8127_v45 = vld [vmem:[%s10521_s1 + $0x4d0] sm:$0xff]  }
  0x5b   :  { %v8129_v47 = vld [vmem:[%s10521_s1 + $0x490] sm:$0xff]  }
  0x5c   :  { %7295 = vmatpush3.bf16.msra.mxu0 %v8079_v50  ;;  %v8132_v50 = vld [vmem:[%s10521_s1 + $0x418] sm:$0xff]  }
  0x5d   :  { %7296 = vmatprep.subr.bf16.mxu0 %v8081_v54  ;;  %7317 = vmatpush3.bf16.msra.mxu1 %v8080_v51  ;;  %v8133_v51 = vld [vmem:[%s10521_s1 + $0x498] sm:$0xff]   ;;  %v8136_v54 = vld [vmem:[%s10521_s1 + $0x420] sm:$0xff]  }
  0x5e   :  { %7318 = vmatprep.subr.bf16.mxu1 %v8082_v55  ;;  %v8137_v55 = vld [vmem:[%s10521_s1 + $0x4a0] sm:$0xff]  }
  0x60   :  { %7297 = vmatpush3.bf16.msra.mxu0 %v8083_v58  ;;  %v8140_v58 = vld [vmem:[%s10521_s1 + $0x428] sm:$0xff]  }
  0x61   :  { %7326 = vmatprep.subr.bf16.mxu0 %v8085_v62  ;;  %7319 = vmatpush3.bf16.msra.mxu1 %v8084_v59  ;;  %v8141_v59 = vld [vmem:[%s10521_s1 + $0x4a8] sm:$0xff]   ;;  %v8143_v62 = vld [vmem:[%s10521_s1 + $0x4f0] sm:$0xff]  }
  0x62   :  { %7348 = vmatprep.subr.bf16.mxu1 %v8086_v63 }
  0x63   :  { %5355 = vmatmul.mubr.bf16.vlgmr.msra.gmra.mrb[8].mxu0 %v1265_v61  ;;  %v18_v61 = vld [vmem:[%s10520_s0 + $0x10] sm:$0xff] }
  0x64   :  { %7327 = vmatpush3.bf16.msra.mxu0 %v8087_v1  ;;  %5434 = vmatprep.mubr.bf16.mxu0 %v1286_v0  ;;  %v1298_v63 = vrot.slane %v18_v61, %v8724_v41  ;;  %v1291_v0 = vcombine.high %v18_v61, %v18_v61  ;;  %v8144_v1 = vld [vmem:[%s10521_s1 + $0x430] sm:$0xff]  }
  0x65   :  { %5395 = vmatmul.mubr.bf16.vlgmr.msra.gmra.mrb[8].mxu1 %v1287_v3  ;;  %7328 = vmatprep.subr.bf16.mxu0 %v8089_v4  ;;  %v8193_v61 = vld [vmem:[%s10521_s1 + $0x610] sm:$0xff]  }
  0x66   :  { %7349 = vmatpush3.bf16.msra.mxu1 %v8088_v2  ;;  %5474 = vmatprep.mubr.bf16.mxu1 %v1290_v6  ;;  %v8145_v2 = vld [vmem:[%s10521_s1 + $0x4b0] sm:$0xff]   ;;  %v1306_v3 = vcombine.high %v1298_v63, %v1298_v63  ;;  %v9122_v4 = vrot.slane %v1291_v0, %v8724_v41  ;;  %v8147_v6 = vld [vmem:[%s10521_s1 + $0x4f8] sm:$0xff]  }
  0x67   :  { %7350 = vmatprep.subr.bf16.mxu1 %v8090_v5  ;;  %v8146_v5 = vld [vmem:[%s10521_s1 + $0x478] sm:$0xff]  }
  0x68   :  { %7329 = vmatpush3.bf16.msra.mxu0 %v8091_v7  ;;  %v1328_v7 = vrot.slane %v1306_v3, %v8724_v41  ;;  %v8196_v0 = vld [vmem:[%s10521_s1 + $0x6d8] sm:$0xff]   ;;  %v8199_v3 = vld [vmem:[%s10521_s1 + $0x660] sm:$0xff]  }
  0x69   :  { %7330 = vmatprep.subr.bf16.mxu0 %v8093_v9  ;;  %v8148_v9 = vld [vmem:[%s10521_s1 + $0x438] sm:$0xff]  }
  0x6a   :  { %7351 = vmatpush3.bf16.msra.mxu1 %v8092_v8  ;;  %v1307_v8 = vcombine.high %v9122_v4, %v9122_v4 }
  0x6b   :  { %7352 = vmatprep.subr.bf16.mxu1 %v8094_v10  ;;  %v8149_v10 = vld [vmem:[%s10521_s1 + $0x4b8] sm:$0xff]  }
  0x6c   :  { %7331 = vmatpush3.bf16.msra.mxu0 %v8095_v11  ;;  %v1338_v11 = vcombine.high %v1328_v7, %v1328_v7 }
  0x6d   :  { %7332 = vmatprep.subr.bf16.mxu0 %v8097_v13  ;;  %v8150_v13 = vld [vmem:[%s10521_s1 + $0x540] sm:$0xff]  }
  0x6e   :  { %7353 = vmatpush3.bf16.msra.mxu1 %v8096_v12  ;;  %v1314_v12 = vrot.slane %v1298_v63, %v8724_v41  ;;  %v8195_v63 = vld [vmem:[%s10521_s1 + $0x658] sm:$0xff]  }
  0x6f   :  { %7354 = vmatprep.subr.bf16.mxu1 %v8098_v14  ;;  %v8151_v14 = vld [vmem:[%s10521_s1 + $0x5c0] sm:$0xff]  }
  0x70   :  { %7333 = vmatpush3.bf16.msra.mxu0 %v8099_v15  ;;  %v1335_v15 = vrot.slane %v1307_v8, %v8724_v41  ;;  %v8204_v8 = vld [vmem:[%s10521_s1 + $0x6e8] sm:$0xff]  }
  0x71   :  { %7334 = vmatprep.subr.bf16.mxu0 %v8101_v17  ;;  %v8153_v17 = vld [vmem:[%s10521_s1 + $0x580] sm:$0xff]  }
  0x72   :  { %7355 = vmatpush3.bf16.msra.mxu1 %v8100_v16  ;;  %v8152_v16 = vld [vmem:[%s10521_s1 + $0x500] sm:$0xff]  }
  0x73   :  { %7356 = vmatprep.subr.bf16.mxu1 %v8102_v18  ;;  %v1336_v18 = vcombine.high %v1314_v12, %v1314_v12 }
  0x74   :  { %7335 = vmatpush3.bf16.msra.mxu0 %v8103_v19  ;;  %v8154_v19 = vld [vmem:[%s10521_s1 + $0x548] sm:$0xff]  }
  0x75   :  { %7336 = vmatprep.subr.bf16.mxu0 %v8105_v21  ;;  %v1339_v21 = vcombine.high %v1335_v15, %v1335_v15 }
  0x76   :  { %7357 = vmatpush3.bf16.msra.mxu1 %v8104_v20  ;;  %v8155_v20 = vld [vmem:[%s10521_s1 + $0x5c8] sm:$0xff]  }
  0x77   :  { %7358 = vmatprep.subr.bf16.mxu1 %v8106_v22  ;;  %v8156_v22 = vld [vmem:[%s10521_s1 + $0x508] sm:$0xff]  }
  0x78   :  { %7337 = vmatpush3.bf16.msra.mxu0 %v8107_v23  ;;  %v8157_v23 = vld [vmem:[%s10521_s1 + $0x588] sm:$0xff]  }
  0x79   :  { %7338 = vmatprep.subr.bf16.mxu0 %v8109_v25  ;;  %v8159_v25 = vld [vmem:[%s10521_s1 + $0x5d0] sm:$0xff]  }
  0x7a   :  { %7359 = vmatpush3.bf16.msra.mxu1 %v8108_v24  ;;  %v8158_v24 = vld [vmem:[%s10521_s1 + $0x550] sm:$0xff]  }
  0x7b   :  { %7360 = vmatprep.subr.bf16.mxu1 %v8110_v26  ;;  %v8160_v26 = vld [vmem:[%s10521_s1 + $0x510] sm:$0xff]  }
  0x7c   :  { %7339 = vmatpush3.bf16.msra.mxu0 %v8111_v27  ;;  %v8161_v27 = vld [vmem:[%s10521_s1 + $0x590] sm:$0xff]  }
  0x7d   :  { %7340 = vmatprep.subr.bf16.mxu0 %v8113_v29  ;;  %v8163_v29 = vld [vmem:[%s10521_s1 + $0x5d8] sm:$0xff]  }
  0x7e   :  { %7361 = vmatpush3.bf16.msra.mxu1 %v8112_v28  ;;  %v8162_v28 = vld [vmem:[%s10521_s1 + $0x558] sm:$0xff]  }
  0x7f   :  { %7362 = vmatprep.subr.bf16.mxu1 %v8114_v30  ;;  %v8164_v30 = vld [vmem:[%s10521_s1 + $0x518] sm:$0xff]  }
  0x80   :  { %7341 = vmatpush3.bf16.msra.mxu0 %v8115_v31  ;;  %v8165_v31 = vld [vmem:[%s10521_s1 + $0x598] sm:$0xff]  }
  0x81   :  { %7370 = vmatprep.subr.bf16.mxu0 %v8118_v34  ;;  %v8168_v34 = vld [vmem:[%s10521_s1 + $0x520] sm:$0xff]  }
  0x82   :  { %7363 = vmatpush3.bf16.msra.mxu1 %v8116_v32  ;;  %v8166_v32 = vld [vmem:[%s10521_s1 + $0x560] sm:$0xff]  }
  0x83   :  { %5435 = vmatmul.mubr.bf16.vlgmr.msra.gmra.mrb[12].mxu0 %v1272_v33  ;;  %7392 = vmatprep.subr.bf16.mxu1 %v8119_v35  ;;  %v8167_v33 = vld [vmem:[%s10521_s1 + $0x5e0] sm:$0xff]  }
  0x84   :  { %7371 = vmatpush3.bf16.msra.mxu0 %v8120_v36  ;;  %5514 = vmatprep.mubr.bf16.mxu0 %v1328_v7  ;;  %v8169_v35 = vld [vmem:[%s10521_s1 + $0x5a0] sm:$0xff]   ;;  %v8170_v36 = vld [vmem:[%s10521_s1 + $0x568] sm:$0xff]  }
  0x85   :  { %5475 = vmatmul.mubr.bf16.vlgmr.msra.gmra.mrb[12].mxu1 %v1288_v38  ;;  %7372 = vmatprep.subr.bf16.mxu0 %v8122_v39  ;;  %v8172_v38 = vld [vmem:[%s10521_s1 + $0x528] sm:$0xff]  }
  0x86   :  { %7393 = vmatpush3.bf16.msra.mxu1 %v8121_v37  ;;  %5554 = vmatprep.mubr.bf16.mxu1 %v1338_v11  ;;  %v8171_v37 = vld [vmem:[%s10521_s1 + $0x5e8] sm:$0xff]   ;;  %v8207_v11 = vld [vmem:[%s10521_s1 + $0x670] sm:$0xff]  }
  0x87   :  { %7394 = vmatprep.subr.bf16.mxu1 %v8123_v40  ;;  %v8173_v39 = vld [vmem:[%s10521_s1 + $0x5a8] sm:$0xff]   ;;  %v8174_v40 = vld [vmem:[%s10521_s1 + $0x570] sm:$0xff]  }
  0x88   :  { %7373 = vmatpush3.bf16.msra.mxu0 %v8124_v42  ;;  %v8175_v42 = vld [vmem:[%s10521_s1 + $0x5f0] sm:$0xff]   ;;  %v8203_v7 = vld [vmem:[%s10521_s1 + $0x668] sm:$0xff]  }
  0x89   :  { %7374 = vmatprep.subr.bf16.mxu0 %v8126_v44  ;;  %v8177_v44 = vld [vmem:[%s10521_s1 + $0x5b0] sm:$0xff]  }
  0x8a   :  { %7395 = vmatpush3.bf16.msra.mxu1 %v8125_v43  ;;  %v8176_v43 = vld [vmem:[%s10521_s1 + $0x530] sm:$0xff]  }
  0x8b   :  { %7396 = vmatprep.subr.bf16.mxu1 %v8127_v45  ;;  %v8178_v45 = vld [vmem:[%s10521_s1 + $0x578] sm:$0xff]  }
  0x8c   :  { %7375 = vmatpush3.bf16.msra.mxu0 %v8128_v46  ;;  %v8179_v46 = vld [vmem:[%s10521_s1 + $0x5f8] sm:$0xff]  }
  0x8d   :  { %7376 = vmatprep.subr.bf16.mxu0 %v8130_v48  ;;  %v8181_v48 = vld [vmem:[%s10521_s1 + $0x5b8] sm:$0xff]  }
  0x8e   :  { %7397 = vmatpush3.bf16.msra.mxu1 %v8129_v47  ;;  %v8180_v47 = vld [vmem:[%s10521_s1 + $0x538] sm:$0xff]  }
  0x8f   :  { %7398 = vmatprep.subr.bf16.mxu1 %v8131_v49  ;;  %v1321_v49 = vrot.slane %v9122_v4, %v8724_v41  ;;  %v8200_v4 = vld [vmem:[%s10521_s1 + $0x6e0] sm:$0xff]  }
  0x90   :  { %7377 = vmatpush3.bf16.msra.mxu0 %v8132_v50  ;;  %v8183_v50 = vld [vmem:[%s10521_s1 + $0x640] sm:$0xff]  }
  0x91   :  { %7378 = vmatprep.subr.bf16.mxu0 %v8134_v52  ;;  %v8185_v52 = vld [vmem:[%s10521_s1 + $0x600] sm:$0xff]  }
  0x92   :  { %7399 = vmatpush3.bf16.msra.mxu1 %v8133_v51  ;;  %v8184_v51 = vld [vmem:[%s10521_s1 + $0x6c0] sm:$0xff]  }
  0x93   :  { %7400 = vmatprep.subr.bf16.mxu1 %v8135_v53  ;;  %v8186_v53 = vld [vmem:[%s10521_s1 + $0x680] sm:$0xff]  }
  0x94   :  { %7379 = vmatpush3.bf16.msra.mxu0 %v8136_v54  ;;  %v1337_v54 = vcombine.high %v1321_v49, %v1321_v49 }
  0x95   :  { %7380 = vmatprep.subr.bf16.mxu0 %v8138_v56  ;;  %v8188_v56 = vld [vmem:[%s10521_s1 + $0x6c8] sm:$0xff]  }
  0x96   :  { %7401 = vmatpush3.bf16.msra.mxu1 %v8137_v55  ;;  %v8187_v55 = vld [vmem:[%s10521_s1 + $0x648] sm:$0xff]  }
  0x97   :  { %7402 = vmatprep.subr.bf16.mxu1 %v8139_v57  ;;  %v8189_v57 = vld [vmem:[%s10521_s1 + $0x608] sm:$0xff]  }
  0x98   :  { %7381 = vmatpush3.bf16.msra.mxu0 %v8140_v58  ;;  %v8190_v58 = vld [vmem:[%s10521_s1 + $0x688] sm:$0xff]  }
  0x99   :  { %7382 = vmatprep.subr.bf16.mxu0 %v8142_v60  ;;  %v8192_v60 = vld [vmem:[%s10521_s1 + $0x6d0] sm:$0xff]  }
  0x9a   :  { %7403 = vmatpush3.bf16.msra.mxu1 %v8141_v59  ;;  %v8191_v59 = vld [vmem:[%s10521_s1 + $0x650] sm:$0xff]  }
  0x9b   :  { %7404 = vmatprep.subr.bf16.mxu1 %v8143_v62  ;;  %v8194_v62 = vld [vmem:[%s10521_s1 + $0x690] sm:$0xff]  }
  0x9c   :  { %7383 = vmatpush3.bf16.msra.mxu0 %v8144_v1  ;;  %v8197_v1 = vld [vmem:[%s10521_s1 + $0x618] sm:$0xff]  }
  0x9d   :  { %7384 = vmatprep.subr.bf16.mxu0 %v8146_v5  ;;  %v8201_v5 = vld [vmem:[%s10521_s1 + $0x620] sm:$0xff]  }
  0x9e   :  { %7405 = vmatpush3.bf16.msra.mxu1 %v8145_v2  ;;  %v8198_v2 = vld [vmem:[%s10521_s1 + $0x698] sm:$0xff]  }
  0x9f   :  { %7406 = vmatprep.subr.bf16.mxu1 %v8147_v6  ;;  %v8202_v6 = vld [vmem:[%s10521_s1 + $0x6a0] sm:$0xff]  }
  0xa0   :  { %7385 = vmatpush3.bf16.msra.mxu0 %v8148_v9  ;;  %v8205_v9 = vld [vmem:[%s10521_s1 + $0x628] sm:$0xff]  }
  0xa1   :  { %7414 = vmatprep.subr.bf16.mxu0 %v8150_v13  ;;  %v8208_v13 = vld [vmem:[%s10521_s1 + $0x6f0] sm:$0xff]  }
  0xa2   :  { %7407 = vmatpush3.bf16.msra.mxu1 %v8149_v10  ;;  %v8206_v10 = vld [vmem:[%s10521_s1 + $0x6a8] sm:$0xff]  }
  0xa3   :  { %5515 = vmatmul.mubr.bf16.vlgmr.msra.gmra.mrb[16].mxu0 %v1314_v12  ;;  %7436 = vmatprep.subr.bf16.mxu1 %v8151_v14  ;;  %v19_v12 = vld [vmem:[%s10520_s0 + $0x18] sm:$0xff] }
  0xa4   :  { %7415 = vmatpush3.bf16.msra.mxu0 %v8152_v16  ;;  %5594 = vmatprep.mubr.bf16.mxu0 %v1335_v15  ;;  %v1347_v14 = vrot.slane %v19_v12, %v8724_v41  ;;  %v1340_v15 = vcombine.high %v19_v12, %v19_v12  ;;  %v8209_v16 = vld [vmem:[%s10521_s1 + $0x630] sm:$0xff]   ;;  %v8246_v12 = vld [vmem:[%s10521_s1 + $0x7b8] sm:$0xff]  }
  0xa5   :  { %5555 = vmatmul.mubr.bf16.vlgmr.msra.gmra.mrb[16].mxu1 %v1336_v18  ;;  %7416 = vmatprep.subr.bf16.mxu0 %v8154_v19 }
  0xa6   :  { %7437 = vmatpush3.bf16.msra.mxu1 %v8153_v17  ;;  %5634 = vmatprep.mubr.bf16.mxu1 %v1339_v21  ;;  %v8211_v17 = vld [vmem:[%s10521_s1 + $0x678] sm:$0xff]   ;;  %v1355_v18 = vcombine.high %v1347_v14, %v1347_v14  ;;  %v9328_v19 = vrot.slane %v1340_v15, %v8724_v41  ;;  %v8249_v15 = vld [vmem:[%s10521_s1 + $0x8c0] sm:$0xff]  }
  0xa7   :  { %7438 = vmatprep.subr.bf16.mxu1 %v8155_v20  ;;  %v8210_v20 = vld [vmem:[%s10521_s1 + $0x6b0] sm:$0xff]   ;;  %v8212_v21 = vld [vmem:[%s10521_s1 + $0x6f8] sm:$0xff]  }
  0xa8   :  { %7417 = vmatpush3.bf16.msra.mxu0 %v8156_v22  ;;  %v1377_v22 = vrot.slane %v1355_v18, %v8724_v41 }
  0xa9   :  { %7418 = vmatprep.subr.bf16.mxu0 %v8158_v24  ;;  %v8213_v24 = vld [vmem:[%s10521_s1 + $0x638] sm:$0xff]  }
  0xaa   :  { %7439 = vmatpush3.bf16.msra.mxu1 %v8157_v23  ;;  %v1356_v23 = vcombine.high %v9328_v19, %v9328_v19 }
  0xab   :  { %7440 = vmatprep.subr.bf16.mxu1 %v8159_v25  ;;  %v1387_v25 = vcombine.high %v1377_v22, %v1377_v22 }
  0xac   :  { %7419 = vmatpush3.bf16.msra.mxu0 %v8160_v26  ;;  %v1363_v26 = vrot.slane %v1347_v14, %v8724_v41  ;;  %v8248_v14 = vld [vmem:[%s10521_s1 + $0x840] sm:$0xff]  }
  0xad   :  { %7420 = vmatprep.subr.bf16.mxu0 %v8162_v28  ;;  %v8214_v28 = vld [vmem:[%s10521_s1 + $0x6b8] sm:$0xff]  }
  0xae   :  { %7441 = vmatpush3.bf16.msra.mxu1 %v8161_v27  ;;  %v8215_v27 = vld [vmem:[%s10521_s1 + $0x740] sm:$0xff]  }
  0xaf   :  { %7442 = vmatprep.subr.bf16.mxu1 %v8163_v29  ;;  %v1384_v29 = vrot.slane %v1356_v23, %v8724_v41  ;;  %v8256_v23 = vld [vmem:[%s10521_s1 + $0x850] sm:$0xff]  }
  0xb0   :  { %7421 = vmatpush3.bf16.msra.mxu0 %v8164_v30  ;;  %v8216_v30 = vld [vmem:[%s10521_s1 + $0x7c0] sm:$0xff]  }
  0xb1   :  { %7422 = vmatprep.subr.bf16.mxu0 %v8166_v32  ;;  %v1385_v32 = vcombine.high %v1363_v26, %v1363_v26 }
  0xb2   :  { %7443 = vmatpush3.bf16.msra.mxu1 %v8165_v31  ;;  %v8217_v31 = vld [vmem:[%s10521_s1 + $0x700] sm:$0xff]  }
  0xb3   :  { %7444 = vmatprep.subr.bf16.mxu1 %v8167_v33  ;;  %v8219_v33 = vld [vmem:[%s10521_s1 + $0x748] sm:$0xff]  }
  0xb4   :  { %7423 = vmatpush3.bf16.msra.mxu0 %v8168_v34  ;;  %v8218_v34 = vld [vmem:[%s10521_s1 + $0x780] sm:$0xff]  }
  0xb5   :  { %7424 = vmatprep.subr.bf16.mxu0 %v8170_v36  ;;  %v8220_v36 = vld [vmem:[%s10521_s1 + $0x7c8] sm:$0xff]  }
  0xb6   :  { %7445 = vmatpush3.bf16.msra.mxu1 %v8169_v35  ;;  %v1388_v35 = vcombine.high %v1384_v29, %v1384_v29 }
  0xb7   :  { %7446 = vmatprep.subr.bf16.mxu1 %v8171_v37  ;;  %v8221_v37 = vld [vmem:[%s10521_s1 + $0x708] sm:$0xff]  }
  0xb8   :  { %7425 = vmatpush3.bf16.msra.mxu0 %v8172_v38  ;;  %v8223_v38 = vld [vmem:[%s10521_s1 + $0x750] sm:$0xff]  }
  0xb9   :  { %7426 = vmatprep.subr.bf16.mxu0 %v8174_v40  ;;  %v8224_v40 = vld [vmem:[%s10521_s1 + $0x7d0] sm:$0xff]  }
  0xba   :  { %7447 = vmatpush3.bf16.msra.mxu1 %v8173_v39  ;;  %v8222_v39 = vld [vmem:[%s10521_s1 + $0x788] sm:$0xff]  }
  0xbb   :  { %7448 = vmatprep.subr.bf16.mxu1 %v8175_v42  ;;  %v8225_v42 = vld [vmem:[%s10521_s1 + $0x710] sm:$0xff]  }
  0xbc   :  { %7427 = vmatpush3.bf16.msra.mxu0 %v8176_v43  ;;  %v8227_v43 = vld [vmem:[%s10521_s1 + $0x758] sm:$0xff]  }
  0xbd   :  { %7428 = vmatprep.subr.bf16.mxu0 %v8178_v45  ;;  %v8228_v45 = vld [vmem:[%s10521_s1 + $0x7d8] sm:$0xff]  }
  0xbe   :  { %7449 = vmatpush3.bf16.msra.mxu1 %v8177_v44  ;;  %v8226_v44 = vld [vmem:[%s10521_s1 + $0x790] sm:$0xff]  }
  0xbf   :  { %7450 = vmatprep.subr.bf16.mxu1 %v8179_v46  ;;  %v8229_v46 = vld [vmem:[%s10521_s1 + $0x718] sm:$0xff]  }
  0xc0   :  { %7429 = vmatpush3.bf16.msra.mxu0 %v8180_v47  ;;  %v8230_v47 = vld [vmem:[%s10521_s1 + $0x798] sm:$0xff]  }
  0xc1   :  { %7458 = vmatprep.subr.bf16.mxu0 %v8183_v50  ;;  %v8233_v50 = vld [vmem:[%s10521_s1 + $0x720] sm:$0xff]  }
  0xc2   :  { %7451 = vmatpush3.bf16.msra.mxu1 %v8181_v48  ;;  %v8231_v48 = vld [vmem:[%s10521_s1 + $0x760] sm:$0xff]  }
  0xc3   :  { %5595 = vmatmul.mubr.bf16.vlgmr.msra.gmra.mrb[20].mxu0 %v1321_v49  ;;  %7480 = vmatprep.subr.bf16.mxu1 %v8184_v51  ;;  %v8232_v49 = vld [vmem:[%s10521_s1 + $0x7e0] sm:$0xff]  }
  0xc4   :  { %7459 = vmatpush3.bf16.msra.mxu0 %v8185_v52  ;;  %5674 = vmatprep.mubr.bf16.mxu0 %v1377_v22  ;;  %v8234_v51 = vld [vmem:[%s10521_s1 + $0x7a0] sm:$0xff]   ;;  %v8235_v52 = vld [vmem:[%s10521_s1 + $0x768] sm:$0xff]  }
  0xc5   :  { %5635 = vmatmul.mubr.bf16.vlgmr.msra.gmra.mrb[20].mxu1 %v1337_v54  ;;  %7460 = vmatprep.subr.bf16.mxu0 %v8187_v55  ;;  %v8237_v54 = vld [vmem:[%s10521_s1 + $0x728] sm:$0xff]  }
  0xc6   :  { %7481 = vmatpush3.bf16.msra.mxu1 %v8186_v53  ;;  %5714 = vmatprep.mubr.bf16.mxu1 %v1387_v25  ;;  %v8236_v53 = vld [vmem:[%s10521_s1 + $0x7e8] sm:$0xff]   ;;  %v8258_v25 = vld [vmem:[%s10521_s1 + $0x810] sm:$0xff]  }
  0xc7   :  { %7482 = vmatprep.subr.bf16.mxu1 %v8188_v56  ;;  %v8238_v55 = vld [vmem:[%s10521_s1 + $0x7a8] sm:$0xff]   ;;  %v6617_v56 = vld [vmem:[%s10522_s2] ss:$0 sm:$0xff] }
  0xc8   :  { %7461 = vmatpush3.bf16.msra.mxu0 %v8189_v57  ;;  %v8239_v57 = vld [vmem:[%s10521_s1 + $0x770] sm:$0xff]   ;;  %v8255_v22 = vld [vmem:[%s10521_s1 + $0x888] sm:$0xff]  }
  0xc9   :  { %7462 = vmatprep.subr.bf16.mxu0 %v8191_v59  ;;  %v8240_v59 = vld [vmem:[%s10521_s1 + $0x7f0] sm:$0xff]  }
  0xca   :  { %7483 = vmatpush3.bf16.msra.mxu1 %v8190_v58 }
  0xcb   :  { %7484 = vmatprep.subr.bf16.mxu1 %v8192_v60 }
  0xcc   :  { %7463 = vmatpush3.bf16.msra.mxu0 %v8193_v61  ;;  %v8241_v61 = vld [vmem:[%s10521_s1 + $0x730] sm:$0xff]  }
  0xcd   :  { %7464 = vmatprep.subr.bf16.mxu0 %v8195_v63 }
  0xce   :  { %7485 = vmatpush3.bf16.msra.mxu1 %v8194_v62 }
  0xcf   :  { %7486 = vmatprep.subr.bf16.mxu1 %v8196_v0 }
  0xd0   :  { %7465 = vmatpush3.bf16.msra.mxu0 %v8197_v1  ;;  %v8242_v1 = vld [vmem:[%s10521_s1 + $0x7b0] sm:$0xff]  }
  0xd1   :  { %7466 = vmatprep.subr.bf16.mxu0 %v8199_v3 }
  0xd2   :  { %7487 = vmatpush3.bf16.msra.mxu1 %v8198_v2  ;;  %v8243_v2 = vld [vmem:[%s10521_s1 + $0x778] sm:$0xff]  }
  0xd3   :  { %7488 = vmatprep.subr.bf16.mxu1 %v8200_v4 }
  0xd4   :  { %7467 = vmatpush3.bf16.msra.mxu0 %v8201_v5 }
  0xd5   :  { %7468 = vmatprep.subr.bf16.mxu0 %v8203_v7 }
  0xd6   :  { %7489 = vmatpush3.bf16.msra.mxu1 %v8202_v6 }
  0xd7   :  { %7490 = vmatprep.subr.bf16.mxu1 %v8204_v8  ;;  %v8244_v8 = vld [vmem:[%s10521_s1 + $0x7f8] sm:$0xff]  }
  0xd8   :  { %7469 = vmatpush3.bf16.msra.mxu0 %v8205_v9 }
  0xd9   :  { %7470 = vmatprep.subr.bf16.mxu0 %v8207_v11 }
  0xda   :  { %7491 = vmatpush3.bf16.msra.mxu1 %v8206_v10  ;;  %v8245_v10 = vld [vmem:[%s10521_s1 + $0x738] sm:$0xff]  }
  0xdb   :  { %7492 = vmatprep.subr.bf16.mxu1 %v8208_v13  ;;  %v1370_v13 = vrot.slane %v9328_v19, %v8724_v41  ;;  %v8252_v19 = vld [vmem:[%s10521_s1 + $0x848] sm:$0xff]  }
  0xdc   :  { %7471 = vmatpush3.bf16.msra.mxu0 %v8209_v16  ;;  %v8250_v16 = vld [vmem:[%s10521_s1 + $0x800] sm:$0xff]  }
  0xdd   :  { %7472 = vmatprep.subr.bf16.mxu0 %v8211_v17  ;;  %v8251_v17 = vld [vmem:[%s10521_s1 + $0x880] sm:$0xff]   ;;  %v1386_v18 = vcombine.high %v1370_v13, %v1370_v13 }
  0xde   :  { %7493 = vmatpush3.bf16.msra.mxu1 %v8210_v20  ;;  %v8253_v20 = vld [vmem:[%s10521_s1 + $0x8c8] sm:$0xff]  }
  0xdf   :  { %7494 = vmatprep.subr.bf16.mxu1 %v8212_v21  ;;  %v8254_v21 = vld [vmem:[%s10521_s1 + $0x808] sm:$0xff]  }
  0xe0   :  { %7473 = vmatpush3.bf16.msra.mxu0 %v8213_v24  ;;  %v8257_v24 = vld [vmem:[%s10521_s1 + $0x8d0] sm:$0xff]  }
  0xe1   :  { %7502 = vmatprep.subr.bf16.mxu0 %v8215_v27  ;;  %v8260_v27 = vld [vmem:[%s10521_s1 + $0x858] sm:$0xff]  }
  0xe2   :  { %7495 = vmatpush3.bf16.msra.mxu1 %v8214_v28  ;;  %v8261_v28 = vld [vmem:[%s10521_s1 + $0x8d8] sm:$0xff]  }
  0xe3   :  { %5675 = vmatmul.mubr.bf16.vlgmr.msra.gmra.mrb[24].mxu0 %v1363_v26  ;;  %7524 = vmatprep.subr.bf16.mxu1 %v8216_v30  ;;  %v8259_v26 = vld [vmem:[%s10521_s1 + $0x890] sm:$0xff]   ;;  %v8263_v30 = vld [vmem:[%s10521_s1 + $0x898] sm:$0xff]  }
  0xe4   :  { %7503 = vmatpush3.bf16.msra.mxu0 %v8217_v31  ;;  %5754 = vmatprep.mubr.bf16.mxu0 %v1384_v29  ;;  %v8262_v29 = vld [vmem:[%s10521_s1 + $0x818] sm:$0xff]   ;;  %v8264_v31 = vld [vmem:[%s10521_s1 + $0x860] sm:$0xff]  }
  0xe5   :  { %5715 = vmatmul.mubr.bf16.vlgmr.msra.gmra.mrb[24].mxu1 %v1385_v32  ;;  %7504 = vmatprep.subr.bf16.mxu0 %v8219_v33  ;;  %v8265_v32 = vld [vmem:[%s10521_s1 + $0x8e0] sm:$0xff]  }
  0xe6   :  { %7525 = vmatpush3.bf16.msra.mxu1 %v8218_v34  ;;  %5794 = vmatprep.mubr.bf16.mxu1 %v1388_v35  ;;  %v8266_v33 = vld [vmem:[%s10521_s1 + $0x820] sm:$0xff]   ;;  %v8268_v35 = vld [vmem:[%s10521_s1 + $0x868] sm:$0xff]  }
  0xe7   :  { %7526 = vmatprep.subr.bf16.mxu1 %v8220_v36  ;;  %v8267_v34 = vld [vmem:[%s10521_s1 + $0x8a0] sm:$0xff]   ;;  %v8269_v36 = vld [vmem:[%s10521_s1 + $0x8e8] sm:$0xff]  }
  0xe8   :  { %7505 = vmatpush3.bf16.msra.mxu0 %v8221_v37  ;;  %v8270_v37 = vld [vmem:[%s10521_s1 + $0x828] sm:$0xff]  }
  0xe9   :  { %7506 = vmatprep.subr.bf16.mxu0 %v8223_v38  ;;  %v8271_v38 = vld [vmem:[%s10521_s1 + $0x8a8] sm:$0xff]  }
  0xea   :  { %7527 = vmatpush3.bf16.msra.mxu1 %v8222_v39  ;;  %v8272_v39 = vld [vmem:[%s10521_s1 + $0x870] sm:$0xff]  }
  0xeb   :  { %7528 = vmatprep.subr.bf16.mxu1 %v8224_v40  ;;  %v8273_v40 = vld [vmem:[%s10521_s1 + $0x8f0] sm:$0xff]  }
  0xec   :  { %7507 = vmatpush3.bf16.msra.mxu0 %v8225_v42 }
  0xed   :  { %7508 = vmatprep.subr.bf16.mxu0 %v8227_v43  ;;  %v8274_v43 = vld [vmem:[%s10521_s1 + $0x830] sm:$0xff]  }
  0xee   :  { %7529 = vmatpush3.bf16.msra.mxu1 %v8226_v44 }
  0xef   :  { %7530 = vmatprep.subr.bf16.mxu1 %v8228_v45  ;;  %v20_v45 = vld [vmem:[%s10520_s0 + $0x20] sm:$0xff] }
  0xf0   :  { %7509 = vmatpush3.bf16.msra.mxu0 %v8229_v46 }
  0xf1   :  { %7510 = vmatprep.subr.bf16.mxu0 %v8231_v48 }
  0xf2   :  { %7531 = vmatpush3.bf16.msra.mxu1 %v8230_v47 }
  0xf3   :  { %7532 = vmatprep.subr.bf16.mxu1 %v8232_v49  ;;  %v8275_v49 = vld [vmem:[%s10521_s1 + $0x8b0] sm:$0xff]  }
  0xf4   :  { %7511 = vmatpush3.bf16.msra.mxu0 %v8233_v50  ;;  %v8276_v50 = vld [vmem:[%s10521_s1 + $0x878] sm:$0xff]  }
  0xf5   :  { %7512 = vmatprep.subr.bf16.mxu0 %v8235_v52  ;;  %v1389_v52 = vcombine.high %v20_v45, %v20_v45 }
  0xf6   :  { %7533 = vmatpush3.bf16.msra.mxu1 %v8234_v51  ;;  %v7210_v58 = vpop.f32.mrb[0].mxu0  ;;  %v1396_v51 = vrot.slane %v20_v45, %v8724_v41 }
  0xf7   :  { %v7211_v60 = vpop.f32.mrb[1].mxu0  ;;  %7534 = vmatprep.subr.bf16.mxu1 %v8236_v53  ;;  %v7232_v62 = vpop.f32.mrb[0].mxu1 }
  0xf8   :  { %v7212_v63 = vadd.f32 %v7211_v60, %v7210_v58  ;;  %v7213_v0 = vpop.f32.mrb[2].mxu0  ;;  %7513 = vmatpush3.bf16.msra.mxu0 %v8237_v54  ;;  %v7233_v3 = vpop.f32.mrb[1].mxu1  ;;  %v8277_v58 = vld [vmem:[%s10521_s1 + $0x8f8] sm:$0xff]  }
  0xf9   :  { %v7214_v4 = vpop.f32.mrb[3].mxu0  ;;  %7514 = vmatprep.subr.bf16.mxu0 %v8239_v57  ;;  %v7234_v6 = vadd.f32 %v7233_v3, %v7232_v62  ;;  %v7235_v7 = vpop.f32.mrb[2].mxu1  ;;  %v9549_v62 = vrot.slane %v1389_v52, %v8724_v41  ;;  %v8279_v0 = vld [vmem:[%s10521_s1 + $0x8b8] sm:$0xff]   ;;  %v8280_v3 = vld [vmem:[%s10521_s1 + $0x940] sm:$0xff]  }
  0xfa   :  { %v5197_v5 = vadd.f32 %v7212_v63, %v6617_v56  ;;  %7535 = vmatpush3.bf16.msra.mxu1 %v8238_v55  ;;  %v7236_v9 = vpop.f32.mrb[3].mxu1  ;;  %v8282_v7 = vld [vmem:[%s10521_s1 + $0x900] sm:$0xff]   ;;  %v8311_v52 = vld [vmem:[%s10521_s1 + $0x9b8] sm:$0xff]  }
  0xfb   :  { %7536 = vmatprep.subr.bf16.mxu1 %v8240_v59  ;;  %v1404_v59 = vcombine.high %v1396_v51, %v1396_v51  ;;  %v1405_v4 = vcombine.high %v9549_v62, %v9549_v62  ;;  %v8283_v9 = vld [vmem:[%s10521_s1 + $0x980] sm:$0xff]  }
  0xfc   :  { %v9443_v11 = vadd.f32 %v7234_v6, %v5197_v5  ;;  %7515 = vmatpush3.bf16.msra.mxu0 %v8241_v61  ;;  %v8278_v61 = vld [vmem:[%s10521_s1 + $0x838] sm:$0xff]   ;;  %v8281_v6 = vld [vmem:[%s10521_s1 + $0x9c0] sm:$0xff]  }
  0xfd   :  { %7516 = vmatprep.subr.bf16.mxu0 %v8243_v2  ;;  %v1412_v2 = vrot.slane %v1396_v51, %v8724_v41 }
  0xfe   :  { %7537 = vmatpush3.bf16.msra.mxu1 %v8242_v1  ;;  %v1426_v1 = vrot.slane %v1404_v59, %v8724_v41  ;;  %v8317_v59 = vld [vmem:[%s10521_s1 + $0xa48] sm:$0xff]  }
  0xff   :  { %7538 = vmatprep.subr.bf16.mxu1 %v8244_v8  ;;  %v1433_v8 = vrot.slane %v1405_v4, %v8724_v41  ;;  %v8326_v4 = vld [vmem:[%s10521_s1 + $0xad8] sm:$0xff]  }
 0x100   :  { %7517 = vmatpush3.bf16.msra.mxu0 %v8245_v10  ;;  %v1436_v5 = vcombine.high %v1426_v1, %v1426_v1  ;;  %v1434_v10 = vcombine.high %v1412_v2, %v1412_v2 }
 0x101   :  { %7546 = vmatprep.subr.bf16.mxu0 %v8248_v14  ;;  %v8286_v14 = vld [vmem:[%s10521_s1 + $0x908] sm:$0xff]  }
 0x102   :  { %7539 = vmatpush3.bf16.msra.mxu1 %v8246_v12  ;;  %v8285_v12 = vld [vmem:[%s10521_s1 + $0x9c8] sm:$0xff]  }
 0x103   :  { %5755 = vmatmul.mubr.bf16.vlgmr.msra.gmra.mrb[28].mxu0 %v1370_v13  ;;  %7568 = vmatprep.subr.bf16.mxu1 %v8249_v15  ;;  %v1437_v13 = vcombine.high %v1433_v8, %v1433_v8  ;;  %v8287_v15 = vld [vmem:[%s10521_s1 + $0x988] sm:$0xff]  }
 0x104   :  { %7547 = vmatpush3.bf16.msra.mxu0 %v8250_v16  ;;  %5834 = vmatprep.mubr.bf16.mxu0 %v1426_v1  ;;  %v8288_v16 = vld [vmem:[%s10521_s1 + $0x950] sm:$0xff]  }
 0x105   :  { %5795 = vmatmul.mubr.bf16.vlgmr.msra.gmra.mrb[28].mxu1 %v1386_v18  ;;  %7548 = vmatprep.subr.bf16.mxu0 %v8252_v19  ;;  %v8290_v18 = vld [vmem:[%s10521_s1 + $0x910] sm:$0xff]  }
 0x106   :  { %7569 = vmatpush3.bf16.msra.mxu1 %v8251_v17  ;;  %5874 = vmatprep.mubr.bf16.mxu1 %v1436_v5  ;;  %v8289_v17 = vld [vmem:[%s10521_s1 + $0x9d0] sm:$0xff]   ;;  %v8327_v5 = vld [vmem:[%s10521_s1 + $0xa18] sm:$0xff]  }
 0x107   :  { %7570 = vmatprep.subr.bf16.mxu1 %v8253_v20  ;;  %v8291_v19 = vld [vmem:[%s10521_s1 + $0x990] sm:$0xff]   ;;  %v8292_v20 = vld [vmem:[%s10521_s1 + $0x958] sm:$0xff]  }
 0x108   :  { %7549 = vmatpush3.bf16.msra.mxu0 %v8254_v21  ;;  %v8293_v21 = vld [vmem:[%s10521_s1 + $0x9d8] sm:$0xff]   ;;  %v8323_v1 = vld [vmem:[%s10521_s1 + $0xa10] sm:$0xff]  }
 0x109   :  { %7550 = vmatprep.subr.bf16.mxu0 %v8256_v23  ;;  %v8295_v23 = vld [vmem:[%s10521_s1 + $0x998] sm:$0xff]  }
 0x10a   :  { %7571 = vmatpush3.bf16.msra.mxu1 %v8255_v22  ;;  %v8294_v22 = vld [vmem:[%s10521_s1 + $0x918] sm:$0xff]  }
 0x10b   :  { %7572 = vmatprep.subr.bf16.mxu1 %v8257_v24  ;;  %v8296_v24 = vld [vmem:[%s10521_s1 + $0x960] sm:$0xff]  }
 0x10c   :  { %7551 = vmatpush3.bf16.msra.mxu0 %v8258_v25  ;;  %v8297_v25 = vld [vmem:[%s10521_s1 + $0x9e0] sm:$0xff]  }
 0x10d   :  { %7552 = vmatprep.subr.bf16.mxu0 %v8260_v27  ;;  %v8299_v27 = vld [vmem:[%s10521_s1 + $0x9a0] sm:$0xff]  }
 0x10e   :  { %7573 = vmatpush3.bf16.msra.mxu1 %v8259_v26  ;;  %v8298_v26 = vld [vmem:[%s10521_s1 + $0x920] sm:$0xff]  }
 0x10f   :  { %7574 = vmatprep.subr.bf16.mxu1 %v8261_v28  ;;  %v8300_v28 = vld [vmem:[%s10521_s1 + $0x968] sm:$0xff]  }
 0x110   :  { %7553 = vmatpush3.bf16.msra.mxu0 %v8262_v29  ;;  %v8301_v29 = vld [vmem:[%s10521_s1 + $0x9e8] sm:$0xff]  }
 0x111   :  { %7554 = vmatprep.subr.bf16.mxu0 %v8264_v31  ;;  %v8303_v31 = vld [vmem:[%s10521_s1 + $0x9a8] sm:$0xff]  }
 0x112   :  { %7575 = vmatpush3.bf16.msra.mxu1 %v8263_v30  ;;  %v8302_v30 = vld [vmem:[%s10521_s1 + $0x928] sm:$0xff]  }
 0x113   :  { %7576 = vmatprep.subr.bf16.mxu1 %v8265_v32  ;;  %v8304_v32 = vld [vmem:[%s10521_s1 + $0x970] sm:$0xff]  }
 0x114   :  { %7555 = vmatpush3.bf16.msra.mxu0 %v8266_v33 }
 0x115   :  { %7556 = vmatprep.subr.bf16.mxu0 %v8268_v35 }
 0x116   :  { %7577 = vmatpush3.bf16.msra.mxu1 %v8267_v34  ;;  %v7254_v42 = vpop.f32.mrb[4].mxu0  ;;  %v8305_v34 = vld [vmem:[%s10521_s1 + $0x9f0] sm:$0xff]  }
 0x117   :  { %v7255_v44 = vpop.f32.mrb[5].mxu0  ;;  %7578 = vmatprep.subr.bf16.mxu1 %v8269_v36  ;;  %v7276_v46 = vpop.f32.mrb[4].mxu1  ;;  %v8306_v36 = vld [vmem:[%s10521_s1 + $0x930] sm:$0xff]  }
 0x118   :  { %v7256_v47 = vadd.f32 %v7255_v44, %v7254_v42  ;;  %v7257_v48 = vpop.f32.mrb[6].mxu0  ;;  %7557 = vmatpush3.bf16.msra.mxu0 %v8270_v37  ;;  %v7277_v53 = vpop.f32.mrb[5].mxu1  ;;  %v8308_v42 = vld [vmem:[%s10521_s1 + $0x978] sm:$0xff]  }
 0x119   :  { %v7258_v54 = vpop.f32.mrb[7].mxu0  ;;  %7558 = vmatprep.subr.bf16.mxu0 %v8272_v39  ;;  %v7278_v56 = vadd.f32 %v7277_v53, %v7276_v46  ;;  %v7279_v57 = vpop.f32.mrb[6].mxu1  ;;  %v8309_v48 = vld [vmem:[%s10521_s1 + $0x9f8] sm:$0xff]   ;;  %v1419_v53 = vrot.slane %v9549_v62, %v8724_v41  ;;  %v8320_v62 = vld [vmem:[%s10521_s1 + $0xa88] sm:$0xff]  }
 0x11a   :  { %v5277_v55 = vadd.f32 %v7256_v47, %v9443_v11  ;;  %7579 = vmatpush3.bf16.msra.mxu1 %v8271_v38  ;;  %v7280_v60 = vpop.f32.mrb[7].mxu1  ;;  %v8284_v11 = vld [vmem:[%s10521_s1 + $0x948] sm:$0xff]   ;;  %v8313_v54 = vld [vmem:[%s10521_s1 + $0xa40] sm:$0xff]  }
 0x11b   :  { %7580 = vmatprep.subr.bf16.mxu1 %v8273_v40  ;;  %v8307_v40 = vld [vmem:[%s10521_s1 + $0x9b0] sm:$0xff]   ;;  %v8316_v57 = vld [vmem:[%s10521_s1 + $0xa80] sm:$0xff]   ;;  %v8318_v60 = vld [vmem:[%s10521_s1 + $0xac8] sm:$0xff]  }
 0x11c   :  { %v9551_v63 = vadd.f32 %v7278_v56, %v5277_v55  ;;  %7559 = vmatpush3.bf16.msra.mxu0 %v8274_v43  ;;  %v8314_v55 = vld [vmem:[%s10521_s1 + $0xac0] sm:$0xff]  }
 0x11d   :  { %7560 = vmatprep.subr.bf16.mxu0 %v8276_v50  ;;  %v8310_v50 = vld [vmem:[%s10521_s1 + $0x938] sm:$0xff]   ;;  %v8315_v56 = vld [vmem:[%s10521_s1 + $0xa00] sm:$0xff]  }
 0x11e   :  { %7581 = vmatpush3.bf16.msra.mxu1 %v8275_v49 }
 0x11f   :  { %7582 = vmatprep.subr.bf16.mxu1 %v8277_v58  ;;  %v1435_v58 = vcombine.high %v1419_v53, %v1419_v53 }
 0x120   :  { %7561 = vmatpush3.bf16.msra.mxu0 %v8278_v61  ;;  %v8319_v61 = vld [vmem:[%s10521_s1 + $0xa08] sm:$0xff]  }
 0x121   :  { %7590 = vmatprep.subr.bf16.mxu0 %v8280_v3  ;;  %v8325_v3 = vld [vmem:[%s10521_s1 + $0xa58] sm:$0xff]  }
 0x122   :  { %7583 = vmatpush3.bf16.msra.mxu1 %v8279_v0  ;;  %v8322_v0 = vld [vmem:[%s10521_s1 + $0xad0] sm:$0xff]  }
 0x123   :  { %5835 = vmatmul.mubr.bf16.vlgmr.msra.gmra.mrb[32].mxu0 %v1412_v2  ;;  %7612 = vmatprep.subr.bf16.mxu1 %v8281_v6  ;;  %v8324_v2 = vld [vmem:[%s10521_s1 + $0xa90] sm:$0xff]   ;;  %v8328_v6 = vld [vmem:[%s10521_s1 + $0xa98] sm:$0xff]  }
 0x124   :  { %7591 = vmatpush3.bf16.msra.mxu0 %v8282_v7  ;;  %5914 = vmatprep.mubr.bf16.mxu0 %v1433_v8  ;;  %v8329_v7 = vld [vmem:[%s10521_s1 + $0xa60] sm:$0xff]  }
 0x125   :  { %5875 = vmatmul.mubr.bf16.vlgmr.msra.gmra.mrb[32].mxu1 %v1434_v10  ;;  %7592 = vmatprep.subr.bf16.mxu0 %v8284_v11  ;;  %v8330_v8 = vld [vmem:[%s10521_s1 + $0xae0] sm:$0xff]   ;;  %v8333_v11 = vld [vmem:[%s10521_s1 + $0xa68] sm:$0xff]  }
 0x126   :  { %7613 = vmatpush3.bf16.msra.mxu1 %v8283_v9  ;;  %5954 = vmatprep.mubr.bf16.mxu1 %v1437_v13  ;;  %v8331_v9 = vld [vmem:[%s10521_s1 + $0xa20] sm:$0xff]   ;;  %v8335_v13 = vld [vmem:[%s10521_s1 + $0xa28] sm:$0xff]  }
 0x127   :  { %7614 = vmatprep.subr.bf16.mxu1 %v8285_v12  ;;  %v8332_v10 = vld [vmem:[%s10521_s1 + $0xaa0] sm:$0xff]   ;;  %v8334_v12 = vld [vmem:[%s10521_s1 + $0xae8] sm:$0xff]  }
 0x128   :  { %7593 = vmatpush3.bf16.msra.mxu0 %v8286_v14  ;;  %v8336_v14 = vld [vmem:[%s10521_s1 + $0xaa8] sm:$0xff]  }
 0x129   :  { %7594 = vmatprep.subr.bf16.mxu0 %v8288_v16 }
 0x12a   :  { %7615 = vmatpush3.bf16.msra.mxu1 %v8287_v15  ;;  %v8337_v15 = vld [vmem:[%s10521_s1 + $0xa70] sm:$0xff]  }
 0x12b   :  { %7616 = vmatprep.subr.bf16.mxu1 %v8289_v17  ;;  %v8338_v17 = vld [vmem:[%s10521_s1 + $0xaf0] sm:$0xff]  }
 0x12c   :  { %7595 = vmatpush3.bf16.msra.mxu0 %v8290_v18 }
 0x12d   :  { %7596 = vmatprep.subr.bf16.mxu0 %v8292_v20 }
 0x12e   :  { %7617 = vmatpush3.bf16.msra.mxu1 %v8291_v19  ;;  %v8339_v19 = vld [vmem:[%s10521_s1 + $0xa30] sm:$0xff]  }
 0x12f   :  { %7618 = vmatprep.subr.bf16.mxu1 %v8293_v21 }
 0x130   :  { %7597 = vmatpush3.bf16.msra.mxu0 %v8294_v22 }
 0x131   :  { %7598 = vmatprep.subr.bf16.mxu0 %v8296_v24  ;;  %v8341_v24 = vld [vmem:[%s10521_s1 + $0xa78] sm:$0xff]  }
 0x132   :  { %7619 = vmatpush3.bf16.msra.mxu1 %v8295_v23  ;;  %v8340_v23 = vld [vmem:[%s10521_s1 + $0xab0] sm:$0xff]  }
 0x133   :  { %7620 = vmatprep.subr.bf16.mxu1 %v8297_v25  ;;  %v21_v25 = vld [vmem:[%s10520_s0 + $0x28] sm:$0xff] }
 0x134   :  { %7599 = vmatpush3.bf16.msra.mxu0 %v8298_v26 }
 0x135   :  { %7600 = vmatprep.subr.bf16.mxu0 %v8300_v28  ;;  %v1445_v28 = vrot.slane %v21_v25, %v8724_v41 }
 0x136   :  { %7621 = vmatpush3.bf16.msra.mxu1 %v8299_v27  ;;  %v7298_v33 = vpop.f32.mrb[8].mxu0 }
 0x137   :  { %v7299_v35 = vpop.f32.mrb[9].mxu0  ;;  %7622 = vmatprep.subr.bf16.mxu1 %v8301_v29  ;;  %v1438_v29 = vcombine.high %v21_v25, %v21_v25  ;;  %v8375_v25 = vld [vmem:[%s10521_s1 + $0xb38] sm:$0xff]  }
 0x138   :  { %v7320_v37 = vpop.f32.mrb[8].mxu1  ;;  %v7300_v38 = vadd.f32 %v7299_v35, %v7298_v33  ;;  %v7301_v39 = vpop.f32.mrb[10].mxu0  ;;  %7601 = vmatpush3.bf16.msra.mxu0 %v8302_v30  ;;  %v8342_v33 = vld [vmem:[%s10521_s1 + $0xaf8] sm:$0xff]  }
 0x139   :  { %v7321_v43 = vpop.f32.mrb[9].mxu1  ;;  %v7302_v44 = vpop.f32.mrb[11].mxu0  ;;  %7602 = vmatprep.subr.bf16.mxu0 %v8304_v32  ;;  %v8343_v35 = vld [vmem:[%s10521_s1 + $0xa38] sm:$0xff]  }
 0x13a   :  { %v5357_v45 = vadd.f32 %v7300_v38, %v9551_v63  ;;  %v7322_v46 = vadd.f32 %v7321_v43, %v7320_v37  ;;  %v7323_v47 = vpop.f32.mrb[10].mxu1  ;;  %7623 = vmatpush3.bf16.msra.mxu1 %v8303_v31  ;;  %v8321_v63 = vld [vmem:[%s10521_s1 + $0xa50] sm:$0xff]   ;;  %v9761_v37 = vrot.slane %v1438_v29, %v8724_v41  ;;  %v8344_v39 = vld [vmem:[%s10521_s1 + $0xab8] sm:$0xff]   ;;  %v8345_v43 = vld [vmem:[%s10521_s1 + $0xb40] sm:$0xff]  }
 0x13b   :  { %v7324_v49 = vpop.f32.mrb[11].mxu1  ;;  %7624 = vmatprep.subr.bf16.mxu1 %v8305_v34  ;;  %v8347_v47 = vld [vmem:[%s10521_s1 + $0xb00] sm:$0xff]  }
 0x13c   :  { %v9655_v51 = vadd.f32 %v7322_v46, %v5357_v45  ;;  %7603 = vmatpush3.bf16.msra.mxu0 %v8306_v36  ;;  %v1453_v36 = vcombine.high %v1445_v28, %v1445_v28  ;;  %v1454_v44 = vcombine.high %v9761_v37, %v9761_v37  ;;  %v8346_v45 = vld [vmem:[%s10521_s1 + $0xbc0] sm:$0xff]  }
 0x13d   :  { %7604 = vmatprep.subr.bf16.mxu0 %v8308_v42  ;;  %v1461_v42 = vrot.slane %v1445_v28, %v8724_v41  ;;  %v8348_v49 = vld [vmem:[%s10521_s1 + $0xb80] sm:$0xff]   ;;  %v1468_v28 = vrot.slane %v9761_v37, %v8724_v41  ;;  %v8385_v37 = vld [vmem:[%s10521_s1 + $0xc88] sm:$0xff]  }
 0x13e   :  { %7625 = vmatpush3.bf16.msra.mxu1 %v8307_v40  ;;  %v1475_v40 = vrot.slane %v1453_v36, %v8724_v41  ;;  %v8378_v29 = vld [vmem:[%s10521_s1 + $0xc40] sm:$0xff]   ;;  %v8384_v36 = vld [vmem:[%s10521_s1 + $0xc08] sm:$0xff]  }
 0x13f   :  { %7626 = vmatprep.subr.bf16.mxu1 %v8309_v48  ;;  %v1482_v48 = vrot.slane %v1454_v44, %v8724_v41  ;;  %v8391_v44 = vld [vmem:[%s10521_s1 + $0xcd8] sm:$0xff]  }
 0x140   :  { %7605 = vmatpush3.bf16.msra.mxu0 %v8310_v50  ;;  %v1485_v46 = vcombine.high %v1475_v40, %v1475_v40  ;;  %v1483_v50 = vcombine.high %v1461_v42, %v1461_v42 }
 0x141   :  { %7634 = vmatprep.subr.bf16.mxu0 %v8313_v54  ;;  %v8351_v54 = vld [vmem:[%s10521_s1 + $0xb08] sm:$0xff]  }
 0x142   :  { %7627 = vmatpush3.bf16.msra.mxu1 %v8311_v52  ;;  %v8350_v52 = vld [vmem:[%s10521_s1 + $0xbc8] sm:$0xff]  }
 0x143   :  { %5915 = vmatmul.mubr.bf16.vlgmr.msra.gmra.mrb[36].mxu0 %v1419_v53  ;;  %7656 = vmatprep.subr.bf16.mxu1 %v8314_v55  ;;  %v1486_v53 = vcombine.high %v1482_v48, %v1482_v48  ;;  %v8352_v55 = vld [vmem:[%s10521_s1 + $0xb88] sm:$0xff]  }
 0x144   :  { %7635 = vmatpush3.bf16.msra.mxu0 %v8315_v56  ;;  %5994 = vmatprep.mubr.bf16.mxu0 %v1475_v40  ;;  %v8353_v56 = vld [vmem:[%s10521_s1 + $0xb50] sm:$0xff]  }
 0x145   :  { %5955 = vmatmul.mubr.bf16.vlgmr.msra.gmra.mrb[36].mxu1 %v1435_v58  ;;  %7636 = vmatprep.subr.bf16.mxu0 %v8317_v59  ;;  %v8355_v58 = vld [vmem:[%s10521_s1 + $0xb10] sm:$0xff]  }
 0x146   :  { %7657 = vmatpush3.bf16.msra.mxu1 %v8316_v57  ;;  %6034 = vmatprep.mubr.bf16.mxu1 %v1485_v46  ;;  %v8354_v57 = vld [vmem:[%s10521_s1 + $0xbd0] sm:$0xff]   ;;  %v8393_v46 = vld [vmem:[%s10521_s1 + $0xc98] sm:$0xff]  }
 0x147   :  { %7658 = vmatprep.subr.bf16.mxu1 %v8318_v60  ;;  %v8356_v59 = vld [vmem:[%s10521_s1 + $0xb90] sm:$0xff]   ;;  %v8357_v60 = vld [vmem:[%s10521_s1 + $0xb58] sm:$0xff]  }
 0x148   :  { %7637 = vmatpush3.bf16.msra.mxu0 %v8319_v61  ;;  %v8358_v61 = vld [vmem:[%s10521_s1 + $0xbd8] sm:$0xff]   ;;  %v8388_v40 = vld [vmem:[%s10521_s1 + $0xc10] sm:$0xff]  }
 0x149   :  { %7638 = vmatprep.subr.bf16.mxu0 %v8321_v63  ;;  %v8360_v63 = vld [vmem:[%s10521_s1 + $0xb98] sm:$0xff]  }
 0x14a   :  { %7659 = vmatpush3.bf16.msra.mxu1 %v8320_v62  ;;  %v8359_v62 = vld [vmem:[%s10521_s1 + $0xb18] sm:$0xff]  }
 0x14b   :  { %7660 = vmatprep.subr.bf16.mxu1 %v8322_v0  ;;  %v8361_v0 = vld [vmem:[%s10521_s1 + $0xb60] sm:$0xff]  }
 0x14c   :  { %7639 = vmatpush3.bf16.msra.mxu0 %v8323_v1  ;;  %v8362_v1 = vld [vmem:[%s10521_s1 + $0xbe0] sm:$0xff]  }
 0x14d   :  { %7640 = vmatprep.subr.bf16.mxu0 %v8325_v3  ;;  %v8364_v3 = vld [vmem:[%s10521_s1 + $0xba0] sm:$0xff]  }
 0x14e   :  { %7661 = vmatpush3.bf16.msra.mxu1 %v8324_v2  ;;  %v8363_v2 = vld [vmem:[%s10521_s1 + $0xb20] sm:$0xff]  }
 0x14f   :  { %7662 = vmatprep.subr.bf16.mxu1 %v8326_v4  ;;  %v8365_v4 = vld [vmem:[%s10521_s1 + $0xb68] sm:$0xff]  }
 0x150   :  { %7641 = vmatpush3.bf16.msra.mxu0 %v8327_v5  ;;  %v8366_v5 = vld [vmem:[%s10521_s1 + $0xbe8] sm:$0xff]  }
 0x151   :  { %7642 = vmatprep.subr.bf16.mxu0 %v8329_v7  ;;  %v8368_v7 = vld [vmem:[%s10521_s1 + $0xba8] sm:$0xff]  }
 0x152   :  { %7663 = vmatpush3.bf16.msra.mxu1 %v8328_v6  ;;  %v8367_v6 = vld [vmem:[%s10521_s1 + $0xb28] sm:$0xff]  }
 0x153   :  { %7664 = vmatprep.subr.bf16.mxu1 %v8330_v8  ;;  %v8369_v8 = vld [vmem:[%s10521_s1 + $0xb70] sm:$0xff]  }
 0x154   :  { %7643 = vmatpush3.bf16.msra.mxu0 %v8331_v9 }
 0x155   :  { %7644 = vmatprep.subr.bf16.mxu0 %v8333_v11 }
 0x156   :  { %7665 = vmatpush3.bf16.msra.mxu1 %v8332_v10  ;;  %v7342_v16 = vpop.f32.mrb[12].mxu0  ;;  %v8370_v10 = vld [vmem:[%s10521_s1 + $0xbf0] sm:$0xff]  }
 0x157   :  { %v7343_v18 = vpop.f32.mrb[13].mxu0  ;;  %7666 = vmatprep.subr.bf16.mxu1 %v8334_v12  ;;  %v8371_v12 = vld [vmem:[%s10521_s1 + $0xb30] sm:$0xff]  }
 0x158   :  { %v7364_v20 = vpop.f32.mrb[12].mxu1  ;;  %v7344_v21 = vadd.f32 %v7343_v18, %v7342_v16  ;;  %v7345_v22 = vpop.f32.mrb[14].mxu0  ;;  %7645 = vmatpush3.bf16.msra.mxu0 %v8335_v13  ;;  %v8372_v16 = vld [vmem:[%s10521_s1 + $0xbb0] sm:$0xff]  }
 0x159   :  { %v7365_v26 = vpop.f32.mrb[13].mxu1  ;;  %v7346_v27 = vpop.f32.mrb[15].mxu0  ;;  %7646 = vmatprep.subr.bf16.mxu0 %v8337_v15 }
 0x15a   :  { %v5437_v30 = vadd.f32 %v7344_v21, %v9655_v51  ;;  %v7366_v31 = vadd.f32 %v7365_v26, %v7364_v20  ;;  %v7367_v32 = vpop.f32.mrb[14].mxu1  ;;  %7667 = vmatpush3.bf16.msra.mxu1 %v8336_v14  ;;  %v8349_v51 = vld [vmem:[%s10521_s1 + $0xb48] sm:$0xff]   ;;  %v8376_v27 = vld [vmem:[%s10521_s1 + $0xbb8] sm:$0xff]  }
 0x15b   :  { %v7368_v34 = vpop.f32.mrb[15].mxu1  ;;  %7668 = vmatprep.subr.bf16.mxu1 %v8338_v17  ;;  %v8373_v17 = vld [vmem:[%s10521_s1 + $0xb78] sm:$0xff]   ;;  %v8381_v32 = vld [vmem:[%s10521_s1 + $0xc80] sm:$0xff]  }
 0x15c   :  { %v9763_v38 = vadd.f32 %v7366_v31, %v5437_v30  ;;  %7647 = vmatpush3.bf16.msra.mxu0 %v8339_v19  ;;  %v8379_v30 = vld [vmem:[%s10521_s1 + $0xcc0] sm:$0xff]   ;;  %v8382_v34 = vld [vmem:[%s10521_s1 + $0xc48] sm:$0xff]  }
 0x15d   :  { %7648 = vmatprep.subr.bf16.mxu0 %v8341_v24  ;;  %v8380_v31 = vld [vmem:[%s10521_s1 + $0xc00] sm:$0xff]  }
 0x15e   :  { %7669 = vmatpush3.bf16.msra.mxu1 %v8340_v23  ;;  %v8374_v23 = vld [vmem:[%s10521_s1 + $0xbf8] sm:$0xff]  }
 0x15f   :  { %7670 = vmatprep.subr.bf16.mxu1 %v8342_v33  ;;  %v1484_v33 = vcombine.high %v1468_v28, %v1468_v28 }
 0x160   :  { %7649 = vmatpush3.bf16.msra.mxu0 %v8343_v35  ;;  %v8383_v35 = vld [vmem:[%s10521_s1 + $0xcc8] sm:$0xff]  }
 0x161   :  { %7678 = vmatprep.subr.bf16.mxu0 %v8345_v43  ;;  %v8390_v43 = vld [vmem:[%s10521_s1 + $0xc58] sm:$0xff]  }
 0x162   :  { %7671 = vmatpush3.bf16.msra.mxu1 %v8344_v39  ;;  %v8387_v39 = vld [vmem:[%s10521_s1 + $0xcd0] sm:$0xff]  }
 0x163   :  { %5995 = vmatmul.mubr.bf16.vlgmr.msra.gmra.mrb[40].mxu0 %v1461_v42  ;;  %7700 = vmatprep.subr.bf16.mxu1 %v8346_v45  ;;  %v8389_v42 = vld [vmem:[%s10521_s1 + $0xc90] sm:$0xff]   ;;  %v8392_v45 = vld [vmem:[%s10521_s1 + $0xc18] sm:$0xff]  }
 0x164   :  { %7679 = vmatpush3.bf16.msra.mxu0 %v8347_v47  ;;  %6074 = vmatprep.mubr.bf16.mxu0 %v1482_v48  ;;  %v8394_v47 = vld [vmem:[%s10521_s1 + $0xc60] sm:$0xff]  }
 0x165   :  { %6035 = vmatmul.mubr.bf16.vlgmr.msra.gmra.mrb[40].mxu1 %v1483_v50  ;;  %7680 = vmatprep.subr.bf16.mxu0 %v8349_v51  ;;  %v8395_v48 = vld [vmem:[%s10521_s1 + $0xce0] sm:$0xff]   ;;  %v8398_v51 = vld [vmem:[%s10521_s1 + $0xc68] sm:$0xff]  }
 0x166   :  { %7701 = vmatpush3.bf16.msra.mxu1 %v8348_v49  ;;  %6114 = vmatprep.mubr.bf16.mxu1 %v1486_v53  ;;  %v8396_v49 = vld [vmem:[%s10521_s1 + $0xc20] sm:$0xff]   ;;  %v8400_v53 = vld [vmem:[%s10521_s1 + $0xc28] sm:$0xff]  }
 0x167   :  { %7702 = vmatprep.subr.bf16.mxu1 %v8350_v52  ;;  %v8397_v50 = vld [vmem:[%s10521_s1 + $0xca0] sm:$0xff]   ;;  %v8399_v52 = vld [vmem:[%s10521_s1 + $0xce8] sm:$0xff]  }
 0x168   :  { %7681 = vmatpush3.bf16.msra.mxu0 %v8351_v54  ;;  %v8401_v54 = vld [vmem:[%s10521_s1 + $0xca8] sm:$0xff]  }
 0x169   :  { %7682 = vmatprep.subr.bf16.mxu0 %v8353_v56 }
 0x16a   :  { %7703 = vmatpush3.bf16.msra.mxu1 %v8352_v55  ;;  %v8402_v55 = vld [vmem:[%s10521_s1 + $0xc70] sm:$0xff]  }
 0x16b   :  { %7704 = vmatprep.subr.bf16.mxu1 %v8354_v57  ;;  %v8403_v57 = vld [vmem:[%s10521_s1 + $0xcf0] sm:$0xff]  }
 0x16c   :  { %7683 = vmatpush3.bf16.msra.mxu0 %v8355_v58 }
 0x16d   :  { %7684 = vmatprep.subr.bf16.mxu0 %v8357_v60 }
 0x16e   :  { %7705 = vmatpush3.bf16.msra.mxu1 %v8356_v59  ;;  %v8404_v59 = vld [vmem:[%s10521_s1 + $0xc30] sm:$0xff]  }
 0x16f   :  { %7706 = vmatprep.subr.bf16.mxu1 %v8358_v61 }
 0x170   :  { %7685 = vmatpush3.bf16.msra.mxu0 %v8359_v62 }
 0x171   :  { %7686 = vmatprep.subr.bf16.mxu0 %v8361_v0 }
 0x172   :  { %7707 = vmatpush3.bf16.msra.mxu1 %v8360_v63  ;;  %v8405_v63 = vld [vmem:[%s10521_s1 + $0xcb0] sm:$0xff]  }
 0x173   :  { %7708 = vmatprep.subr.bf16.mxu1 %v8362_v1 }
 0x174   :  { %7687 = vmatpush3.bf16.msra.mxu0 %v8363_v2  ;;  %v8406_v2 = vld [vmem:[%s10521_s1 + $0xc78] sm:$0xff]  }
 0x175   :  { %7688 = vmatprep.subr.bf16.mxu0 %v8365_v4 }
 0x176   :  { %7709 = vmatpush3.bf16.msra.mxu1 %v8364_v3  ;;  %v7386_v9 = vpop.f32.mrb[16].mxu0  ;;  %v22_v3 = vld [vmem:[%s10520_s0 + $0x30] sm:$0xff] }
 0x177   :  { %v7387_v11 = vpop.f32.mrb[17].mxu0  ;;  %7710 = vmatprep.subr.bf16.mxu1 %v8366_v5 }
 0x178   :  { %v7408_v13 = vpop.f32.mrb[16].mxu1  ;;  %v7388_v14 = vadd.f32 %v7387_v11, %v7386_v9  ;;  %v7389_v15 = vpop.f32.mrb[18].mxu0  ;;  %7689 = vmatpush3.bf16.msra.mxu0 %v8367_v6  ;;  %v1487_v9 = vcombine.high %v22_v3, %v22_v3  ;;  %v8408_v11 = vld [vmem:[%s10521_s1 + $0xc38] sm:$0xff]  }
 0x179   :  { %v7409_v18 = vpop.f32.mrb[17].mxu1  ;;  %v7390_v19 = vpop.f32.mrb[19].mxu0  ;;  %7690 = vmatprep.subr.bf16.mxu0 %v8369_v8  ;;  %v1494_v8 = vrot.slane %v22_v3, %v8724_v41  ;;  %v8441_v3 = vld [vmem:[%s10521_s1 + $0xdb8] sm:$0xff]  }
 0x17a   :  { %v5517_v20 = vadd.f32 %v7388_v14, %v9763_v38  ;;  %v7410_v21 = vadd.f32 %v7409_v18, %v7408_v13  ;;  %v7411_v22 = vpop.f32.mrb[18].mxu1  ;;  %7711 = vmatpush3.bf16.msra.mxu1 %v8368_v7  ;;  %v8386_v38 = vld [vmem:[%s10521_s1 + $0xc50] sm:$0xff]   ;;  %v8407_v7 = vld [vmem:[%s10521_s1 + $0xcf8] sm:$0xff]   ;;  %v9978_v15 = vrot.slane %v1487_v9, %v8724_v41  ;;  %v8411_v19 = vld [vmem:[%s10521_s1 + $0xdc0] sm:$0xff]  }
 0x17b   :  { %v7412_v24 = vpop.f32.mrb[19].mxu1  ;;  %7712 = vmatprep.subr.bf16.mxu1 %v8370_v10  ;;  %v8409_v13 = vld [vmem:[%s10521_s1 + $0xcb8] sm:$0xff]   ;;  %v1502_v14 = vcombine.high %v1494_v8, %v1494_v8 }
 0x17c   :  { %v9867_v26 = vadd.f32 %v7410_v21, %v5517_v20  ;;  %7691 = vmatpush3.bf16.msra.mxu0 %v8371_v12  ;;  %v1503_v20 = vcombine.high %v9978_v15, %v9978_v15  ;;  %v8412_v21 = vld [vmem:[%s10521_s1 + $0xd00] sm:$0xff]  }
 0x17d   :  { %7692 = vmatprep.subr.bf16.mxu0 %v8373_v17  ;;  %v8410_v17 = vld [vmem:[%s10521_s1 + $0xd40] sm:$0xff]   ;;  %v1524_v18 = vrot.slane %v1502_v14, %v8724_v41  ;;  %v8451_v14 = vld [vmem:[%s10521_s1 + $0xe50] sm:$0xff]  }
 0x17e   :  { %7713 = vmatpush3.bf16.msra.mxu1 %v8372_v16  ;;  %v1510_v16 = vrot.slane %v1494_v8, %v8724_v41  ;;  %v1531_v24 = vrot.slane %v1503_v20, %v8724_v41  ;;  %v8446_v8 = vld [vmem:[%s10521_s1 + $0xe80] sm:$0xff]   ;;  %v8457_v20 = vld [vmem:[%s10521_s1 + $0xe18] sm:$0xff]  }
 0x17f   :  { %7714 = vmatprep.subr.bf16.mxu1 %v8374_v23  ;;  %v1534_v22 = vcombine.high %v1524_v18, %v1524_v18  ;;  %v8413_v23 = vld [vmem:[%s10521_s1 + $0xd80] sm:$0xff]  }
 0x180   :  { %7693 = vmatpush3.bf16.msra.mxu0 %v8375_v25  ;;  %v1532_v25 = vcombine.high %v1510_v16, %v1510_v16 }
 0x181   :  { %7722 = vmatprep.subr.bf16.mxu0 %v8378_v29  ;;  %v8416_v29 = vld [vmem:[%s10521_s1 + $0xd08] sm:$0xff]  }
 0x182   :  { %7715 = vmatpush3.bf16.msra.mxu1 %v8376_v27  ;;  %v8415_v27 = vld [vmem:[%s10521_s1 + $0xdc8] sm:$0xff]  }
 0x183   :  { %6075 = vmatmul.mubr.bf16.vlgmr.msra.gmra.mrb[44].mxu0 %v1468_v28  ;;  %7744 = vmatprep.subr.bf16.mxu1 %v8379_v30  ;;  %v1535_v28 = vcombine.high %v1531_v24, %v1531_v24  ;;  %v8417_v30 = vld [vmem:[%s10521_s1 + $0xd88] sm:$0xff]  }
 0x184   :  { %7723 = vmatpush3.bf16.msra.mxu0 %v8380_v31  ;;  %6154 = vmatprep.mubr.bf16.mxu0 %v1524_v18  ;;  %v8418_v31 = vld [vmem:[%s10521_s1 + $0xd50] sm:$0xff]   ;;  %v8455_v18 = vld [vmem:[%s10521_s1 + $0xe58] sm:$0xff]  }
 0x185   :  { %6115 = vmatmul.mubr.bf16.vlgmr.msra.gmra.mrb[44].mxu1 %v1484_v33  ;;  %7724 = vmatprep.subr.bf16.mxu0 %v8382_v34  ;;  %v8420_v33 = vld [vmem:[%s10521_s1 + $0xd10] sm:$0xff]  }
 0x186   :  { %7745 = vmatpush3.bf16.msra.mxu1 %v8381_v32  ;;  %6194 = vmatprep.mubr.bf16.mxu1 %v1534_v22  ;;  %v8419_v32 = vld [vmem:[%s10521_s1 + $0xdd0] sm:$0xff]   ;;  %v8459_v22 = vld [vmem:[%s10521_s1 + $0xe60] sm:$0xff]  }
 0x187   :  { %7746 = vmatprep.subr.bf16.mxu1 %v8383_v35  ;;  %v8421_v34 = vld [vmem:[%s10521_s1 + $0xd90] sm:$0xff]   ;;  %v8422_v35 = vld [vmem:[%s10521_s1 + $0xd58] sm:$0xff]  }
 0x188   :  { %7725 = vmatpush3.bf16.msra.mxu0 %v8384_v36  ;;  %v8423_v36 = vld [vmem:[%s10521_s1 + $0xdd8] sm:$0xff]  }
 0x189   :  { %7726 = vmatprep.subr.bf16.mxu0 %v8386_v38  ;;  %v8425_v38 = vld [vmem:[%s10521_s1 + $0xd98] sm:$0xff]  }
 0x18a   :  { %7747 = vmatpush3.bf16.msra.mxu1 %v8385_v37  ;;  %v8424_v37 = vld [vmem:[%s10521_s1 + $0xd18] sm:$0xff]  }
 0x18b   :  { %7748 = vmatprep.subr.bf16.mxu1 %v8387_v39  ;;  %v8426_v39 = vld [vmem:[%s10521_s1 + $0xd60] sm:$0xff]  }
 0x18c   :  { %7727 = vmatpush3.bf16.msra.mxu0 %v8388_v40  ;;  %v8427_v40 = vld [vmem:[%s10521_s1 + $0xde0] sm:$0xff]  }
 0x18d   :  { %7728 = vmatprep.subr.bf16.mxu0 %v8390_v43  ;;  %v8429_v43 = vld [vmem:[%s10521_s1 + $0xda0] sm:$0xff]  }
 0x18e   :  { %7749 = vmatpush3.bf16.msra.mxu1 %v8389_v42  ;;  %v8428_v42 = vld [vmem:[%s10521_s1 + $0xd20] sm:$0xff]  }
 0x18f   :  { %7750 = vmatprep.subr.bf16.mxu1 %v8391_v44  ;;  %v8430_v44 = vld [vmem:[%s10521_s1 + $0xd68] sm:$0xff]  }
 0x190   :  { %7729 = vmatpush3.bf16.msra.mxu0 %v8392_v45  ;;  %v8431_v45 = vld [vmem:[%s10521_s1 + $0xde8] sm:$0xff]  }
 0x191   :  { %7730 = vmatprep.subr.bf16.mxu0 %v8394_v47  ;;  %v8433_v47 = vld [vmem:[%s10521_s1 + $0xda8] sm:$0xff]  }
 0x192   :  { %7751 = vmatpush3.bf16.msra.mxu1 %v8393_v46  ;;  %v8432_v46 = vld [vmem:[%s10521_s1 + $0xd28] sm:$0xff]  }
 0x193   :  { %7752 = vmatprep.subr.bf16.mxu1 %v8395_v48  ;;  %v8434_v48 = vld [vmem:[%s10521_s1 + $0xd70] sm:$0xff]  }
 0x194   :  { %7731 = vmatpush3.bf16.msra.mxu0 %v8396_v49 }
 0x195   :  { %7732 = vmatprep.subr.bf16.mxu0 %v8398_v51 }
 0x196   :  { %7753 = vmatpush3.bf16.msra.mxu1 %v8397_v50  ;;  %v7430_v56 = vpop.f32.mrb[20].mxu0  ;;  %v8435_v50 = vld [vmem:[%s10521_s1 + $0xdf0] sm:$0xff]  }
 0x197   :  { %v7431_v58 = vpop.f32.mrb[21].mxu0  ;;  %7754 = vmatprep.subr.bf16.mxu1 %v8399_v52  ;;  %v8436_v52 = vld [vmem:[%s10521_s1 + $0xd30] sm:$0xff]  }
 0x198   :  { %v7452_v60 = vpop.f32.mrb[20].mxu1  ;;  %v7432_v61 = vadd.f32 %v7431_v58, %v7430_v56  ;;  %v7433_v62 = vpop.f32.mrb[22].mxu0  ;;  %7733 = vmatpush3.bf16.msra.mxu0 %v8400_v53  ;;  %v8437_v56 = vld [vmem:[%s10521_s1 + $0xdb0] sm:$0xff]  }
 0x199   :  { %v7453_v0 = vpop.f32.mrb[21].mxu1  ;;  %v7434_v1 = vpop.f32.mrb[23].mxu0  ;;  %7734 = vmatprep.subr.bf16.mxu0 %v8402_v55 }
 0x19a   :  { %v5597_v4 = vadd.f32 %v7432_v61, %v9867_v26  ;;  %v7454_v5 = vadd.f32 %v7453_v0, %v7452_v60  ;;  %v7455_v6 = vpop.f32.mrb[22].mxu1  ;;  %7755 = vmatpush3.bf16.msra.mxu1 %v8401_v54  ;;  %v8414_v26 = vld [vmem:[%s10521_s1 + $0xd48] sm:$0xff]   ;;  %v8440_v1 = vld [vmem:[%s10521_s1 + $0xd38] sm:$0xff]  }
 0x19b   :  { %v7456_v10 = vpop.f32.mrb[23].mxu1  ;;  %7756 = vmatprep.subr.bf16.mxu1 %v8403_v57  ;;  %v8438_v57 = vld [vmem:[%s10521_s1 + $0xd78] sm:$0xff]   ;;  %v8444_v6 = vld [vmem:[%s10521_s1 + $0xec0] sm:$0xff]  }
 0x19c   :  { %v9972_v12 = vadd.f32 %v7454_v5, %v5597_v4  ;;  %7735 = vmatpush3.bf16.msra.mxu0 %v8404_v59  ;;  %v1517_v4 = vrot.slane %v9978_v15, %v8724_v41  ;;  %v8443_v5 = vld [vmem:[%s10521_s1 + $0xe40] sm:$0xff]   ;;  %v8447_v10 = vld [vmem:[%s10521_s1 + $0xe48] sm:$0xff]   ;;  %v8452_v15 = vld [vmem:[%s10521_s1 + $0xed0] sm:$0xff]  }
 0x19d   :  { %7736 = vmatprep.subr.bf16.mxu0 %v8406_v2 }
 0x19e   :  { %7757 = vmatpush3.bf16.msra.mxu1 %v8405_v63  ;;  %v8439_v63 = vld [vmem:[%s10521_s1 + $0xdf8] sm:$0xff]   ;;  %v1533_v9 = vcombine.high %v1517_v4, %v1517_v4 }
 0x19f   :  { %7758 = vmatprep.subr.bf16.mxu1 %v8407_v7  ;;  %v8445_v7 = vld [vmem:[%s10521_s1 + $0xe00] sm:$0xff]  }
 0x1a0   :  { %7737 = vmatpush3.bf16.msra.mxu0 %v8408_v11  ;;  %v8448_v11 = vld [vmem:[%s10521_s1 + $0xec8] sm:$0xff]  }
 0x1a1   :  { %7766 = vmatprep.subr.bf16.mxu0 %v8410_v17  ;;  %v8454_v17 = vld [vmem:[%s10521_s1 + $0xe90] sm:$0xff]  }
 0x1a2   :  { %7759 = vmatpush3.bf16.msra.mxu1 %v8409_v13  ;;  %v8450_v13 = vld [vmem:[%s10521_s1 + $0xe88] sm:$0xff]  }
 0x1a3   :  { %6155 = vmatmul.mubr.bf16.vlgmr.msra.gmra.mrb[48].mxu0 %v1510_v16  ;;  %7788 = vmatprep.subr.bf16.mxu1 %v8411_v19  ;;  %v8453_v16 = vld [vmem:[%s10521_s1 + $0xe10] sm:$0xff]   ;;  %v8456_v19 = vld [vmem:[%s10521_s1 + $0xed8] sm:$0xff]  }
 0x1a4   :  { %7767 = vmatpush3.bf16.msra.mxu0 %v8412_v21  ;;  %6234 = vmatprep.mubr.bf16.mxu0 %v1531_v24  ;;  %v8458_v21 = vld [vmem:[%s10521_s1 + $0xe98] sm:$0xff]   ;;  %v8461_v24 = vld [vmem:[%s10521_s1 + $0xe20] sm:$0xff]  }
 0x1a5   :  { %6195 = vmatmul.mubr.bf16.vlgmr.msra.gmra.mrb[48].mxu1 %v1532_v25  ;;  %7768 = vmatprep.subr.bf16.mxu0 %v8414_v26  ;;  %v8462_v25 = vld [vmem:[%s10521_s1 + $0xea0] sm:$0xff]   ;;  %v8463_v26 = vld [vmem:[%s10521_s1 + $0xe68] sm:$0xff]  }
 0x1a6   :  { %7789 = vmatpush3.bf16.msra.mxu1 %v8413_v23  ;;  %6274 = vmatprep.mubr.bf16.mxu1 %v1535_v28  ;;  %v8460_v23 = vld [vmem:[%s10521_s1 + $0xee0] sm:$0xff]   ;;  %v8465_v28 = vld [vmem:[%s10521_s1 + $0xe28] sm:$0xff]  }
 0x1a7   :  { %7790 = vmatprep.subr.bf16.mxu1 %v8415_v27  ;;  %v8464_v27 = vld [vmem:[%s10521_s1 + $0xee8] sm:$0xff]  }
 0x1a8   :  { %7769 = vmatpush3.bf16.msra.mxu0 %v8416_v29  ;;  %v8466_v29 = vld [vmem:[%s10521_s1 + $0xea8] sm:$0xff]  }
 0x1a9   :  { %7770 = vmatprep.subr.bf16.mxu0 %v8418_v31 }
 0x1aa   :  { %7791 = vmatpush3.bf16.msra.mxu1 %v8417_v30  ;;  %v8467_v30 = vld [vmem:[%s10521_s1 + $0xe70] sm:$0xff]  }
 0x1ab   :  { %7792 = vmatprep.subr.bf16.mxu1 %v8419_v32  ;;  %v8468_v32 = vld [vmem:[%s10521_s1 + $0xef0] sm:$0xff]  }
 0x1ac   :  { %7771 = vmatpush3.bf16.msra.mxu0 %v8420_v33 }
 0x1ad   :  { %7772 = vmatprep.subr.bf16.mxu0 %v8422_v35 }
 0x1ae   :  { %7793 = vmatpush3.bf16.msra.mxu1 %v8421_v34  ;;  %v8469_v34 = vld [vmem:[%s10521_s1 + $0xe30] sm:$0xff]  }
 0x1af   :  { %7794 = vmatprep.subr.bf16.mxu1 %v8423_v36 }
 0x1b0   :  { %7773 = vmatpush3.bf16.msra.mxu0 %v8424_v37 }
 0x1b1   :  { %7774 = vmatprep.subr.bf16.mxu0 %v8426_v39 }
 0x1b2   :  { %7795 = vmatpush3.bf16.msra.mxu1 %v8425_v38  ;;  %v8470_v38 = vld [vmem:[%s10521_s1 + $0xeb0] sm:$0xff]  }
 0x1b3   :  { %7796 = vmatprep.subr.bf16.mxu1 %v8427_v40 }
 0x1b4   :  { %7775 = vmatpush3.bf16.msra.mxu0 %v8428_v42  ;;  %v8471_v42 = vld [vmem:[%s10521_s1 + $0xe78] sm:$0xff]  }
 0x1b5   :  { %7776 = vmatprep.subr.bf16.mxu0 %v8430_v44 }
 0x1b6   :  { %7797 = vmatpush3.bf16.msra.mxu1 %v8429_v43  ;;  %v7474_v49 = vpop.f32.mrb[24].mxu0  ;;  %v8472_v43 = vld [vmem:[%s10521_s1 + $0xef8] sm:$0xff]  }
 0x1b7   :  { %v7475_v51 = vpop.f32.mrb[25].mxu0  ;;  %7798 = vmatprep.subr.bf16.mxu1 %v8431_v45 }
 0x1b8   :  { %v7496_v53 = vpop.f32.mrb[24].mxu1  ;;  %v7476_v54 = vadd.f32 %v7475_v51, %v7474_v49  ;;  %v7477_v55 = vpop.f32.mrb[26].mxu0  ;;  %7777 = vmatpush3.bf16.msra.mxu0 %v8432_v46  ;;  %v8473_v49 = vld [vmem:[%s10521_s1 + $0xe38] sm:$0xff]  }
 0x1b9   :  { %v7497_v58 = vpop.f32.mrb[25].mxu1  ;;  %v7478_v59 = vpop.f32.mrb[27].mxu0  ;;  %7778 = vmatprep.subr.bf16.mxu0 %v8434_v48 }
 0x1ba   :  { %v5677_v60 = vadd.f32 %v7476_v54, %v9972_v12  ;;  %v7498_v61 = vadd.f32 %v7497_v58, %v7496_v53  ;;  %v7499_v62 = vpop.f32.mrb[26].mxu1  ;;  %7799 = vmatpush3.bf16.msra.mxu1 %v8433_v47  ;;  %v8449_v12 = vld [vmem:[%s10521_s1 + $0xe08] sm:$0xff]   ;;  %v23_v47 = vld [vmem:[%s10520_s0 + $0x38] sm:$0xff]  ;;  %v8476_v58 = vld [vmem:[%s10521_s1 + $0xfc0] sm:$0xff]  }
 0x1bb   :  { %v7500_v0 = vpop.f32.mrb[27].mxu1  ;;  %7800 = vmatprep.subr.bf16.mxu1 %v8435_v50  ;;  %v1543_v50 = vrot.slane %v23_v47, %v8724_v41  ;;  %v1536_v51 = vcombine.high %v23_v47, %v23_v47  ;;  %v8474_v53 = vld [vmem:[%s10521_s1 + $0xeb8] sm:$0xff]   ;;  %v8478_v62 = vld [vmem:[%s10521_s1 + $0xf80] sm:$0xff]  }
 0x1bc   :  { %v10079_v2 = vadd.f32 %v7498_v61, %v5677_v60  ;;  %7779 = vmatpush3.bf16.msra.mxu0 %v8436_v52  ;;  %v8477_v60 = vld [vmem:[%s10521_s1 + $0xf00] sm:$0xff]  }
 0x1bd   :  { %7780 = vmatprep.subr.bf16.mxu0 %v8438_v57  ;;  %v1551_v54 = vcombine.high %v1543_v50, %v1543_v50  ;;  %v1559_v55 = vrot.slane %v1543_v50, %v8724_v41  ;;  %v10194_v57 = vrot.slane %v1536_v51, %v8724_v41  ;;  %v8510_v47 = vld [vmem:[%s10521_s1 + $0x1000] sm:$0xff]   ;;  %v8512_v50 = vld [vmem:[%s10521_s1 + $0x1048] sm:$0xff]  }
 0x1be   :  { %7801 = vmatpush3.bf16.msra.mxu1 %v8437_v56  ;;  %v8475_v56 = vld [vmem:[%s10521_s1 + $0xf40] sm:$0xff]   ;;  %v8513_v51 = vld [vmem:[%s10521_s1 + $0x10c8] sm:$0xff]  }
 0x1bf   :  { %7802 = vmatprep.subr.bf16.mxu1 %v8439_v63  ;;  %v1573_v59 = vrot.slane %v1551_v54, %v8724_v41  ;;  %v1552_v61 = vcombine.high %v10194_v57, %v10194_v57  ;;  %v1581_v0 = vcombine.high %v1559_v55, %v1559_v55  ;;  %v8516_v54 = vld [vmem:[%s10521_s1 + $0x1050] sm:$0xff]  }
 0x1c0   :  { %7781 = vmatpush3.bf16.msra.mxu0 %v8440_v1  ;;  %v8479_v1 = vld [vmem:[%s10521_s1 + $0xf48] sm:$0xff]  }
 0x1c1   :  { %7810 = vmatprep.subr.bf16.mxu0 %v8443_v5  ;;  %v1583_v63 = vcombine.high %v1573_v59, %v1573_v59 }
 0x1c2   :  { %7803 = vmatpush3.bf16.msra.mxu1 %v8441_v3  ;;  %v8480_v3 = vld [vmem:[%s10521_s1 + $0xfc8] sm:$0xff]  }
 0x1c3   :  { %6235 = vmatmul.mubr.bf16.vlgmr.msra.gmra.mrb[52].mxu0 %v1517_v4  ;;  %7832 = vmatprep.subr.bf16.mxu1 %v8444_v6  ;;  %v8481_v4 = vld [vmem:[%s10521_s1 + $0xf08] sm:$0xff]  }
 0x1c4   :  { %7811 = vmatpush3.bf16.msra.mxu0 %v8445_v7  ;;  %6314 = vmatprep.mubr.bf16.mxu0 %v1573_v59  ;;  %v8482_v6 = vld [vmem:[%s10521_s1 + $0xf88] sm:$0xff]   ;;  %v8483_v7 = vld [vmem:[%s10521_s1 + $0xf50] sm:$0xff]   ;;  %v8521_v59 = vld [vmem:[%s10521_s1 + $0x10d8] sm:$0xff]  }
 0x1c5   :  { %6275 = vmatmul.mubr.bf16.vlgmr.msra.gmra.mrb[52].mxu1 %v1533_v9  ;;  %7812 = vmatprep.subr.bf16.mxu0 %v8447_v10  ;;  %v8485_v9 = vld [vmem:[%s10521_s1 + $0xf10] sm:$0xff]  }
 0x1c6   :  { %7833 = vmatpush3.bf16.msra.mxu1 %v8446_v8  ;;  %6354 = vmatprep.mubr.bf16.mxu1 %v1583_v63  ;;  %v8484_v8 = vld [vmem:[%s10521_s1 + $0xfd0] sm:$0xff]   ;;  %v8525_v63 = vld [vmem:[%s10521_s1 + $0x10e0] sm:$0xff]  }
 0x1c7   :  { %7834 = vmatprep.subr.bf16.mxu1 %v8448_v11  ;;  %v8486_v10 = vld [vmem:[%s10521_s1 + $0xf90] sm:$0xff]   ;;  %v8487_v11 = vld [vmem:[%s10521_s1 + $0xf58] sm:$0xff]  }
 0x1c8   :  { %7813 = vmatpush3.bf16.msra.mxu0 %v8449_v12  ;;  %v8488_v12 = vld [vmem:[%s10521_s1 + $0xfd8] sm:$0xff]  }
 0x1c9   :  { %7814 = vmatprep.subr.bf16.mxu0 %v8451_v14  ;;  %v8490_v14 = vld [vmem:[%s10521_s1 + $0xf98] sm:$0xff]  }
 0x1ca   :  { %7835 = vmatpush3.bf16.msra.mxu1 %v8450_v13  ;;  %v8489_v13 = vld [vmem:[%s10521_s1 + $0xf18] sm:$0xff]  }
 0x1cb   :  { %7836 = vmatprep.subr.bf16.mxu1 %v8452_v15  ;;  %v8491_v15 = vld [vmem:[%s10521_s1 + $0xf60] sm:$0xff]  }
 0x1cc   :  { %7815 = vmatpush3.bf16.msra.mxu0 %v8453_v16  ;;  %v8492_v16 = vld [vmem:[%s10521_s1 + $0xfe0] sm:$0xff]  }
 0x1cd   :  { %7816 = vmatprep.subr.bf16.mxu0 %v8455_v18  ;;  %v8494_v18 = vld [vmem:[%s10521_s1 + $0xfa0] sm:$0xff]  }
 0x1ce   :  { %7837 = vmatpush3.bf16.msra.mxu1 %v8454_v17  ;;  %v8493_v17 = vld [vmem:[%s10521_s1 + $0xf20] sm:$0xff]  }
 0x1cf   :  { %7838 = vmatprep.subr.bf16.mxu1 %v8456_v19  ;;  %v8495_v19 = vld [vmem:[%s10521_s1 + $0xf68] sm:$0xff]  }
 0x1d0   :  { %7817 = vmatpush3.bf16.msra.mxu0 %v8457_v20  ;;  %v8496_v20 = vld [vmem:[%s10521_s1 + $0xfe8] sm:$0xff]  }
 0x1d1   :  { %7818 = vmatprep.subr.bf16.mxu0 %v8459_v22  ;;  %v8498_v22 = vld [vmem:[%s10521_s1 + $0xfa8] sm:$0xff]  }
 0x1d2   :  { %7839 = vmatpush3.bf16.msra.mxu1 %v8458_v21  ;;  %v8497_v21 = vld [vmem:[%s10521_s1 + $0xf28] sm:$0xff]  }
 0x1d3   :  { %7840 = vmatprep.subr.bf16.mxu1 %v8460_v23  ;;  %v8499_v23 = vld [vmem:[%s10521_s1 + $0xf70] sm:$0xff]  }
 0x1d4   :  { %7819 = vmatpush3.bf16.msra.mxu0 %v8461_v24 }
 0x1d5   :  { %7820 = vmatprep.subr.bf16.mxu0 %v8463_v26 }
 0x1d6   :  { %7841 = vmatpush3.bf16.msra.mxu1 %v8462_v25  ;;  %v7518_v31 = vpop.f32.mrb[28].mxu0  ;;  %v8500_v25 = vld [vmem:[%s10521_s1 + $0xff0] sm:$0xff]  }
 0x1d7   :  { %v7519_v33 = vpop.f32.mrb[29].mxu0  ;;  %7842 = vmatprep.subr.bf16.mxu1 %v8464_v27  ;;  %v8501_v27 = vld [vmem:[%s10521_s1 + $0xf30] sm:$0xff]  }
 0x1d8   :  { %v7540_v35 = vpop.f32.mrb[28].mxu1  ;;  %v7520_v36 = vadd.f32 %v7519_v33, %v7518_v31  ;;  %v7521_v37 = vpop.f32.mrb[30].mxu0  ;;  %7821 = vmatpush3.bf16.msra.mxu0 %v8465_v28  ;;  %v8502_v31 = vld [vmem:[%s10521_s1 + $0xfb0] sm:$0xff]  }
 0x1d9   :  { %v7541_v39 = vpop.f32.mrb[29].mxu1  ;;  %v7522_v40 = vpop.f32.mrb[31].mxu0  ;;  %7822 = vmatprep.subr.bf16.mxu0 %v8467_v30 }
 0x1da   :  { %v5757_v44 = vadd.f32 %v7520_v36, %v10079_v2  ;;  %v7542_v45 = vadd.f32 %v7541_v39, %v7540_v35  ;;  %v7543_v46 = vpop.f32.mrb[30].mxu1  ;;  %7843 = vmatpush3.bf16.msra.mxu1 %v8466_v29  ;;  %v1580_v2 = vrot.slane %v1552_v61, %v8724_v41  ;;  %v8505_v40 = vld [vmem:[%s10521_s1 + $0xf38] sm:$0xff]  }
 0x1db   :  { %v7544_v48 = vpop.f32.mrb[31].mxu1  ;;  %7844 = vmatprep.subr.bf16.mxu1 %v8468_v32  ;;  %v8503_v32 = vld [vmem:[%s10521_s1 + $0xf78] sm:$0xff]   ;;  %v8509_v46 = vld [vmem:[%s10521_s1 + $0x10c0] sm:$0xff]  }
 0x1dc   :  { %v10184_v52 = vadd.f32 %v7542_v45, %v5757_v44  ;;  %7823 = vmatpush3.bf16.msra.mxu0 %v8469_v34  ;;  %v1584_v5 = vcombine.high %v1580_v2, %v1580_v2  ;;  %v1566_v44 = vrot.slane %v10194_v57, %v8724_v41  ;;  %v8508_v45 = vld [vmem:[%s10521_s1 + $0x1040] sm:$0xff]   ;;  %v8519_v57 = vld [vmem:[%s10521_s1 + $0x1090] sm:$0xff]   ;;  %v8523_v61 = vld [vmem:[%s10521_s1 + $0x1098] sm:$0xff]  }
 0x1dd   :  { %7824 = vmatprep.subr.bf16.mxu0 %v8471_v42  ;;  %v8511_v48 = vld [vmem:[%s10521_s1 + $0x1080] sm:$0xff]  }
 0x1de   :  { %7845 = vmatpush3.bf16.msra.mxu1 %v8470_v38  ;;  %v8504_v38 = vld [vmem:[%s10521_s1 + $0xff8] sm:$0xff]  }
 0x1df   :  { %7846 = vmatprep.subr.bf16.mxu1 %v8472_v43  ;;  %v8506_v43 = vld [vmem:[%s10521_s1 + $0xfb8] sm:$0xff]  }
 0x1e0   :  { %7825 = vmatpush3.bf16.msra.mxu0 %v8473_v49  ;;  %v1582_v49 = vcombine.high %v1566_v44, %v1566_v44 }
 0x1e1   :  { %7854 = vmatprep.subr.bf16.mxu0 %v8475_v56  ;;  %v8518_v56 = vld [vmem:[%s10521_s1 + $0x1010] sm:$0xff]  }
 0x1e2   :  { %7847 = vmatpush3.bf16.msra.mxu1 %v8474_v53  ;;  %v8515_v53 = vld [vmem:[%s10521_s1 + $0x1088] sm:$0xff]  }
 0x1e3   :  { %6315 = vmatmul.mubr.bf16.vlgmr.msra.gmra.mrb[56].mxu0 %v1559_v55  ;;  %7876 = vmatprep.subr.bf16.mxu1 %v8476_v58  ;;  %v8517_v55 = vld [vmem:[%s10521_s1 + $0x10d0] sm:$0xff]   ;;  %v8520_v58 = vld [vmem:[%s10521_s1 + $0x1058] sm:$0xff]  }
 0x1e4   :  { %7855 = vmatpush3.bf16.msra.mxu0 %v8477_v60  ;;  %6394 = vmatprep.mubr.bf16.mxu0 %v1580_v2  ;;  %v8522_v60 = vld [vmem:[%s10521_s1 + $0x1018] sm:$0xff]   ;;  %v8528_v2 = vld [vmem:[%s10521_s1 + $0x1068] sm:$0xff]  }
 0x1e5   :  { %6355 = vmatmul.mubr.bf16.vlgmr.msra.gmra.mrb[56].mxu1 %v1581_v0  ;;  %7856 = vmatprep.subr.bf16.mxu0 %v8479_v1  ;;  %v8526_v0 = vld [vmem:[%s10521_s1 + $0x1020] sm:$0xff]  }
 0x1e6   :  { %7877 = vmatpush3.bf16.msra.mxu1 %v8478_v62  ;;  %6434 = vmatprep.mubr.bf16.mxu1 %v1584_v5  ;;  %v8524_v62 = vld [vmem:[%s10521_s1 + $0x1060] sm:$0xff]   ;;  %v8531_v5 = vld [vmem:[%s10521_s1 + $0x10a8] sm:$0xff]  }
 0x1e7   :  { %7878 = vmatprep.subr.bf16.mxu1 %v8480_v3  ;;  %v8527_v1 = vld [vmem:[%s10521_s1 + $0x10a0] sm:$0xff]   ;;  %v8529_v3 = vld [vmem:[%s10521_s1 + $0x10e8] sm:$0xff]  }
 0x1e8   :  { %7857 = vmatpush3.bf16.msra.mxu0 %v8481_v4  ;;  %v8530_v4 = vld [vmem:[%s10521_s1 + $0x1028] sm:$0xff]  }
 0x1e9   :  { %7858 = vmatprep.subr.bf16.mxu0 %v8483_v7 }
 0x1ea   :  { %7879 = vmatpush3.bf16.msra.mxu1 %v8482_v6  ;;  %v8532_v6 = vld [vmem:[%s10521_s1 + $0x1070] sm:$0xff]  }
 0x1eb   :  { %7880 = vmatprep.subr.bf16.mxu1 %v8484_v8  ;;  %v8533_v8 = vld [vmem:[%s10521_s1 + $0x10f0] sm:$0xff]  }
 0x1ec   :  { %7859 = vmatpush3.bf16.msra.mxu0 %v8485_v9 }
 0x1ed   :  { %7860 = vmatprep.subr.bf16.mxu0 %v8487_v11 }
 0x1ee   :  { %7881 = vmatpush3.bf16.msra.mxu1 %v8486_v10  ;;  %v8534_v10 = vld [vmem:[%s10521_s1 + $0x1030] sm:$0xff]  }
 0x1ef   :  { %7882 = vmatprep.subr.bf16.mxu1 %v8488_v12 }
 0x1f0   :  { %7861 = vmatpush3.bf16.msra.mxu0 %v8489_v13 }
 0x1f1   :  { %7862 = vmatprep.subr.bf16.mxu0 %v8491_v15 }
 0x1f2   :  { %7883 = vmatpush3.bf16.msra.mxu1 %v8490_v14 }
 0x1f3   :  { %7884 = vmatprep.subr.bf16.mxu1 %v8492_v16  ;;  %v8535_v16 = vld [vmem:[%s10521_s1 + $0x10b0] sm:$0xff]  }
 0x1f4   :  { %7863 = vmatpush3.bf16.msra.mxu0 %v8493_v17  ;;  %v8536_v17 = vld [vmem:[%s10521_s1 + $0x1078] sm:$0xff]  }
 0x1f5   :  { %7864 = vmatprep.subr.bf16.mxu0 %v8495_v19 }
 0x1f6   :  { %7885 = vmatpush3.bf16.msra.mxu1 %v8494_v18  ;;  %v7562_v24 = vpop.f32.mrb[32].mxu0 }
 0x1f7   :  { %v7563_v26 = vpop.f32.mrb[33].mxu0  ;;  %7886 = vmatprep.subr.bf16.mxu1 %v8496_v20 }
 0x1f8   :  { %v7584_v28 = vpop.f32.mrb[32].mxu1  ;;  %v7564_v29 = vadd.f32 %v7563_v26, %v7562_v24  ;;  %v7565_v30 = vpop.f32.mrb[34].mxu0  ;;  %7865 = vmatpush3.bf16.msra.mxu0 %v8497_v21  ;;  %v8537_v21 = vld [vmem:[%s10521_s1 + $0x10f8] sm:$0xff]  }
 0x1f9   :  { %v7585_v33 = vpop.f32.mrb[33].mxu1  ;;  %v7566_v34 = vpop.f32.mrb[35].mxu0  ;;  %7866 = vmatprep.subr.bf16.mxu0 %v8499_v23  ;;  %v24_v23 = vld [vmem:[%s10520_s0 + $0x40] sm:$0xff] }
 0x1fa   :  { %v5837_v35 = vadd.f32 %v7564_v29, %v10184_v52  ;;  %v7586_v36 = vadd.f32 %v7585_v33, %v7584_v28  ;;  %v7587_v37 = vpop.f32.mrb[34].mxu1  ;;  %7887 = vmatpush3.bf16.msra.mxu1 %v8498_v22  ;;  %v8514_v52 = vld [vmem:[%s10521_s1 + $0x1008] sm:$0xff]   ;;  %v1592_v26 = vrot.slane %v24_v23, %v8724_v41  ;;  %v8540_v28 = vld [vmem:[%s10521_s1 + $0x1140] sm:$0xff]   ;;  %v8539_v29 = vld [vmem:[%s10521_s1 + $0x10b8] sm:$0xff]  }
 0x1fb   :  { %v7588_v39 = vpop.f32.mrb[35].mxu1  ;;  %7888 = vmatprep.subr.bf16.mxu1 %v8500_v25  ;;  %v8538_v25 = vld [vmem:[%s10521_s1 + $0x1038] sm:$0xff]   ;;  %v8541_v33 = vld [vmem:[%s10521_s1 + $0x11c0] sm:$0xff]  }
 0x1fc   :  { %v10291_v42 = vadd.f32 %v7586_v36, %v5837_v35  ;;  %7867 = vmatpush3.bf16.msra.mxu0 %v8501_v27  ;;  %v1585_v27 = vcombine.high %v24_v23, %v24_v23  ;;  %v1600_v30 = vcombine.high %v1592_v26, %v1592_v26  ;;  %v8542_v35 = vld [vmem:[%s10521_s1 + $0x1100] sm:$0xff]  }
 0x1fd   :  { %7868 = vmatprep.subr.bf16.mxu0 %v8503_v32 }
 0x1fe   :  { %7889 = vmatpush3.bf16.msra.mxu1 %v8502_v31  ;;  %v1608_v31 = vrot.slane %v1592_v26, %v8724_v41  ;;  %v10406_v32 = vrot.slane %v1585_v27, %v8724_v41  ;;  %v1622_v34 = vrot.slane %v1600_v30, %v8724_v41 }
 0x1ff   :  { %7890 = vmatprep.subr.bf16.mxu1 %v8504_v38  ;;  %v8544_v38 = vld [vmem:[%s10521_s1 + $0x1148] sm:$0xff]  }
 0x200   :  { %7869 = vmatpush3.bf16.msra.mxu0 %v8505_v40  ;;  %v1601_v36 = vcombine.high %v10406_v32, %v10406_v32  ;;  %v1630_v37 = vcombine.high %v1608_v31, %v1608_v31  ;;  %v1632_v39 = vcombine.high %v1622_v34, %v1622_v34  ;;  %v8543_v40 = vld [vmem:[%s10521_s1 + $0x1180] sm:$0xff]  }
 0x201   :  { %7898 = vmatprep.subr.bf16.mxu0 %v8508_v45 }
 0x202   :  { %7891 = vmatpush3.bf16.msra.mxu1 %v8506_v43  ;;  %v8545_v43 = vld [vmem:[%s10521_s1 + $0x11c8] sm:$0xff]  }
 0x203   :  { %6395 = vmatmul.mubr.bf16.vlgmr.msra.gmra.mrb[60].mxu0 %v1566_v44  ;;  %7920 = vmatprep.subr.bf16.mxu1 %v8509_v46  ;;  %v8546_v44 = vld [vmem:[%s10521_s1 + $0x1108] sm:$0xff]   ;;  %v8548_v46 = vld [vmem:[%s10521_s1 + $0x1150] sm:$0xff]  }
 0x204   :  { %7899 = vmatpush3.bf16.msra.mxu0 %v8510_v47  ;;  %6474 = vmatprep.mubr.bf16.mxu0 %v1622_v34  ;;  %v8547_v47 = vld [vmem:[%s10521_s1 + $0x1188] sm:$0xff]  }
 0x205   :  { %6435 = vmatmul.mubr.bf16.vlgmr.msra.gmra.mrb[60].mxu1 %v1582_v49  ;;  %7900 = vmatprep.subr.bf16.mxu0 %v8512_v50  ;;  %v8550_v49 = vld [vmem:[%s10521_s1 + $0x1110] sm:$0xff]   ;;  %v8552_v50 = vld [vmem:[%s10521_s1 + $0x1158] sm:$0xff]  }
 0x206   :  { %7921 = vmatpush3.bf16.msra.mxu1 %v8511_v48  ;;  %6514 = vmatprep.mubr.bf16.mxu1 %v1632_v39  ;;  %v8549_v48 = vld [vmem:[%s10521_s1 + $0x11d0] sm:$0xff]  }
 0x207   :  { %7922 = vmatprep.subr.bf16.mxu1 %v8513_v51  ;;  %v8551_v51 = vld [vmem:[%s10521_s1 + $0x1190] sm:$0xff]  }
 0x208   :  { %7901 = vmatpush3.bf16.msra.mxu0 %v8514_v52  ;;  %v8553_v52 = vld [vmem:[%s10521_s1 + $0x11d8] sm:$0xff]  }
 0x209   :  { %7902 = vmatprep.subr.bf16.mxu0 %v8516_v54  ;;  %v8556_v54 = vld [vmem:[%s10521_s1 + $0x1160] sm:$0xff]  }
 0x20a   :  { %7923 = vmatpush3.bf16.msra.mxu1 %v8515_v53  ;;  %v8554_v53 = vld [vmem:[%s10521_s1 + $0x1118] sm:$0xff]  }
 0x20b   :  { %7924 = vmatprep.subr.bf16.mxu1 %v8517_v55  ;;  %v8555_v55 = vld [vmem:[%s10521_s1 + $0x1198] sm:$0xff]  }
 0x20c   :  { %7903 = vmatpush3.bf16.msra.mxu0 %v8518_v56  ;;  %v8557_v56 = vld [vmem:[%s10521_s1 + $0x11e0] sm:$0xff]  }
 0x20d   :  { %7904 = vmatprep.subr.bf16.mxu0 %v8520_v58  ;;  %v8560_v58 = vld [vmem:[%s10521_s1 + $0x1168] sm:$0xff]  }
 0x20e   :  { %7925 = vmatpush3.bf16.msra.mxu1 %v8519_v57  ;;  %v8558_v57 = vld [vmem:[%s10521_s1 + $0x1120] sm:$0xff]  }
 0x20f   :  { %7926 = vmatprep.subr.bf16.mxu1 %v8521_v59  ;;  %v8559_v59 = vld [vmem:[%s10521_s1 + $0x11a0] sm:$0xff]  }
 0x210   :  { %7905 = vmatpush3.bf16.msra.mxu0 %v8522_v60  ;;  %v8561_v60 = vld [vmem:[%s10521_s1 + $0x11e8] sm:$0xff]  }
 0x211   :  { %7906 = vmatprep.subr.bf16.mxu0 %v8524_v62  ;;  %v8564_v62 = vld [vmem:[%s10521_s1 + $0x1170] sm:$0xff]  }
 0x212   :  { %7927 = vmatpush3.bf16.msra.mxu1 %v8523_v61  ;;  %v8562_v61 = vld [vmem:[%s10521_s1 + $0x1128] sm:$0xff]  }
 0x213   :  { %7928 = vmatprep.subr.bf16.mxu1 %v8525_v63 }
 0x214   :  { %7907 = vmatpush3.bf16.msra.mxu0 %v8526_v0  ;;  %v8563_v0 = vld [vmem:[%s10521_s1 + $0x11a8] sm:$0xff]  }
 0x215   :  { %7908 = vmatprep.subr.bf16.mxu0 %v8528_v2  ;;  %v8565_v2 = vld [vmem:[%s10521_s1 + $0x11f0] sm:$0xff]  }
 0x216   :  { %7929 = vmatpush3.bf16.msra.mxu1 %v8527_v1  ;;  %v7606_v7 = vpop.f32.mrb[36].mxu0 }
 0x217   :  { %v7607_v9 = vpop.f32.mrb[37].mxu0  ;;  %7930 = vmatprep.subr.bf16.mxu1 %v8529_v3 }
 0x218   :  { %v7628_v11 = vpop.f32.mrb[36].mxu1  ;;  %v7608_v12 = vadd.f32 %v7607_v9, %v7606_v7  ;;  %v7609_v13 = vpop.f32.mrb[38].mxu0  ;;  %7909 = vmatpush3.bf16.msra.mxu0 %v8530_v4  ;;  %v8568_v7 = vld [vmem:[%s10521_s1 + $0x1178] sm:$0xff]  }
 0x219   :  { %v7629_v14 = vpop.f32.mrb[37].mxu1  ;;  %v7610_v15 = vpop.f32.mrb[39].mxu0  ;;  %7910 = vmatprep.subr.bf16.mxu0 %v8532_v6  ;;  %v8566_v6 = vld [vmem:[%s10521_s1 + $0x1130] sm:$0xff]  }
 0x21a   :  { %v5917_v18 = vadd.f32 %v7608_v12, %v10291_v42  ;;  %v7630_v19 = vadd.f32 %v7629_v14, %v7628_v11  ;;  %v7631_v20 = vpop.f32.mrb[38].mxu1  ;;  %7931 = vmatpush3.bf16.msra.mxu1 %v8531_v5  ;;  %v1629_v42 = vrot.slane %v1601_v36, %v8724_v41  ;;  %v8567_v13 = vld [vmem:[%s10521_s1 + $0x11b0] sm:$0xff]   ;;  %v8569_v15 = vld [vmem:[%s10521_s1 + $0x11f8] sm:$0xff]  }
 0x21b   :  { %v7632_v22 = vpop.f32.mrb[39].mxu1  ;;  %7932 = vmatprep.subr.bf16.mxu1 %v8533_v8 }
 0x21c   :  { %v10392_v24 = vadd.f32 %v7630_v19, %v5917_v18  ;;  %7911 = vmatpush3.bf16.msra.mxu0 %v8534_v10  ;;  %v1633_v45 = vcombine.high %v1629_v42, %v1629_v42 }
 0x21d   :  { %7912 = vmatprep.subr.bf16.mxu0 %v8536_v17  ;;  %v8570_v17 = vld [vmem:[%s10521_s1 + $0x1138] sm:$0xff]  }
 0x21e   :  { %7933 = vmatpush3.bf16.msra.mxu1 %v8535_v16 }
 0x21f   :  { %7934 = vmatprep.subr.bf16.mxu1 %v8537_v21 }
 0x220   :  { %7913 = vmatpush3.bf16.msra.mxu0 %v8538_v25 }
 0x221   :  { %7942 = vmatprep.subr.bf16.mxu0 %v8540_v28 }
 0x222   :  { %7935 = vmatpush3.bf16.msra.mxu1 %v8539_v29 }
 0x223   :  { %6475 = vmatmul.mubr.bf16.vlgmr.msra.gmra.mrb[64].mxu0 %v1608_v31  ;;  %7964 = vmatprep.subr.bf16.mxu1 %v8541_v33 }
 0x224   :  { %7943 = vmatpush3.bf16.msra.mxu0 %v8542_v35  ;;  %6554 = vmatprep.mubr.bf16.mxu0 %v1629_v42 }
 0x225   :  { %6515 = vmatmul.mubr.bf16.vlgmr.msra.gmra.mrb[64].mxu1 %v1630_v37  ;;  %7944 = vmatprep.subr.bf16.mxu0 %v8544_v38 }
 0x226   :  { %7965 = vmatpush3.bf16.msra.mxu1 %v8543_v40  ;;  %6594 = vmatprep.mubr.bf16.mxu1 %v1633_v45 }
 0x227   :  { %7966 = vmatprep.subr.bf16.mxu1 %v8545_v43 }
 0x228   :  { %7945 = vmatpush3.bf16.msra.mxu0 %v8546_v44 }
 0x229   :  { %7946 = vmatprep.subr.bf16.mxu0 %v8548_v46 }
 0x22a   :  { %7967 = vmatpush3.bf16.msra.mxu1 %v8547_v47 }
 0x22b   :  { %7968 = vmatprep.subr.bf16.mxu1 %v8549_v48 }
 0x22c   :  { %7947 = vmatpush3.bf16.msra.mxu0 %v8550_v49 }
 0x22d   :  { %7948 = vmatprep.subr.bf16.mxu0 %v8552_v50 }
 0x22e   :  { %7969 = vmatpush3.bf16.msra.mxu1 %v8551_v51 }
 0x22f   :  { %7970 = vmatprep.subr.bf16.mxu1 %v8553_v52 }
 0x230   :  { %7949 = vmatpush3.bf16.msra.mxu0 %v8554_v53 }
 0x231   :  { %7950 = vmatprep.subr.bf16.mxu0 %v8556_v54 }
 0x232   :  { %7971 = vmatpush3.bf16.msra.mxu1 %v8555_v55 }
 0x233   :  { %7972 = vmatprep.subr.bf16.mxu1 %v8557_v56 }
 0x234   :  { %7951 = vmatpush3.bf16.msra.mxu0 %v8558_v57 }
 0x235   :  { %7952 = vmatprep.subr.bf16.mxu0 %v8560_v58 }
 0x236   :  { %7973 = vmatpush3.bf16.msra.mxu1 %v8559_v59  ;;  %v7650_v63 = vpop.f32.mrb[40].mxu0 }
 0x237   :  { %v7651_v1 = vpop.f32.mrb[41].mxu0  ;;  %7974 = vmatprep.subr.bf16.mxu1 %v8561_v60 }
 0x238   :  { %v7672_v3 = vpop.f32.mrb[40].mxu1  ;;  %v7652_v4 = vadd.f32 %v7651_v1, %v7650_v63  ;;  %v7653_v5 = vpop.f32.mrb[42].mxu0  ;;  %7953 = vmatpush3.bf16.msra.mxu0 %v8562_v61 }
 0x239   :  { %v7673_v8 = vpop.f32.mrb[41].mxu1  ;;  %v7654_v9 = vpop.f32.mrb[43].mxu0  ;;  %7954 = vmatprep.subr.bf16.mxu0 %v8564_v62 }
 0x23a   :  { %v5997_v10 = vadd.f32 %v7652_v4, %v10392_v24  ;;  %v7674_v11 = vadd.f32 %v7673_v8, %v7672_v3  ;;  %v7675_v12 = vpop.f32.mrb[42].mxu1  ;;  %7975 = vmatpush3.bf16.msra.mxu1 %v8563_v0 }
 0x23b   :  { %v7676_v14 = vpop.f32.mrb[43].mxu1  ;;  %7976 = vmatprep.subr.bf16.mxu1 %v8565_v2 }
 0x23c   :  { %v6037_v16 = vadd.f32 %v7674_v11, %v5997_v10  ;;  %7955 = vmatpush3.bf16.msra.mxu0 %v8566_v6 }
 0x23d   :  { %8 = vsyncpa [#allocation3], 0  ;;  %7956 = vmatprep.subr.bf16.mxu0 %v8568_v7  ;;  %v1615_v18 = vrot.slane %v10406_v32, %v8724_v41  ;;  %v8571_v19 = vld [vmem:[%s10521_s1 + $0x11b8] sm:$0xff]   ;;  %s8598_s1 = smov [#allocation2]  }
 0x23e   :  { %7977 = vmatpush3.bf16.msra.mxu1 %v8567_v13  ;;  %s6609_s23 = sshll.u32 %s8598_s1, 4  ;;  %s6610_s23 = int_to_ptr.vmem [resolvable:$true] %s6609_s23 }
 0x23f   :  { %7978 = vmatprep.subr.bf16.mxu1 %v8569_v15  ;;  %v1631_v20 = vcombine.high %v1615_v18, %v1615_v18  ;;  %s8573_s24 = scalar_lea.vmem %s6610_s23, 32  ;;  %p8578_p1 = scmp.lt.s32.totalorder %s6610_s23, %s6610_s23 }
 0x240   :  { %7957 = vmatpush3.bf16.msra.mxu0 %v8570_v17  ;;  %p8574_p0 = scmp.ne.s32.totalorder %s6610_s23, %s8573_s24  ;;  %p8579_p2 = scmp.lt.s32.totalorder %s8573_s24, %s8573_s24 }
 0x242   :  { %7979 = vmatpush3.bf16.msra.mxu1 %v8571_v19  ;;  %p8580_p3 = por %p8579_p2, %p8578_p1 }
 0x243   :  { %6555 = vmatmul.mubr.bf16.vlgmr.msra.gmra.mrb[68].mxu0 %v1615_v18 }
 0x244   :  { %p8581_p4 = pnand %p8580_p3, %p8574_p0 }
 0x245   :  { %6595 = vmatmul.mubr.bf16.vlgmr.msra.gmra.mrb[68].mxu1 %v1631_v20 }
 0x256   :  { %v7694_v21 = vpop.f32.mrb[44].mxu0 }
 0x257   :  { %v7695_v22 = vpop.f32.mrb[45].mxu0 }
 0x258   :  { %v7716_v23 = vpop.f32.mrb[44].mxu1  ;;  %v7696_v24 = vadd.f32 %v7695_v22, %v7694_v21  ;;  %v7697_v25 = vpop.f32.mrb[46].mxu0 }
 0x259   :  { %v7717_v26 = vpop.f32.mrb[45].mxu1  ;;  %v7698_v27 = vpop.f32.mrb[47].mxu0 }
 0x25a   :  { %v6077_v28 = vadd.f32 %v7696_v24, %v6037_v16  ;;  %v7718_v41 = vadd.f32 %v7717_v26, %v7716_v23  ;;  %v7719_v29 = vpop.f32.mrb[46].mxu1 }
 0x25b   :  { %v7720_v30 = vpop.f32.mrb[47].mxu1 }
 0x25c   :  { %v6117_v31 = vadd.f32 %v7718_v41, %v6077_v28 }
 0x276   :  { %v7738_v32 = vpop.f32.mrb[48].mxu0 }
 0x277   :  { %v7739_v33 = vpop.f32.mrb[49].mxu0 }
 0x278   :  { %v7760_v34 = vpop.f32.mrb[48].mxu1  ;;  %v7740_v35 = vadd.f32 %v7739_v33, %v7738_v32  ;;  %v7741_v36 = vpop.f32.mrb[50].mxu0 }
 0x279   :  { %v7761_v37 = vpop.f32.mrb[49].mxu1  ;;  %v7742_v38 = vpop.f32.mrb[51].mxu0 }
 0x27a   :  { %v6157_v39 = vadd.f32 %v7740_v35, %v6117_v31  ;;  %v7762_v40 = vadd.f32 %v7761_v37, %v7760_v34  ;;  %v7763_v42 = vpop.f32.mrb[50].mxu1 }
 0x27b   :  { %v7764_v43 = vpop.f32.mrb[51].mxu1 }
 0x27c   :  { %v6197_v44 = vadd.f32 %v7762_v40, %v6157_v39 }
 0x296   :  { %v7782_v45 = vpop.f32.mrb[52].mxu0 }
 0x297   :  { %v7783_v46 = vpop.f32.mrb[53].mxu0 }
 0x298   :  { %v7804_v47 = vpop.f32.mrb[52].mxu1  ;;  %v7784_v48 = vadd.f32 %v7783_v46, %v7782_v45  ;;  %v7785_v49 = vpop.f32.mrb[54].mxu0 }
 0x299   :  { %v7805_v50 = vpop.f32.mrb[53].mxu1  ;;  %v7786_v51 = vpop.f32.mrb[55].mxu0 }
 0x29a   :  { %v6237_v52 = vadd.f32 %v7784_v48, %v6197_v44  ;;  %v7806_v53 = vadd.f32 %v7805_v50, %v7804_v47  ;;  %v7807_v54 = vpop.f32.mrb[54].mxu1 }
 0x29b   :  { %v7808_v55 = vpop.f32.mrb[55].mxu1 }
 0x29c   :  { %v6277_v56 = vadd.f32 %v7806_v53, %v6237_v52 }
 0x2b6   :  { %v7826_v57 = vpop.f32.mrb[56].mxu0 }
 0x2b7   :  { %v7827_v58 = vpop.f32.mrb[57].mxu0 }
 0x2b8   :  { %v7848_v59 = vpop.f32.mrb[56].mxu1  ;;  %v7828_v60 = vadd.f32 %v7827_v58, %v7826_v57  ;;  %v7829_v61 = vpop.f32.mrb[58].mxu0 }
 0x2b9   :  { %v7849_v62 = vpop.f32.mrb[57].mxu1  ;;  %v7830_v63 = vpop.f32.mrb[59].mxu0 }
 0x2ba   :  { %v6317_v0 = vadd.f32 %v7828_v60, %v6277_v56  ;;  %v7850_v1 = vadd.f32 %v7849_v62, %v7848_v59  ;;  %v7851_v2 = vpop.f32.mrb[58].mxu1 }
 0x2bb   :  { %v7852_v3 = vpop.f32.mrb[59].mxu1 }
 0x2bc   :  { %v6357_v4 = vadd.f32 %v7850_v1, %v6317_v0 }
 0x2d6   :  { %v7870_v5 = vpop.f32.mrb[60].mxu0 }
 0x2d7   :  { %v7871_v6 = vpop.f32.mrb[61].mxu0 }
 0x2d8   :  { %v7892_v7 = vpop.f32.mrb[60].mxu1  ;;  %v7872_v8 = vadd.f32 %v7871_v6, %v7870_v5  ;;  %v7873_v9 = vpop.f32.mrb[62].mxu0 }
 0x2d9   :  { %v7893_v10 = vpop.f32.mrb[61].mxu1  ;;  %v7874_v11 = vpop.f32.mrb[63].mxu0 }
 0x2da   :  { %v6397_v12 = vadd.f32 %v7872_v8, %v6357_v4  ;;  %v7894_v13 = vadd.f32 %v7893_v10, %v7892_v7  ;;  %v7895_v14 = vpop.f32.mrb[62].mxu1 }
 0x2db   :  { %v7896_v15 = vpop.f32.mrb[63].mxu1 }
 0x2dc   :  { %v6437_v16 = vadd.f32 %v7894_v13, %v6397_v12 }
 0x2f6   :  { %v7914_v17 = vpop.f32.mrb[64].mxu0 }
 0x2f7   :  { %v7915_v18 = vpop.f32.mrb[65].mxu0 }
 0x2f8   :  { %v7936_v19 = vpop.f32.mrb[64].mxu1  ;;  %v7916_v20 = vadd.f32 %v7915_v18, %v7914_v17  ;;  %v7917_v21 = vpop.f32.mrb[66].mxu0 }
 0x2f9   :  { %v7937_v22 = vpop.f32.mrb[65].mxu1  ;;  %v7918_v23 = vpop.f32.mrb[67].mxu0 }
 0x2fa   :  { %v6477_v24 = vadd.f32 %v7916_v20, %v6437_v16  ;;  %v7938_v25 = vadd.f32 %v7937_v22, %v7936_v19  ;;  %v7939_v26 = vpop.f32.mrb[66].mxu1 }
 0x2fb   :  { %v7940_v27 = vpop.f32.mrb[67].mxu1 }
 0x2fc   :  { %v6517_v28 = vadd.f32 %v7938_v25, %v6477_v24 }
 0x316   :  { %v7958_v41 = vpop.f32.mrb[68].mxu0 }
 0x317   :  { %v7959_v29 = vpop.f32.mrb[69].mxu0 }
 0x318   :  { %v7980_v30 = vpop.f32.mrb[68].mxu1  ;;  %v7960_v31 = vadd.f32 %v7959_v29, %v7958_v41  ;;  %v7961_v32 = vpop.f32.mrb[70].mxu0 }
 0x319   :  { %v7981_v33 = vpop.f32.mrb[69].mxu1  ;;  %v7962_v34 = vpop.f32.mrb[71].mxu0 }
 0x31a   :  { %v6557_v35 = vadd.f32 %v7960_v31, %v6517_v28  ;;  %v7982_v36 = vadd.f32 %v7981_v33, %v7980_v30  ;;  %v7983_v37 = vpop.f32.mrb[70].mxu1 }
 0x31b   :  { %v7984_v38 = vpop.f32.mrb[71].mxu1 }
 0x31c   :  { %v6597_v39 = vadd.f32 %v7982_v36, %v6557_v35 }
 0x31e   :  { %6602 = vst [vmem:[#allocation2] sm:$0x3] %v6597_v39 }
 0x31f   :  { %8584 = shalt.err (!%p8581_p4)
}
 0x320   :  { %s8585_s27 = scalar_lea.hbm %s10523_s3, 32 }
 0x321   :  { %p8586_p5 = scmp.ne.s32.totalorder %s10523_s3, %s8585_s27  ;;  %p8589_p6 = scmp.lt.u32.totalorder %s8585_s27, %s10523_s3 }
 0x323   :  { %p8591_p7 = pnand %p8589_p6, %p8586_p5 }
 0x325   :  { %8594 = shalt.err (!%p8591_p7)
}
 0x326   :  { %6612 = dma.vmem_to_hbm [thread:$0]  %s6610_s23, 32, %s10523_s3, [#allocation3]  }
 0x327   :  { %8595 = dma.done.wait [#allocation3], 32  }
 0x328   :  { %8596 = vsyncadd [#allocation3], 4294967264 }
 0x329   :  { %6616 = vsyncpa [#allocation3], 1 }

</bundles_post_ra>
